<compile_context>
chip_gen: v6e
topology: v6e:2x2x1
jax: 0.10.0
libtpu: 0.0.40
codegen_flags: <defaults>
</compile_context>

<pallas_src>
import functools
import math

import jax
import jax.numpy as jnp
from jax.experimental import pallas as pl
from jax.experimental.pallas import tpu as pltpu

PAD_IDX = 0
NEG_BIAS = -1e9            # finite additive key-pad mask (safe under f32 max-subtract)


# ----------------------------------------------------------------------------
# Kernel
# ----------------------------------------------------------------------------
def _layer_norm(x, gamma, beta, eps=1e-5):
    mu = jnp.mean(x, axis=-1, keepdims=True)
    var = jnp.mean(jnp.square(x - mu), axis=-1, keepdims=True)
    return (x - mu) * jax.lax.rsqrt(var + eps) * gamma + beta


def transformer_encoder_kernel(
        # inputs ------------------------------------------------------------
        x_ref, kbias_ref, qg_ref,
        wqkv_ref, bqkv_ref, wo_ref, bo_ref, g1_ref, be1_ref,
        w1_ref, bf1_ref, w2_ref, bf2_ref, g2_ref, be2_ref,
        fcw_ref, fcb_ref,
        # outputs -----------------------------------------------------------
        hid_ref, out_ref,
        # scratch -----------------------------------------------------------
        x_scr, ctx_scr,
        *, n_head, d_k, d_v, weights_resident, use_vpu_attn):
    li = pl.program_id(1)
    n_layers = pl.num_programs(1)
    # Resident weights: index the full layer stack with the (dynamic) layer id.
    # Streaming weights: the BlockSpec already selected this layer -> index 0.
    wi = li if weights_resident else 0

    # Load the fresh activation only on the first layer step of this batch
    # tile; afterwards the activation lives in VMEM scratch (no HBM traffic).
    @pl.when(li == 0)
    def _():
        x_scr[...] = x_ref[...].astype(jnp.float32)

    TB, L, D = x_scr.shape
    hk = n_head * d_k
    hv = n_head * d_v

    x3 = x_scr[...]                                    # (TB, L, D) f32 carry
    x2b = x3.reshape(TB * L, D).astype(jnp.bfloat16)   # flattened matmul LHS

    kbias = kbias_ref[...]           # (TB, 1, L) additive key mask, 0 / -1e9 (f32)
    qmask = qg_ref[:, :, 0:1]        # (TB, L, 1) 1.0 valid token / 0.0 pad

    # --- multi-head self-attention: fused QKV projection ---------------------
    qkv = (jnp.dot(x2b, wqkv_ref[wi], preferred_element_type=jnp.float32)
           + bqkv_ref[wi])                             # (TB*L, 2*H*dk + H*dv)
    q = qkv[:, :hk] * (1.0 / math.sqrt(d_k))           # fold softmax scale once
    k = qkv[:, hk:2 * hk]
    v = qkv[:, 2 * hk:]
    q3 = q.reshape(TB, L, hk)
    k3 = k.reshape(TB, L, hk)
    v3 = v.reshape(TB, L, hv)
    if not use_vpu_attn:                               # MXU path wants bf16 operands
        q3 = q3.astype(jnp.bfloat16)
        k3 = k3.astype(jnp.bfloat16)
        v3 = v3.astype(jnp.bfloat16)

    for h in range(n_head):                            # static unroll over heads
        qh = q3[:, :, h * d_k:(h + 1) * d_k]           # (TB, L, d_k)
        kh = k3[:, :, h * d_k:(h + 1) * d_k]
        vh = v3[:, :, h * d_v:(h + 1) * d_v]
        if use_vpu_attn:
            # Tiny L / d_k: VPU broadcast-multiply-reduce (no tiny vmatmuls,
            # no implicit k-transpose relayout).
            s = jnp.sum(qh[:, :, None, :] * kh[:, None, :, :], axis=-1)
        else:
            s = jnp.einsum('bld,bmd->blm', qh, kh,
                           preferred_element_type=jnp.float32)
        s = s + kbias                                  # hoisted additive pad mask
        s = s - jnp.max(s, axis=-1, keepdims=True)     # f32 softmax
        p = jnp.exp(s)
        p = p * pl.reciprocal(jnp.sum(p, axis=-1, keepdims=True), approx=True)
        if use_vpu_attn:
            ctx_h = jnp.sum(p[:, :, :, None] * vh[:, None, :, :], axis=2)
        else:
            ctx_h = jnp.einsum('blm,bmd->bld', p.astype(jnp.bfloat16), vh,
                               preferred_element_type=jnp.float32)
        # Sliced store into the bf16 context scratch (replaces lane-dim concat).
        ctx_scr[:, :, h * d_v:(h + 1) * d_v] = ctx_h.astype(jnp.bfloat16)

    # One full-width output projection over all heads at once.
    ctx2b = ctx_scr[...].reshape(TB * L, hv)
    attn = jnp.dot(ctx2b, wo_ref[wi], preferred_element_type=jnp.float32) + bo_ref[wi]

    y = _layer_norm(attn.reshape(TB, L, D) + x3, g1_ref[wi], be1_ref[wi])
    y = y * qmask

    # --- position-wise feed-forward ------------------------------------------
    y2b = y.reshape(TB * L, D).astype(jnp.bfloat16)
    h1 = jnp.maximum(
        jnp.dot(y2b, w1_ref[wi], preferred_element_type=jnp.float32) + bf1_ref[wi],
        0.0)
    h2 = (jnp.dot(h1.astype(jnp.bfloat16), w2_ref[wi],
                  preferred_element_type=jnp.float32) + bf2_ref[wi])

    z = _layer_norm(h2.reshape(TB, L, D) + y, g2_ref[wi], be2_ref[wi])
    z = z * qmask
    x_scr[...] = z                                     # carry to the next layer

    # --- last-layer epilogue: gather last valid token + fc (fused) -----------
    @pl.when(li == n_layers - 1)
    def _():
        gather = qg_ref[:, :, 1:2]                     # (TB, L, 1) indicator
        hidden = jnp.sum(z * gather, axis=1)           # (TB, D) f32
        hid_ref[...] = hidden[:, None, :]
        logits = (jnp.dot(hidden.astype(jnp.bfloat16), fcw_ref[...],
                          preferred_element_type=jnp.float32) + fcb_ref[...])
        out_ref[...] = logits[:, None, :]


# ----------------------------------------------------------------------------
# Tiling / VMEM heuristics
# ----------------------------------------------------------------------------
def _vmem_limit_bytes():
    phys = 128 * 1024 * 1024
    try:
        phys = int(pltpu.get_tpu_info().vmem_capacity_bytes)   # 64 MiB on v7x
    except Exception:
        pass
    return max(32 * 1024 * 1024, min(phys - 16 * 1024 * 1024, 100 * 1024 * 1024))


def _tile_vmem_bytes(tb, seq_len, d_model, d_qkv, d_ctx, d_inner):
    """Rough per-batch-tile activation footprint (bytes)."""
    rows = tb * seq_len
    b = rows * d_model * 4                    # f32 activation carry scratch
    b += 2 * rows * d_model * 2               # double-buffered bf16 input block
    b += rows * d_ctx * 2                     # bf16 per-head context scratch
    b += rows * d_qkv * 4                     # fused QKV activations (f32)
    b += rows * d_inner * (4 + 2)             # FFN hidden f32 + bf16 copy
    b += rows * d_model * (4 + 2) * 2         # residual / LN / matmul LHS temps
    b += tb * seq_len * seq_len * 4 * 4       # per-head score / prob temporaries
    b += 2 * tb * 8 * 128 * 4 * 2             # padded mask blocks (x2 buffers)
    return b


def _pick_batch_tile(batch, seq_len, d_model, d_qkv, d_ctx, d_inner, act_budget):
    best = 1
    for tb in range(1, batch + 1):
        if batch % tb:
            continue
        if _tile_vmem_bytes(tb, seq_len, d_model, d_qkv, d_ctx, d_inner) > act_budget:
            continue
        best = tb
        if tb * seq_len >= 1024:              # MXU rows saturated; stop growing
            break
    # Prefer >=2 batch tiles (megacore sharding of the "parallel" axis) when a
    # split still leaves >=256 MXU rows per tile.
    if batch // best < 2:
        for tb in range(best // 2, 0, -1):
            if batch % tb == 0 and tb * seq_len >= 256:
                best = tb
                break
    return best


# ----------------------------------------------------------------------------
# Wrapper
# ----------------------------------------------------------------------------
def transformer_encoder_apply(x, kbias, qg, stacked, fc_w, fc_b,
                              *, n_head, d_k, d_v):
    B, L, D = x.shape
    n_layers = stacked[0].shape[0]
    d_qkv = stacked[0].shape[-1]
    d_inner = stacked[6].shape[-1]
    d_ctx = n_head * d_v
    O = fc_w.shape[1]

    vmem_limit = _vmem_limit_bytes()
    TB = _pick_batch_tile(B, L, D, d_qkv, d_ctx, d_inner,
                          act_budget=vmem_limit // 2)
    grid = (B // TB, n_layers)

    tile_bytes = _tile_vmem_bytes(TB, L, D, d_qkv, d_ctx, d_inner)
    weight_bytes = sum(int(w.size) * w.dtype.itemsize for w in stacked)
    weight_bytes += int(fc_w.size) * fc_w.dtype.itemsize
    weight_bytes += int(fc_b.size) * fc_b.dtype.itemsize
    # Hold the whole layer stack VMEM-resident (DMA'd once for the entire grid)
    # when it fits beside the activation tile; otherwise stream per layer step.
    weights_resident = (2 * weight_bytes + tile_bytes) <= int(0.85 * vmem_limit)

    # Tiny L / head dims -> VPU attention; large shapes -> MXU einsum path.
    use_vpu_attn = (L <= 32 and d_k <= 32 and d_v <= 32)

    def batch_spec(shape):        # blocked over batch tiles, layer-invariant
        nd = len(shape)
        return pl.BlockSpec((TB,) + tuple(shape[1:]),
                            lambda b, l, nd=nd: (b,) + (0,) * (nd - 1))

    def weight_spec(shape):
        nd = len(shape)
        if weights_resident:      # whole stack resident, fetched once
            return pl.BlockSpec(tuple(shape), lambda b, l, nd=nd: (0,) * nd)
        return pl.BlockSpec((1,) + tuple(shape[1:]),   # stream one layer / step
                            lambda b, l, nd=nd: (l,) + (0,) * (nd - 1))

    def const_spec(shape):
        nd = len(shape)
        return pl.BlockSpec(tuple(shape), lambda b, l, nd=nd: (0,) * nd)

    in_specs = ([batch_spec(x.shape), batch_spec(kbias.shape), batch_spec(qg.shape)]
                + [weight_spec(w.shape) for w in stacked]
                + [const_spec(fc_w.shape), const_spec(fc_b.shape)])

    kernel = functools.partial(
        transformer_encoder_kernel, n_head=n_head, d_k=d_k, d_v=d_v,
        weights_resident=weights_resident, use_vpu_attn=use_vpu_attn)

    hidden, logits = pl.pallas_call(
        kernel,
        grid=grid,
        in_specs=in_specs,
        out_specs=[pl.BlockSpec((TB, 1, D), lambda b, l: (b, 0, 0)),
                   pl.BlockSpec((TB, 1, O), lambda b, l: (b, 0, 0))],
        out_shape=[jax.ShapeDtypeStruct((B, 1, D), jnp.float32),
                   jax.ShapeDtypeStruct((B, 1, O), jnp.float32)],
        scratch_shapes=[pltpu.VMEM((TB, L, D), jnp.float32),       # activation carry
                        pltpu.VMEM((TB, L, d_ctx), jnp.bfloat16)],  # per-head context
        compiler_params=pltpu.CompilerParams(
            dimension_semantics=("parallel", "arbitrary"),
            vmem_limit_bytes=int(vmem_limit)),
    )(x, kbias, qg, *stacked, fc_w, fc_b)
    return hidden[:, 0, :], logits[:, 0, :]


# ----------------------------------------------------------------------------
# Parameters / glue
# ----------------------------------------------------------------------------
def sinusoid_table(n_position, d_model):
    pos = jnp.arange(n_position, dtype=jnp.float32)[:, None]
    i = jnp.arange(d_model)[None, :]
    angle = pos / jnp.power(10000.0, (2 * (i // 2)).astype(jnp.float32) / d_model)
    tbl = jnp.where(i % 2 == 0, jnp.sin(angle), jnp.cos(angle))
    tbl = tbl.at[0].set(0.0)                  # padding position -> zero encoding
    return tbl.astype(jnp.float32)


def init_params(key, vocab_size, output_size, max_seq_len, d_model,
                n_layers, n_head, d_k, d_v, d_inner):
    keys = jax.random.split(key, 2 + n_layers)

    def rnd(k, shape, scale=0.05):
        return jax.random.normal(k, shape, dtype=jnp.float32) * scale

    word_emb = rnd(keys[0], (vocab_size, d_model)).at[PAD_IDX].set(0.0)
    pos_table = sinusoid_table(max_seq_len + 1, d_model)

    layers = []
    for li in range(n_layers):
        lk = jax.random.split(keys[2 + li], 6)
        layers.append((
            rnd(lk[0], (d_model, n_head * d_k)), jnp.zeros((1, n_head * d_k), jnp.float32),
            rnd(lk[1], (d_model, n_head * d_k)), jnp.zeros((1, n_head * d_k), jnp.float32),
            rnd(lk[2], (d_model, n_head * d_v)), jnp.zeros((1, n_head * d_v), jnp.float32),
            rnd(lk[3], (n_head * d_v, d_model)), jnp.zeros((1, d_model), jnp.float32),
            jnp.ones((1, d_model), jnp.float32), jnp.zeros((1, d_model), jnp.float32),
            rnd(lk[4], (d_model, d_inner)),      jnp.zeros((1, d_inner), jnp.float32),
            rnd(lk[5], (d_inner, d_model)),      jnp.zeros((1, d_model), jnp.float32),
            jnp.ones((1, d_model), jnp.float32), jnp.zeros((1, d_model), jnp.float32),
        ))

    fc_w = rnd(keys[1], (d_model, output_size))
    fc_b = jnp.zeros((1, output_size), jnp.float32)
    return dict(word_emb=word_emb, pos_table=pos_table, layers=layers,
                fc_w=fc_w, fc_b=fc_b)


def _prep_layer_stacks(layers):
    n_fields = len(layers[0])
    stk = [jnp.stack([lp[i] for lp in layers], axis=0) for i in range(n_fields)]
    (wq, bq, wk, bk, wv, bv, wo, bo, g1, be1, w1, bf1, w2, bf2, g2, be2) = stk
    # Fused QKV weight (one MXU contraction per layer); matmul weights in bf16
    # (halves weight DMA bytes), biases / LayerNorm params stay f32.
    wqkv = jnp.concatenate([wq, wk, wv], axis=-1).astype(jnp.bfloat16)
    bqkv = jnp.concatenate([bq, bk, bv], axis=-1)
    return [wqkv, bqkv,
            wo.astype(jnp.bfloat16), bo, g1, be1,
            w1.astype(jnp.bfloat16), bf1,
            w2.astype(jnp.bfloat16), bf2, g2, be2]


def transformer_program_encoder_forward(tokens, seq_lengths, params, *,
                                        n_head, d_k, d_v,
                                        return_hiddens=False):
    B, L = tokens.shape
    valid = tokens != PAD_IDX                                   # (B, L) bool

    # embedding + sinusoidal positional encoding (glue, plain JAX)
    emb = params["word_emb"][tokens]                            # (B, L, D)
    pos = jnp.where(valid, jnp.arange(1, L + 1, dtype=jnp.int32)[None, :], 0)
    x = (emb + params["pos_table"][pos]).astype(jnp.bfloat16)   # bf16 kernel input

    validf = valid.astype(jnp.float32)
    kbias = (1.0 - validf[:, None, :]) * NEG_BIAS               # (B, 1, L) additive
    # TODO(synk): custom TransformerEncoder return convention is not in the
    # reference; assuming RNN-style "final hidden" = encoder state at the last
    # valid token of each sequence (index seq_lengths - 1).
    gather = (jnp.arange(L, dtype=jnp.int32)[None, :] ==
              (seq_lengths - 1)[:, None]).astype(jnp.float32)
    qg = jnp.stack([validf, gather], axis=-1)                   # (B, L, 2)

    stacked = _prep_layer_stacks(params["layers"])
    fc_w = params["fc_w"].astype(jnp.bfloat16)
    fc_b = params["fc_b"]

    hidden, logits = transformer_encoder_apply(
        x, kbias, qg, stacked, fc_w, fc_b, n_head=n_head, d_k=d_k, d_v=d_v)

    if return_hiddens:
        return hidden
    return logits


# ----------------------------------------------------------------------------
# Demo
# ----------------------------------------------------------------------------
if __name__ == "__main__":
    # small but architecture-faithful config
    vocab_size, output_size, max_seq_len = 50, 16, 8
    hidden_size = 32
    n_layers, n_head, d_k, d_v, d_inner = 2, 4, 16, 16, 128

    key = jax.random.PRNGKey(0)
    kp, kt = jax.random.split(key)

    params = init_params(kp, vocab_size, output_size, max_seq_len, hidden_size,
                         n_layers, n_head, d_k, d_v, d_inner)

    B, L = 2, max_seq_len
    seq_lengths = jnp.array([8, 5], dtype=jnp.int32)
    tokens = jax.random.randint(kt, (B, L), 1, vocab_size, dtype=jnp.int32)
    pos_idx = jnp.arange(L, dtype=jnp.int32)[None, :]
    tokens = jnp.where(pos_idx < seq_lengths[:, None], tokens, PAD_IDX)

    fwd = jax.jit(functools.partial(transformer_program_encoder_forward,
                                    n_head=n_head, d_k=d_k, d_v=d_v))
    out = fwd(tokens, seq_lengths, params)
    jax.block_until_ready(out)
    assert out.shape == (B, output_size)
    assert bool(jnp.all(jnp.isfinite(out)))
    print("KERNEL_OK")
</pallas_src>

<mosaic_0001>
module attributes {stable_mosaic.version = 11 : i64} {
  func.func @transformer_encoder_kernel(%arg0: i32, %arg1: i32, %arg2: memref<2x8x32xbf16, #tpu.memory_space<vmem>>, %arg3: memref<2x1x8xf32, #tpu.memory_space<vmem>>, %arg4: memref<2x8x2xf32, #tpu.memory_space<vmem>>, %arg5: memref<2x32x192xbf16, #tpu.memory_space<vmem>>, %arg6: memref<2x1x192xf32, #tpu.memory_space<vmem>>, %arg7: memref<2x64x32xbf16, #tpu.memory_space<vmem>>, %arg8: memref<2x1x32xf32, #tpu.memory_space<vmem>>, %arg9: memref<2x1x32xf32, #tpu.memory_space<vmem>>, %arg10: memref<2x1x32xf32, #tpu.memory_space<vmem>>, %arg11: memref<2x32x128xbf16, #tpu.memory_space<vmem>>, %arg12: memref<2x1x128xf32, #tpu.memory_space<vmem>>, %arg13: memref<2x128x32xbf16, #tpu.memory_space<vmem>>, %arg14: memref<2x1x32xf32, #tpu.memory_space<vmem>>, %arg15: memref<2x1x32xf32, #tpu.memory_space<vmem>>, %arg16: memref<2x1x32xf32, #tpu.memory_space<vmem>>, %arg17: memref<32x16xbf16, #tpu.memory_space<vmem>>, %arg18: memref<1x16xf32, #tpu.memory_space<vmem>>, %arg19: memref<2x1x32xf32, #tpu.memory_space<vmem>>, %arg20: memref<2x1x16xf32, #tpu.memory_space<vmem>>, %arg21: memref<2x8x32xf32, #tpu.memory_space<vmem>>, %arg22: memref<2x8x64xbf16, #tpu.memory_space<vmem>>) attributes {dimension_semantics = [#tpu.dimension_semantics<parallel>, #tpu.dimension_semantics<arbitrary>], iteration_bounds = array<i64: 1, 2>, scalar_prefetch = 0 : i64, scratch_operands = 2 : i64, tpu.core_type = #tpu.core_type<tc>, window_params = [{transform_indices = @transform_0, window_bounds = array<i64: 2, 8, 32>}, {transform_indices = @transform_1, window_bounds = array<i64: 2, 1, 8>}, {transform_indices = @transform_2, window_bounds = array<i64: 2, 8, 2>}, {pipeline_mode = #tpu.pipeline_mode<synchronous>, transform_indices = @transform_3, window_bounds = array<i64: 2, 32, 192>}, {pipeline_mode = #tpu.pipeline_mode<synchronous>, transform_indices = @transform_4, window_bounds = array<i64: 2, 1, 192>}, {pipeline_mode = #tpu.pipeline_mode<synchronous>, transform_indices = @transform_5, window_bounds = array<i64: 2, 64, 32>}, {pipeline_mode = #tpu.pipeline_mode<synchronous>, transform_indices = @transform_6, window_bounds = array<i64: 2, 1, 32>}, {pipeline_mode = #tpu.pipeline_mode<synchronous>, transform_indices = @transform_7, window_bounds = array<i64: 2, 1, 32>}, {pipeline_mode = #tpu.pipeline_mode<synchronous>, transform_indices = @transform_8, window_bounds = array<i64: 2, 1, 32>}, {pipeline_mode = #tpu.pipeline_mode<synchronous>, transform_indices = @transform_9, window_bounds = array<i64: 2, 32, 128>}, {pipeline_mode = #tpu.pipeline_mode<synchronous>, transform_indices = @transform_10, window_bounds = array<i64: 2, 1, 128>}, {pipeline_mode = #tpu.pipeline_mode<synchronous>, transform_indices = @transform_11, window_bounds = array<i64: 2, 128, 32>}, {pipeline_mode = #tpu.pipeline_mode<synchronous>, transform_indices = @transform_12, window_bounds = array<i64: 2, 1, 32>}, {pipeline_mode = #tpu.pipeline_mode<synchronous>, transform_indices = @transform_13, window_bounds = array<i64: 2, 1, 32>}, {pipeline_mode = #tpu.pipeline_mode<synchronous>, transform_indices = @transform_14, window_bounds = array<i64: 2, 1, 32>}, {pipeline_mode = #tpu.pipeline_mode<synchronous>, transform_indices = @transform_15, window_bounds = array<i64: 32, 16>}, {pipeline_mode = #tpu.pipeline_mode<synchronous>, transform_indices = @transform_16, window_bounds = array<i64: 1, 16>}, {transform_indices = @transform_17, window_bounds = array<i64: 2, 1, 32>}, {transform_indices = @transform_18, window_bounds = array<i64: 2, 1, 16>}]} {
    %c0_i32 = arith.constant 0 : i32
    %0 = arith.cmpi eq, %arg1, %c0_i32 : i32
    %1 = arith.extui %0 : i1 to i32
    %c0_i32_0 = arith.constant 0 : i32
    %2 = arith.cmpi ne, %1, %c0_i32_0 : i32
    scf.if %2 {
      %c0_80 = arith.constant 0 : index
      %c0_81 = arith.constant 0 : index
      %c0_82 = arith.constant 0 : index
      %247 = vector.load %arg2[%c0_80, %c0_81, %c0_82] : memref<2x8x32xbf16, #tpu.memory_space<vmem>>, vector<2x8x32xbf16>
      %248 = arith.extf %247 : vector<2x8x32xbf16> to vector<2x8x32xf32>
      %c0_83 = arith.constant 0 : index
      %c0_84 = arith.constant 0 : index
      %c0_85 = arith.constant 0 : index
      %249 = vector.load %arg21[%c0_83, %c0_84, %c0_85] : memref<2x8x32xf32, #tpu.memory_space<vmem>>, vector<2x8x32xf32>
      tpu.vector_store %arg21[%c0_83, %c0_84, %c0_85], %248 {strides = array<i32>} : memref<2x8x32xf32, #tpu.memory_space<vmem>>, vector<2x8x32xf32>,
    } else {
    }
    %c0 = arith.constant 0 : index
    %c0_1 = arith.constant 0 : index
    %c0_2 = arith.constant 0 : index
    %3 = vector.load %arg21[%c0, %c0_1, %c0_2] : memref<2x8x32xf32, #tpu.memory_space<vmem>>, vector<2x8x32xf32>
    %4 = vector.shape_cast %3 : vector<2x8x32xf32> to vector<16x32xf32>
    %5 = arith.truncf %4 : vector<16x32xf32> to vector<16x32xbf16>
    %c0_3 = arith.constant 0 : index
    %c0_4 = arith.constant 0 : index
    %c0_5 = arith.constant 0 : index
    %6 = vector.load %arg3[%c0_3, %c0_4, %c0_5] : memref<2x1x8xf32, #tpu.memory_space<vmem>>, vector<2x1x8xf32>
    %c0_6 = arith.constant 0 : index
    %c0_7 = arith.constant 0 : index
    %c0_8 = arith.constant 0 : index
    %7 = vector.load %arg4[%c0_6, %c0_7, %c0_8] : memref<2x8x2xf32, #tpu.memory_space<vmem>>, vector<2x8x1xf32>
    %8 = arith.index_cast %arg1 : i32 to index
    %c0_9 = arith.constant 0 : index
    %c0_10 = arith.constant 0 : index
    %9 = vector.load %arg5[%8, %c0_9, %c0_10] : memref<2x32x192xbf16, #tpu.memory_space<vmem>>, vector<1x32x192xbf16>
    %10 = vector.shape_cast %9 : vector<1x32x192xbf16> to vector<32x192xbf16>
    %cst = arith.constant dense<0.000000e+00> : vector<16x192xf32>
    %11 = tpu.matmul %5, %10, %cst {dimension_numbers = #tpu.dot_dimension_numbers<[1], [0], [0], [1], [0, 0, 1, 1], [], []>} : vector<16x32xbf16>, vector<32x192xbf16>, vector<16x192xf32> -> vector<16x192xf32>
    %12 = arith.index_cast %arg1 : i32 to index
    %c0_11 = arith.constant 0 : index
    %c0_12 = arith.constant 0 : index
    %13 = vector.load %arg6[%12, %c0_11, %c0_12] : memref<2x1x192xf32, #tpu.memory_space<vmem>>, vector<1x1x192xf32>
    %14 = vector.shape_cast %13 : vector<1x1x192xf32> to vector<1x192xf32>
    %15 = vector.broadcast %14 : vector<1x192xf32> to vector<16x192xf32>
    %16 = arith.addf %11, %15 : vector<16x192xf32>
    %17 = vector.extract_strided_slice %16 {offsets = [0, 0], sizes = [16, 64], strides = [1, 1]} : vector<16x192xf32> to vector<16x64xf32>
    %cst_13 = arith.constant 2.500000e-01 : f32
    %18 = vector.broadcast %cst_13 : f32 to vector<16x64xf32>
    %19 = arith.mulf %17, %18 : vector<16x64xf32>
    %20 = vector.extract_strided_slice %16 {offsets = [0, 64], sizes = [16, 64], strides = [1, 1]} : vector<16x192xf32> to vector<16x64xf32>
    %21 = vector.extract_strided_slice %16 {offsets = [0, 128], sizes = [16, 64], strides = [1, 1]} : vector<16x192xf32> to vector<16x64xf32>
    %22 = vector.shape_cast %19 : vector<16x64xf32> to vector<2x8x64xf32>
    %23 = vector.shape_cast %20 : vector<16x64xf32> to vector<2x8x64xf32>
    %24 = vector.shape_cast %21 : vector<16x64xf32> to vector<2x8x64xf32>
    %25 = vector.extract_strided_slice %22 {offsets = [0, 0, 0], sizes = [2, 8, 16], strides = [1, 1, 1]} : vector<2x8x64xf32> to vector<2x8x16xf32>
    %26 = vector.extract_strided_slice %23 {offsets = [0, 0, 0], sizes = [2, 8, 16], strides = [1, 1, 1]} : vector<2x8x64xf32> to vector<2x8x16xf32>
    %27 = vector.extract_strided_slice %24 {offsets = [0, 0, 0], sizes = [2, 8, 16], strides = [1, 1, 1]} : vector<2x8x64xf32> to vector<2x8x16xf32>
    %28 = vector.shape_cast %25 : vector<2x8x16xf32> to vector<2x8x1x16xf32>
    %29 = vector.shape_cast %26 : vector<2x8x16xf32> to vector<2x1x8x16xf32>
    %30 = vector.broadcast %28 : vector<2x8x1x16xf32> to vector<2x8x8x16xf32>
    %31 = vector.broadcast %29 : vector<2x1x8x16xf32> to vector<2x8x8x16xf32>
    %32 = arith.mulf %30, %31 : vector<2x8x8x16xf32>
    %cst_14 = arith.constant dense<0.000000e+00> : vector<2x8x8xf32>
    %33 = vector.multi_reduction <add>, %32, %cst_14 [3] : vector<2x8x8x16xf32> to vector<2x8x8xf32>
    %34 = vector.broadcast %6 : vector<2x1x8xf32> to vector<2x8x8xf32>
    %35 = arith.addf %33, %34 : vector<2x8x8xf32>
    %cst_15 = arith.constant dense<0xFF800000> : vector<2x8xf32>
    %36 = vector.multi_reduction <maximumf>, %35, %cst_15 [2] : vector<2x8x8xf32> to vector<2x8xf32>
    %37 = vector.shape_cast %36 : vector<2x8xf32> to vector<2x8x1xf32>
    %38 = vector.broadcast %37 : vector<2x8x1xf32> to vector<2x8x8xf32>
    %39 = arith.subf %35, %38 : vector<2x8x8xf32>
    %40 = math.exp %39 : vector<2x8x8xf32>
    %cst_16 = arith.constant dense<0.000000e+00> : vector<2x8xf32>
    %41 = vector.multi_reduction <add>, %40, %cst_16 [2] : vector<2x8x8xf32> to vector<2x8xf32>
    %42 = vector.shape_cast %41 : vector<2x8xf32> to vector<2x8x1xf32>
    %43 = tpu.reciprocal %42 {approx = true} : vector<2x8x1xf32> -> vector<2x8x1xf32>
    %44 = vector.broadcast %43 : vector<2x8x1xf32> to vector<2x8x8xf32>
    %45 = arith.mulf %40, %44 : vector<2x8x8xf32>
    %46 = vector.shape_cast %45 : vector<2x8x8xf32> to vector<2x8x8x1xf32>
    %47 = vector.shape_cast %27 : vector<2x8x16xf32> to vector<2x1x8x16xf32>
    %48 = vector.broadcast %46 : vector<2x8x8x1xf32> to vector<2x8x8x16xf32>
    %49 = vector.broadcast %47 : vector<2x1x8x16xf32> to vector<2x8x8x16xf32>
    %50 = arith.mulf %48, %49 : vector<2x8x8x16xf32>
    %cst_17 = arith.constant dense<0.000000e+00> : vector<2x8x16xf32>
    %51 = vector.multi_reduction <add>, %50, %cst_17 [2] : vector<2x8x8x16xf32> to vector<2x8x16xf32>
    %52 = arith.truncf %51 : vector<2x8x16xf32> to vector<2x8x16xbf16>
    %c0_18 = arith.constant 0 : index
    %c0_19 = arith.constant 0 : index
    %c0_20 = arith.constant 0 : index
    %53 = vector.load %arg22[%c0_18, %c0_19, %c0_20] : memref<2x8x64xbf16, #tpu.memory_space<vmem>>, vector<2x8x16xbf16>
    tpu.vector_store %arg22[%c0_18, %c0_19, %c0_20], %52 {strides = array<i32>} : memref<2x8x64xbf16, #tpu.memory_space<vmem>>, vector<2x8x16xbf16>,
    %54 = vector.extract_strided_slice %22 {offsets = [0, 0, 16], sizes = [2, 8, 16], strides = [1, 1, 1]} : vector<2x8x64xf32> to vector<2x8x16xf32>
    %55 = vector.extract_strided_slice %23 {offsets = [0, 0, 16], sizes = [2, 8, 16], strides = [1, 1, 1]} : vector<2x8x64xf32> to vector<2x8x16xf32>
    %56 = vector.extract_strided_slice %24 {offsets = [0, 0, 16], sizes = [2, 8, 16], strides = [1, 1, 1]} : vector<2x8x64xf32> to vector<2x8x16xf32>
    %57 = vector.shape_cast %54 : vector<2x8x16xf32> to vector<2x8x1x16xf32>
    %58 = vector.shape_cast %55 : vector<2x8x16xf32> to vector<2x1x8x16xf32>
    %59 = vector.broadcast %57 : vector<2x8x1x16xf32> to vector<2x8x8x16xf32>
    %60 = vector.broadcast %58 : vector<2x1x8x16xf32> to vector<2x8x8x16xf32>
    %61 = arith.mulf %59, %60 : vector<2x8x8x16xf32>
    %cst_21 = arith.constant dense<0.000000e+00> : vector<2x8x8xf32>
    %62 = vector.multi_reduction <add>, %61, %cst_21 [3] : vector<2x8x8x16xf32> to vector<2x8x8xf32>
    %63 = vector.broadcast %6 : vector<2x1x8xf32> to vector<2x8x8xf32>
    %64 = arith.addf %62, %63 : vector<2x8x8xf32>
    %cst_22 = arith.constant dense<0xFF800000> : vector<2x8xf32>
    %65 = vector.multi_reduction <maximumf>, %64, %cst_22 [2] : vector<2x8x8xf32> to vector<2x8xf32>
    %66 = vector.shape_cast %65 : vector<2x8xf32> to vector<2x8x1xf32>
    %67 = vector.broadcast %66 : vector<2x8x1xf32> to vector<2x8x8xf32>
    %68 = arith.subf %64, %67 : vector<2x8x8xf32>
    %69 = math.exp %68 : vector<2x8x8xf32>
    %cst_23 = arith.constant dense<0.000000e+00> : vector<2x8xf32>
    %70 = vector.multi_reduction <add>, %69, %cst_23 [2] : vector<2x8x8xf32> to vector<2x8xf32>
    %71 = vector.shape_cast %70 : vector<2x8xf32> to vector<2x8x1xf32>
    %72 = tpu.reciprocal %71 {approx = true} : vector<2x8x1xf32> -> vector<2x8x1xf32>
    %73 = vector.broadcast %72 : vector<2x8x1xf32> to vector<2x8x8xf32>
    %74 = arith.mulf %69, %73 : vector<2x8x8xf32>
    %75 = vector.shape_cast %74 : vector<2x8x8xf32> to vector<2x8x8x1xf32>
    %76 = vector.shape_cast %56 : vector<2x8x16xf32> to vector<2x1x8x16xf32>
    %77 = vector.broadcast %75 : vector<2x8x8x1xf32> to vector<2x8x8x16xf32>
    %78 = vector.broadcast %76 : vector<2x1x8x16xf32> to vector<2x8x8x16xf32>
    %79 = arith.mulf %77, %78 : vector<2x8x8x16xf32>
    %cst_24 = arith.constant dense<0.000000e+00> : vector<2x8x16xf32>
    %80 = vector.multi_reduction <add>, %79, %cst_24 [2] : vector<2x8x8x16xf32> to vector<2x8x16xf32>
    %81 = arith.truncf %80 : vector<2x8x16xf32> to vector<2x8x16xbf16>
    %c0_25 = arith.constant 0 : index
    %c0_26 = arith.constant 0 : index
    %c16 = arith.constant 16 : index
    %82 = vector.load %arg22[%c0_25, %c0_26, %c16] : memref<2x8x64xbf16, #tpu.memory_space<vmem>>, vector<2x8x16xbf16>
    tpu.vector_store %arg22[%c0_25, %c0_26, %c16], %81 {strides = array<i32>} : memref<2x8x64xbf16, #tpu.memory_space<vmem>>, vector<2x8x16xbf16>,
    %83 = vector.extract_strided_slice %22 {offsets = [0, 0, 32], sizes = [2, 8, 16], strides = [1, 1, 1]} : vector<2x8x64xf32> to vector<2x8x16xf32>
    %84 = vector.extract_strided_slice %23 {offsets = [0, 0, 32], sizes = [2, 8, 16], strides = [1, 1, 1]} : vector<2x8x64xf32> to vector<2x8x16xf32>
    %85 = vector.extract_strided_slice %24 {offsets = [0, 0, 32], sizes = [2, 8, 16], strides = [1, 1, 1]} : vector<2x8x64xf32> to vector<2x8x16xf32>
    %86 = vector.shape_cast %83 : vector<2x8x16xf32> to vector<2x8x1x16xf32>
    %87 = vector.shape_cast %84 : vector<2x8x16xf32> to vector<2x1x8x16xf32>
    %88 = vector.broadcast %86 : vector<2x8x1x16xf32> to vector<2x8x8x16xf32>
    %89 = vector.broadcast %87 : vector<2x1x8x16xf32> to vector<2x8x8x16xf32>
    %90 = arith.mulf %88, %89 : vector<2x8x8x16xf32>
    %cst_27 = arith.constant dense<0.000000e+00> : vector<2x8x8xf32>
    %91 = vector.multi_reduction <add>, %90, %cst_27 [3] : vector<2x8x8x16xf32> to vector<2x8x8xf32>
    %92 = vector.broadcast %6 : vector<2x1x8xf32> to vector<2x8x8xf32>
    %93 = arith.addf %91, %92 : vector<2x8x8xf32>
    %cst_28 = arith.constant dense<0xFF800000> : vector<2x8xf32>
    %94 = vector.multi_reduction <maximumf>, %93, %cst_28 [2] : vector<2x8x8xf32> to vector<2x8xf32>
    %95 = vector.shape_cast %94 : vector<2x8xf32> to vector<2x8x1xf32>
    %96 = vector.broadcast %95 : vector<2x8x1xf32> to vector<2x8x8xf32>
    %97 = arith.subf %93, %96 : vector<2x8x8xf32>
    %98 = math.exp %97 : vector<2x8x8xf32>
    %cst_29 = arith.constant dense<0.000000e+00> : vector<2x8xf32>
    %99 = vector.multi_reduction <add>, %98, %cst_29 [2] : vector<2x8x8xf32> to vector<2x8xf32>
    %100 = vector.shape_cast %99 : vector<2x8xf32> to vector<2x8x1xf32>
    %101 = tpu.reciprocal %100 {approx = true} : vector<2x8x1xf32> -> vector<2x8x1xf32>
    %102 = vector.broadcast %101 : vector<2x8x1xf32> to vector<2x8x8xf32>
    %103 = arith.mulf %98, %102 : vector<2x8x8xf32>
    %104 = vector.shape_cast %103 : vector<2x8x8xf32> to vector<2x8x8x1xf32>
    %105 = vector.shape_cast %85 : vector<2x8x16xf32> to vector<2x1x8x16xf32>
    %106 = vector.broadcast %104 : vector<2x8x8x1xf32> to vector<2x8x8x16xf32>
    %107 = vector.broadcast %105 : vector<2x1x8x16xf32> to vector<2x8x8x16xf32>
    %108 = arith.mulf %106, %107 : vector<2x8x8x16xf32>
    %cst_30 = arith.constant dense<0.000000e+00> : vector<2x8x16xf32>
    %109 = vector.multi_reduction <add>, %108, %cst_30 [2] : vector<2x8x8x16xf32> to vector<2x8x16xf32>
    %110 = arith.truncf %109 : vector<2x8x16xf32> to vector<2x8x16xbf16>
    %c0_31 = arith.constant 0 : index
    %c0_32 = arith.constant 0 : index
    %c32 = arith.constant 32 : index
    %111 = vector.load %arg22[%c0_31, %c0_32, %c32] : memref<2x8x64xbf16, #tpu.memory_space<vmem>>, vector<2x8x16xbf16>
    tpu.vector_store %arg22[%c0_31, %c0_32, %c32], %110 {strides = array<i32>} : memref<2x8x64xbf16, #tpu.memory_space<vmem>>, vector<2x8x16xbf16>,
    %112 = vector.extract_strided_slice %22 {offsets = [0, 0, 48], sizes = [2, 8, 16], strides = [1, 1, 1]} : vector<2x8x64xf32> to vector<2x8x16xf32>
    %113 = vector.extract_strided_slice %23 {offsets = [0, 0, 48], sizes = [2, 8, 16], strides = [1, 1, 1]} : vector<2x8x64xf32> to vector<2x8x16xf32>
    %114 = vector.extract_strided_slice %24 {offsets = [0, 0, 48], sizes = [2, 8, 16], strides = [1, 1, 1]} : vector<2x8x64xf32> to vector<2x8x16xf32>
    %115 = vector.shape_cast %112 : vector<2x8x16xf32> to vector<2x8x1x16xf32>
    %116 = vector.shape_cast %113 : vector<2x8x16xf32> to vector<2x1x8x16xf32>
    %117 = vector.broadcast %115 : vector<2x8x1x16xf32> to vector<2x8x8x16xf32>
    %118 = vector.broadcast %116 : vector<2x1x8x16xf32> to vector<2x8x8x16xf32>
    %119 = arith.mulf %117, %118 : vector<2x8x8x16xf32>
    %cst_33 = arith.constant dense<0.000000e+00> : vector<2x8x8xf32>
    %120 = vector.multi_reduction <add>, %119, %cst_33 [3] : vector<2x8x8x16xf32> to vector<2x8x8xf32>
    %121 = vector.broadcast %6 : vector<2x1x8xf32> to vector<2x8x8xf32>
    %122 = arith.addf %120, %121 : vector<2x8x8xf32>
    %cst_34 = arith.constant dense<0xFF800000> : vector<2x8xf32>
    %123 = vector.multi_reduction <maximumf>, %122, %cst_34 [2] : vector<2x8x8xf32> to vector<2x8xf32>
    %124 = vector.shape_cast %123 : vector<2x8xf32> to vector<2x8x1xf32>
    %125 = vector.broadcast %124 : vector<2x8x1xf32> to vector<2x8x8xf32>
    %126 = arith.subf %122, %125 : vector<2x8x8xf32>
    %127 = math.exp %126 : vector<2x8x8xf32>
    %cst_35 = arith.constant dense<0.000000e+00> : vector<2x8xf32>
    %128 = vector.multi_reduction <add>, %127, %cst_35 [2] : vector<2x8x8xf32> to vector<2x8xf32>
    %129 = vector.shape_cast %128 : vector<2x8xf32> to vector<2x8x1xf32>
    %130 = tpu.reciprocal %129 {approx = true} : vector<2x8x1xf32> -> vector<2x8x1xf32>
    %131 = vector.broadcast %130 : vector<2x8x1xf32> to vector<2x8x8xf32>
    %132 = arith.mulf %127, %131 : vector<2x8x8xf32>
    %133 = vector.shape_cast %132 : vector<2x8x8xf32> to vector<2x8x8x1xf32>
    %134 = vector.shape_cast %114 : vector<2x8x16xf32> to vector<2x1x8x16xf32>
    %135 = vector.broadcast %133 : vector<2x8x8x1xf32> to vector<2x8x8x16xf32>
    %136 = vector.broadcast %134 : vector<2x1x8x16xf32> to vector<2x8x8x16xf32>
    %137 = arith.mulf %135, %136 : vector<2x8x8x16xf32>
    %cst_36 = arith.constant dense<0.000000e+00> : vector<2x8x16xf32>
    %138 = vector.multi_reduction <add>, %137, %cst_36 [2] : vector<2x8x8x16xf32> to vector<2x8x16xf32>
    %139 = arith.truncf %138 : vector<2x8x16xf32> to vector<2x8x16xbf16>
    %c0_37 = arith.constant 0 : index
    %c0_38 = arith.constant 0 : index
    %c48 = arith.constant 48 : index
    %140 = vector.load %arg22[%c0_37, %c0_38, %c48] : memref<2x8x64xbf16, #tpu.memory_space<vmem>>, vector<2x8x16xbf16>
    tpu.vector_store %arg22[%c0_37, %c0_38, %c48], %139 {strides = array<i32>} : memref<2x8x64xbf16, #tpu.memory_space<vmem>>, vector<2x8x16xbf16>,
    %c0_39 = arith.constant 0 : index
    %c0_40 = arith.constant 0 : index
    %c0_41 = arith.constant 0 : index
    %141 = vector.load %arg22[%c0_39, %c0_40, %c0_41] : memref<2x8x64xbf16, #tpu.memory_space<vmem>>, vector<2x8x64xbf16>
    %142 = vector.shape_cast %141 : vector<2x8x64xbf16> to vector<16x64xbf16>
    %143 = arith.index_cast %arg1 : i32 to index
    %c0_42 = arith.constant 0 : index
    %c0_43 = arith.constant 0 : index
    %144 = vector.load %arg7[%143, %c0_42, %c0_43] : memref<2x64x32xbf16, #tpu.memory_space<vmem>>, vector<1x64x32xbf16>
    %145 = vector.shape_cast %144 : vector<1x64x32xbf16> to vector<64x32xbf16>
    %cst_44 = arith.constant dense<0.000000e+00> : vector<16x32xf32>
    %146 = tpu.matmul %142, %145, %cst_44 {dimension_numbers = #tpu.dot_dimension_numbers<[1], [0], [0], [1], [0, 0, 1, 1], [], []>} : vector<16x64xbf16>, vector<64x32xbf16>, vector<16x32xf32> -> vector<16x32xf32>
    %147 = arith.index_cast %arg1 : i32 to index
    %c0_45 = arith.constant 0 : index
    %c0_46 = arith.constant 0 : index
    %148 = vector.load %arg8[%147, %c0_45, %c0_46] : memref<2x1x32xf32, #tpu.memory_space<vmem>>, vector<1x1x32xf32>
    %149 = vector.shape_cast %148 : vector<1x1x32xf32> to vector<1x32xf32>
    %150 = vector.broadcast %149 : vector<1x32xf32> to vector<16x32xf32>
    %151 = arith.addf %146, %150 : vector<16x32xf32>
    %152 = vector.shape_cast %151 : vector<16x32xf32> to vector<2x8x32xf32>
    %153 = arith.addf %152, %3 : vector<2x8x32xf32>
    %154 = arith.index_cast %arg1 : i32 to index
    %c0_47 = arith.constant 0 : index
    %c0_48 = arith.constant 0 : index
    %155 = vector.load %arg9[%154, %c0_47, %c0_48] : memref<2x1x32xf32, #tpu.memory_space<vmem>>, vector<1x1x32xf32>
    %156 = vector.shape_cast %155 : vector<1x1x32xf32> to vector<1x32xf32>
    %157 = arith.index_cast %arg1 : i32 to index
    %c0_49 = arith.constant 0 : index
    %c0_50 = arith.constant 0 : index
    %158 = vector.load %arg10[%157, %c0_49, %c0_50] : memref<2x1x32xf32, #tpu.memory_space<vmem>>, vector<1x1x32xf32>
    %159 = vector.shape_cast %158 : vector<1x1x32xf32> to vector<1x32xf32>
    %cst_51 = arith.constant dense<0.000000e+00> : vector<2x8xf32>
    %160 = vector.multi_reduction <add>, %153, %cst_51 [2] : vector<2x8x32xf32> to vector<2x8xf32>
    %161 = vector.shape_cast %160 : vector<2x8xf32> to vector<2x8x1xf32>
    %cst_52 = arith.constant 3.200000e+01 : f32
    %162 = vector.broadcast %cst_52 : f32 to vector<2x8x1xf32>
    %163 = arith.divf %161, %162 : vector<2x8x1xf32>
    %164 = vector.broadcast %163 : vector<2x8x1xf32> to vector<2x8x32xf32>
    %165 = arith.subf %153, %164 : vector<2x8x32xf32>
    %166 = arith.mulf %165, %165 : vector<2x8x32xf32>
    %cst_53 = arith.constant dense<0.000000e+00> : vector<2x8xf32>
    %167 = vector.multi_reduction <add>, %166, %cst_53 [2] : vector<2x8x32xf32> to vector<2x8xf32>
    %168 = vector.shape_cast %167 : vector<2x8xf32> to vector<2x8x1xf32>
    %cst_54 = arith.constant 3.200000e+01 : f32
    %169 = vector.broadcast %cst_54 : f32 to vector<2x8x1xf32>
    %170 = arith.divf %168, %169 : vector<2x8x1xf32>
    %171 = vector.broadcast %163 : vector<2x8x1xf32> to vector<2x8x32xf32>
    %172 = arith.subf %153, %171 : vector<2x8x32xf32>
    %cst_55 = arith.constant 9.99999974E-6 : f32
    %173 = vector.broadcast %cst_55 : f32 to vector<2x8x1xf32>
    %174 = arith.addf %170, %173 : vector<2x8x1xf32>
    %175 = math.rsqrt %174 : vector<2x8x1xf32>
    %176 = vector.broadcast %175 : vector<2x8x1xf32> to vector<2x8x32xf32>
    %177 = arith.mulf %172, %176 : vector<2x8x32xf32>
    %178 = vector.shape_cast %156 : vector<1x32xf32> to vector<1x1x32xf32>
    %179 = vector.broadcast %178 : vector<1x1x32xf32> to vector<2x8x32xf32>
    %180 = arith.mulf %177, %179 : vector<2x8x32xf32>
    %181 = vector.shape_cast %159 : vector<1x32xf32> to vector<1x1x32xf32>
    %182 = vector.broadcast %181 : vector<1x1x32xf32> to vector<2x8x32xf32>
    %183 = arith.addf %180, %182 : vector<2x8x32xf32>
    %184 = vector.broadcast %7 : vector<2x8x1xf32> to vector<2x8x32xf32>
    %185 = arith.mulf %183, %184 : vector<2x8x32xf32>
    %186 = vector.shape_cast %185 : vector<2x8x32xf32> to vector<16x32xf32>
    %187 = arith.truncf %186 : vector<16x32xf32> to vector<16x32xbf16>
    %188 = arith.index_cast %arg1 : i32 to index
    %c0_56 = arith.constant 0 : index
    %c0_57 = arith.constant 0 : index
    %189 = vector.load %arg11[%188, %c0_56, %c0_57] : memref<2x32x128xbf16, #tpu.memory_space<vmem>>, vector<1x32x128xbf16>
    %190 = vector.shape_cast %189 : vector<1x32x128xbf16> to vector<32x128xbf16>
    %cst_58 = arith.constant dense<0.000000e+00> : vector<16x128xf32>
    %191 = tpu.matmul %187, %190, %cst_58 {dimension_numbers = #tpu.dot_dimension_numbers<[1], [0], [0], [1], [0, 0, 1, 1], [], []>} : vector<16x32xbf16>, vector<32x128xbf16>, vector<16x128xf32> -> vector<16x128xf32>
    %192 = arith.index_cast %arg1 : i32 to index
    %c0_59 = arith.constant 0 : index
    %c0_60 = arith.constant 0 : index
    %193 = vector.load %arg12[%192, %c0_59, %c0_60] : memref<2x1x128xf32, #tpu.memory_space<vmem>>, vector<1x1x128xf32>
    %194 = vector.shape_cast %193 : vector<1x1x128xf32> to vector<1x128xf32>
    %195 = vector.broadcast %194 : vector<1x128xf32> to vector<16x128xf32>
    %196 = arith.addf %191, %195 : vector<16x128xf32>
    %cst_61 = arith.constant 0.000000e+00 : f32
    %197 = vector.broadcast %cst_61 : f32 to vector<16x128xf32>
    %198 = arith.maximumf %196, %197 : vector<16x128xf32>
    %199 = arith.truncf %198 : vector<16x128xf32> to vector<16x128xbf16>
    %200 = arith.index_cast %arg1 : i32 to index
    %c0_62 = arith.constant 0 : index
    %c0_63 = arith.constant 0 : index
    %201 = vector.load %arg13[%200, %c0_62, %c0_63] : memref<2x128x32xbf16, #tpu.memory_space<vmem>>, vector<1x128x32xbf16>
    %202 = vector.shape_cast %201 : vector<1x128x32xbf16> to vector<128x32xbf16>
    %cst_64 = arith.constant dense<0.000000e+00> : vector<16x32xf32>
    %203 = tpu.matmul %199, %202, %cst_64 {dimension_numbers = #tpu.dot_dimension_numbers<[1], [0], [0], [1], [0, 0, 1, 1], [], []>} : vector<16x128xbf16>, vector<128x32xbf16>, vector<16x32xf32> -> vector<16x32xf32>
    %204 = arith.index_cast %arg1 : i32 to index
    %c0_65 = arith.constant 0 : index
    %c0_66 = arith.constant 0 : index
    %205 = vector.load %arg14[%204, %c0_65, %c0_66] : memref<2x1x32xf32, #tpu.memory_space<vmem>>, vector<1x1x32xf32>
    %206 = vector.shape_cast %205 : vector<1x1x32xf32> to vector<1x32xf32>
    %207 = vector.broadcast %206 : vector<1x32xf32> to vector<16x32xf32>
    %208 = arith.addf %203, %207 : vector<16x32xf32>
    %209 = vector.shape_cast %208 : vector<16x32xf32> to vector<2x8x32xf32>
    %210 = arith.addf %209, %185 : vector<2x8x32xf32>
    %211 = arith.index_cast %arg1 : i32 to index
    %c0_67 = arith.constant 0 : index
    %c0_68 = arith.constant 0 : index
    %212 = vector.load %arg15[%211, %c0_67, %c0_68] : memref<2x1x32xf32, #tpu.memory_space<vmem>>, vector<1x1x32xf32>
    %213 = vector.shape_cast %212 : vector<1x1x32xf32> to vector<1x32xf32>
    %214 = arith.index_cast %arg1 : i32 to index
    %c0_69 = arith.constant 0 : index
    %c0_70 = arith.constant 0 : index
    %215 = vector.load %arg16[%214, %c0_69, %c0_70] : memref<2x1x32xf32, #tpu.memory_space<vmem>>, vector<1x1x32xf32>
    %216 = vector.shape_cast %215 : vector<1x1x32xf32> to vector<1x32xf32>
    %cst_71 = arith.constant dense<0.000000e+00> : vector<2x8xf32>
    %217 = vector.multi_reduction <add>, %210, %cst_71 [2] : vector<2x8x32xf32> to vector<2x8xf32>
    %218 = vector.shape_cast %217 : vector<2x8xf32> to vector<2x8x1xf32>
    %cst_72 = arith.constant 3.200000e+01 : f32
    %219 = vector.broadcast %cst_72 : f32 to vector<2x8x1xf32>
    %220 = arith.divf %218, %219 : vector<2x8x1xf32>
    %221 = vector.broadcast %220 : vector<2x8x1xf32> to vector<2x8x32xf32>
    %222 = arith.subf %210, %221 : vector<2x8x32xf32>
    %223 = arith.mulf %222, %222 : vector<2x8x32xf32>
    %cst_73 = arith.constant dense<0.000000e+00> : vector<2x8xf32>
    %224 = vector.multi_reduction <add>, %223, %cst_73 [2] : vector<2x8x32xf32> to vector<2x8xf32>
    %225 = vector.shape_cast %224 : vector<2x8xf32> to vector<2x8x1xf32>
    %cst_74 = arith.constant 3.200000e+01 : f32
    %226 = vector.broadcast %cst_74 : f32 to vector<2x8x1xf32>
    %227 = arith.divf %225, %226 : vector<2x8x1xf32>
    %228 = vector.broadcast %220 : vector<2x8x1xf32> to vector<2x8x32xf32>
    %229 = arith.subf %210, %228 : vector<2x8x32xf32>
    %cst_75 = arith.constant 9.99999974E-6 : f32
    %230 = vector.broadcast %cst_75 : f32 to vector<2x8x1xf32>
    %231 = arith.addf %227, %230 : vector<2x8x1xf32>
    %232 = math.rsqrt %231 : vector<2x8x1xf32>
    %233 = vector.broadcast %232 : vector<2x8x1xf32> to vector<2x8x32xf32>
    %234 = arith.mulf %229, %233 : vector<2x8x32xf32>
    %235 = vector.shape_cast %213 : vector<1x32xf32> to vector<1x1x32xf32>
    %236 = vector.broadcast %235 : vector<1x1x32xf32> to vector<2x8x32xf32>
    %237 = arith.mulf %234, %236 : vector<2x8x32xf32>
    %238 = vector.shape_cast %216 : vector<1x32xf32> to vector<1x1x32xf32>
    %239 = vector.broadcast %238 : vector<1x1x32xf32> to vector<2x8x32xf32>
    %240 = arith.addf %237, %239 : vector<2x8x32xf32>
    %241 = vector.broadcast %7 : vector<2x8x1xf32> to vector<2x8x32xf32>
    %242 = arith.mulf %240, %241 : vector<2x8x32xf32>
    %c0_76 = arith.constant 0 : index
    %c0_77 = arith.constant 0 : index
    %c0_78 = arith.constant 0 : index
    %243 = vector.load %arg21[%c0_76, %c0_77, %c0_78] : memref<2x8x32xf32, #tpu.memory_space<vmem>>, vector<2x8x32xf32>
    tpu.vector_store %arg21[%c0_76, %c0_77, %c0_78], %242 {strides = array<i32>} : memref<2x8x32xf32, #tpu.memory_space<vmem>>, vector<2x8x32xf32>,
    %c1_i32 = arith.constant 1 : i32
    %244 = arith.cmpi eq, %arg1, %c1_i32 : i32
    %245 = arith.extui %244 : i1 to i32
    %c0_i32_79 = arith.constant 0 : i32
    %246 = arith.cmpi ne, %245, %c0_i32_79 : i32
    scf.if %246 {
      %c0_80 = arith.constant 0 : index
      %c0_81 = arith.constant 0 : index
      %c1 = arith.constant 1 : index
      %247 = vector.load %arg4[%c0_80, %c0_81, %c1] : memref<2x8x2xf32, #tpu.memory_space<vmem>>, vector<2x8x1xf32>
      %248 = vector.broadcast %247 : vector<2x8x1xf32> to vector<2x8x32xf32>
      %249 = arith.mulf %242, %248 : vector<2x8x32xf32>
      %cst_82 = arith.constant dense<0.000000e+00> : vector<2x32xf32>
      %250 = vector.multi_reduction <add>, %249, %cst_82 [1] : vector<2x8x32xf32> to vector<2x32xf32>
      %251 = vector.shape_cast %250 : vector<2x32xf32> to vector<2x1x32xf32>
      %c0_83 = arith.constant 0 : index
      %c0_84 = arith.constant 0 : index
      %c0_85 = arith.constant 0 : index
      %252 = vector.load %arg19[%c0_83, %c0_84, %c0_85] : memref<2x1x32xf32, #tpu.memory_space<vmem>>, vector<2x1x32xf32>
      tpu.vector_store %arg19[%c0_83, %c0_84, %c0_85], %251 {strides = array<i32>} : memref<2x1x32xf32, #tpu.memory_space<vmem>>, vector<2x1x32xf32>,
      %253 = arith.truncf %250 : vector<2x32xf32> to vector<2x32xbf16>
      %c0_86 = arith.constant 0 : index
      %c0_87 = arith.constant 0 : index
      %254 = vector.load %arg17[%c0_86, %c0_87] : memref<32x16xbf16, #tpu.memory_space<vmem>>, vector<32x16xbf16>
      %cst_88 = arith.constant dense<0.000000e+00> : vector<2x16xf32>
      %255 = tpu.matmul %253, %254, %cst_88 {dimension_numbers = #tpu.dot_dimension_numbers<[1], [0], [0], [1], [0, 0, 1, 1], [], []>} : vector<2x32xbf16>, vector<32x16xbf16>, vector<2x16xf32> -> vector<2x16xf32>
      %c0_89 = arith.constant 0 : index
      %c0_90 = arith.constant 0 : index
      %256 = vector.load %arg18[%c0_89, %c0_90] : memref<1x16xf32, #tpu.memory_space<vmem>>, vector<1x16xf32>
      %257 = vector.broadcast %256 : vector<1x16xf32> to vector<2x16xf32>
      %258 = arith.addf %255, %257 : vector<2x16xf32>
      %259 = vector.shape_cast %258 : vector<2x16xf32> to vector<2x1x16xf32>
      %c0_91 = arith.constant 0 : index
      %c0_92 = arith.constant 0 : index
      %c0_93 = arith.constant 0 : index
      %260 = vector.load %arg20[%c0_91, %c0_92, %c0_93] : memref<2x1x16xf32, #tpu.memory_space<vmem>>, vector<2x1x16xf32>
      tpu.vector_store %arg20[%c0_91, %c0_92, %c0_93], %259 {strides = array<i32>} : memref<2x1x16xf32, #tpu.memory_space<vmem>>, vector<2x1x16xf32>,
    } else {
    }
    return
  }
  func.func @transform_0(%arg0: i32, %arg1: i32) -> (i32, i32, i32) {
    %c0_i32 = arith.constant 0 : i32
    %c0_i32_0 = arith.constant 0 : i32
    %c0_i32_1 = arith.constant 0 : i32
    return %arg0, %c0_i32, %c0_i32_0 : i32, i32, i32
  }
  func.func @transform_1(%arg0: i32, %arg1: i32) -> (i32, i32, i32) {
    %c0_i32 = arith.constant 0 : i32
    %c0_i32_0 = arith.constant 0 : i32
    %c0_i32_1 = arith.constant 0 : i32
    return %arg0, %c0_i32, %c0_i32_0 : i32, i32, i32
  }
  func.func @transform_2(%arg0: i32, %arg1: i32) -> (i32, i32, i32) {
    %c0_i32 = arith.constant 0 : i32
    %c0_i32_0 = arith.constant 0 : i32
    %c0_i32_1 = arith.constant 0 : i32
    return %arg0, %c0_i32, %c0_i32_0 : i32, i32, i32
  }
  func.func @transform_3(%arg0: i32, %arg1: i32) -> (i32, i32, i32) {
    %c0_i32 = arith.constant 0 : i32
    %c0_i32_0 = arith.constant 0 : i32
    %c0_i32_1 = arith.constant 0 : i32
    %c0_i32_2 = arith.constant 0 : i32
    return %c0_i32, %c0_i32_0, %c0_i32_1 : i32, i32, i32
  }
  func.func @transform_4(%arg0: i32, %arg1: i32) -> (i32, i32, i32) {
    %c0_i32 = arith.constant 0 : i32
    %c0_i32_0 = arith.constant 0 : i32
    %c0_i32_1 = arith.constant 0 : i32
    %c0_i32_2 = arith.constant 0 : i32
    return %c0_i32, %c0_i32_0, %c0_i32_1 : i32, i32, i32
  }
  func.func @transform_5(%arg0: i32, %arg1: i32) -> (i32, i32, i32) {
    %c0_i32 = arith.constant 0 : i32
    %c0_i32_0 = arith.constant 0 : i32
    %c0_i32_1 = arith.constant 0 : i32
    %c0_i32_2 = arith.constant 0 : i32
    return %c0_i32, %c0_i32_0, %c0_i32_1 : i32, i32, i32
  }
  func.func @transform_6(%arg0: i32, %arg1: i32) -> (i32, i32, i32) {
    %c0_i32 = arith.constant 0 : i32
    %c0_i32_0 = arith.constant 0 : i32
    %c0_i32_1 = arith.constant 0 : i32
    %c0_i32_2 = arith.constant 0 : i32
    return %c0_i32, %c0_i32_0, %c0_i32_1 : i32, i32, i32
  }
  func.func @transform_7(%arg0: i32, %arg1: i32) -> (i32, i32, i32) {
    %c0_i32 = arith.constant 0 : i32
    %c0_i32_0 = arith.constant 0 : i32
    %c0_i32_1 = arith.constant 0 : i32
    %c0_i32_2 = arith.constant 0 : i32
    return %c0_i32, %c0_i32_0, %c0_i32_1 : i32, i32, i32
  }
  func.func @transform_8(%arg0: i32, %arg1: i32) -> (i32, i32, i32) {
    %c0_i32 = arith.constant 0 : i32
    %c0_i32_0 = arith.constant 0 : i32
    %c0_i32_1 = arith.constant 0 : i32
    %c0_i32_2 = arith.constant 0 : i32
    return %c0_i32, %c0_i32_0, %c0_i32_1 : i32, i32, i32
  }
  func.func @transform_9(%arg0: i32, %arg1: i32) -> (i32, i32, i32) {
    %c0_i32 = arith.constant 0 : i32
    %c0_i32_0 = arith.constant 0 : i32
    %c0_i32_1 = arith.constant 0 : i32
    %c0_i32_2 = arith.constant 0 : i32
    return %c0_i32, %c0_i32_0, %c0_i32_1 : i32, i32, i32
  }
  func.func @transform_10(%arg0: i32, %arg1: i32) -> (i32, i32, i32) {
    %c0_i32 = arith.constant 0 : i32
    %c0_i32_0 = arith.constant 0 : i32
    %c0_i32_1 = arith.constant 0 : i32
    %c0_i32_2 = arith.constant 0 : i32
    return %c0_i32, %c0_i32_0, %c0_i32_1 : i32, i32, i32
  }
  func.func @transform_11(%arg0: i32, %arg1: i32) -> (i32, i32, i32) {
    %c0_i32 = arith.constant 0 : i32
    %c0_i32_0 = arith.constant 0 : i32
    %c0_i32_1 = arith.constant 0 : i32
    %c0_i32_2 = arith.constant 0 : i32
    return %c0_i32, %c0_i32_0, %c0_i32_1 : i32, i32, i32
  }
  func.func @transform_12(%arg0: i32, %arg1: i32) -> (i32, i32, i32) {
    %c0_i32 = arith.constant 0 : i32
    %c0_i32_0 = arith.constant 0 : i32
    %c0_i32_1 = arith.constant 0 : i32
    %c0_i32_2 = arith.constant 0 : i32
    return %c0_i32, %c0_i32_0, %c0_i32_1 : i32, i32, i32
  }
  func.func @transform_13(%arg0: i32, %arg1: i32) -> (i32, i32, i32) {
    %c0_i32 = arith.constant 0 : i32
    %c0_i32_0 = arith.constant 0 : i32
    %c0_i32_1 = arith.constant 0 : i32
    %c0_i32_2 = arith.constant 0 : i32
    return %c0_i32, %c0_i32_0, %c0_i32_1 : i32, i32, i32
  }
  func.func @transform_14(%arg0: i32, %arg1: i32) -> (i32, i32, i32) {
    %c0_i32 = arith.constant 0 : i32
    %c0_i32_0 = arith.constant 0 : i32
    %c0_i32_1 = arith.constant 0 : i32
    %c0_i32_2 = arith.constant 0 : i32
    return %c0_i32, %c0_i32_0, %c0_i32_1 : i32, i32, i32
  }
  func.func @transform_15(%arg0: i32, %arg1: i32) -> (i32, i32) {
    %c0_i32 = arith.constant 0 : i32
    %c0_i32_0 = arith.constant 0 : i32
    %c0_i32_1 = arith.constant 0 : i32
    return %c0_i32, %c0_i32_0 : i32, i32
  }
  func.func @transform_16(%arg0: i32, %arg1: i32) -> (i32, i32) {
    %c0_i32 = arith.constant 0 : i32
    %c0_i32_0 = arith.constant 0 : i32
    %c0_i32_1 = arith.constant 0 : i32
    return %c0_i32, %c0_i32_0 : i32, i32
  }
  func.func @transform_17(%arg0: i32, %arg1: i32) -> (i32, i32, i32) {
    %c0_i32 = arith.constant 0 : i32
    %c0_i32_0 = arith.constant 0 : i32
    %c0_i32_1 = arith.constant 0 : i32
    return %arg0, %c0_i32, %c0_i32_0 : i32, i32, i32
  }
  func.func @transform_18(%arg0: i32, %arg1: i32) -> (i32, i32, i32) {
    %c0_i32 = arith.constant 0 : i32
    %c0_i32_0 = arith.constant 0 : i32
    %c0_i32_1 = arith.constant 0 : i32
    return %arg0, %c0_i32, %c0_i32_0 : i32, i32, i32
  }
}

</mosaic_0001>

<bundles_post_ra>
// kernel: transformer_program_encoder_forward.1
= control target key start
LH: loop header
LB: loop body
LE: loop exit
PB: predicated region body
PF: predicated region fallthrough
CT: control target
= control target key end

     0   :  { %s8031_s0 = inlined_call_operand.vmem [shape: bf16[2,8,32], index: 0, kind: input, shape index: {}]   ;;  %s8032_s1 = inlined_call_operand.vmem [shape: f32[2,1,8], index: 1, kind: input, shape index: {}]   ;;  %s8033_s2 = inlined_call_operand.vmem [shape: f32[2,8,2], index: 2, kind: input, shape index: {}]   ;;  %s8034_s3 = inlined_call_operand.vmem [shape: bf16[2,32,192], index: 3, kind: input, shape index: {}]   ;;  %s8035_s4 = inlined_call_operand.vmem [shape: f32[2,1,192], index: 4, kind: input, shape index: {}]   ;;  %s8036_s5 = inlined_call_operand.vmem [shape: bf16[2,64,32], index: 5, kind: input, shape index: {}]   ;;  %s8037_s6 = inlined_call_operand.vmem [shape: f32[2,1,32], index: 6, kind: input, shape index: {}]   ;;  %s8038_s7 = inlined_call_operand.vmem [shape: f32[2,1,32], index: 7, kind: input, shape index: {}]   ;;  %s8039_s8 = inlined_call_operand.vmem [shape: f32[2,1,32], index: 8, kind: input, shape index: {}]   ;;  %s8040_s9 = inlined_call_operand.vmem [shape: bf16[2,32,128], index: 9, kind: input, shape index: {}]   ;;  %s8041_s10 = inlined_call_operand.vmem [shape: f32[2,1,128], index: 10, kind: input, shape index: {}]   ;;  %s8042_s11 = inlined_call_operand.vmem [shape: bf16[2,128,32], index: 11, kind: input, shape index: {}]   ;;  %s8043_s12 = inlined_call_operand.vmem [shape: f32[2,1,32], index: 12, kind: input, shape index: {}]   ;;  %s8044_s13 = inlined_call_operand.vmem [shape: f32[2,1,32], index: 13, kind: input, shape index: {}]   ;;  %s8045_s14 = inlined_call_operand.vmem [shape: f32[2,1,32], index: 14, kind: input, shape index: {}]   ;;  %s8046_s15 = inlined_call_operand.vmem [shape: bf16[32,16], index: 15, kind: input, shape index: {}]   ;;  %s8047_s16 = inlined_call_operand.vmem [shape: f32[1,16], index: 16, kind: input, shape index: {}]   ;;  %s8048_s17 = inlined_call_operand.hbm [shape: f32[2,1,32], index: 17, kind: output, shape index: {0}]   ;;  %s8049_s18 = inlined_call_operand.hbm [shape: f32[2,1,16], index: 18, kind: output, shape index: {1}]  }
   0x1   :  { %8150 = sst [smem:[#allocation59_spill]] %s8031_s0 }
   0x2   :  { %8151 = sst [smem:[#allocation60_spill]] %s8032_s1 }
   0x3   :  { %8152 = sst [smem:[#allocation61_spill]] %s8033_s2 }
   0x4   :  { %8153 = sst [smem:[#allocation62_spill]] %s8034_s3 }
   0x5   :  { %24 = vsyncpa [#allocation5], 0 }
   0x6   :  { %25 = vsyncpa [#allocation7], 0  ;;  %s6100_s27 = smov 0   ;;  %s6102_s28 = smov 0  }
   0x7   :  { %s6104_s29 = smov 0  }
   0x8 LB: > { %s40_s0 = sadd.s32 1, %s5984_s28  ;;  %p5423_p1 = scmp.ge.s32.totalorder %s5988_s29, 1  ;;  %s5988_s29 = sphi %s6104_s29, %s31_s29   ;;  %s5984_s28 = sphi %s6102_s28, %s8353_s28   ;;  %s5980_s27 = sphi %s6100_s27, %s8352_s27  }
   0x9   : > { %p41_p0 = scmp.ge.s32.totalorder %s40_s0, 2  ;;  %p551_p2 = scmp.lt.s32.totalorder %s5988_s29, 3 }
   0xb   : > { %s8355_s0 = smov (%p41_p0, %s40_s0), 0  ;;  %p552_p3 = pnand %p5423_p1, %p551_p2 }
   0xd   : > { %555 = sbr.rel (%p552_p3) target bundleno = 3298 (0xce2), region = 88 }
  0x12   : > { %p5424_p4 = scmp.ne.s32.totalorder %s5980_s27, 0 }
  0x13   : > { %s8154_s20 = sld [smem:[#allocation59_spill]] (!%p5424_p4) }
  0x14   : > { %632 = sbr.rel (%p5424_p4) target bundleno = 29 (0x1d), region = 92 }
  0x19   : > { %v5608_v0 = vld [vmem:[%s8154_s20] sm:$0xff]   ;;  %vm637_vm0 = vcmask 261120  }
  0x1a   : > { %v5609_v1 = vunpack.c.l.bf16 %v5608_v0  ;;  %v5610_v2 = vunpack.c.h.bf16 %v5608_v0 }
  0x1c   : > { %638 = vst.msk [vmem:[#allocation2] sm:$0xff] %vm637_vm0, %v5609_v1  ;;  %639 = vst.msk [vmem:[#allocation2 + $0x8] sm:$0xff] %vm637_vm0, %v5610_v2 }
  0x1d PF: > { %s5539_s21 = sshll.u32 %s5980_s27, 5  ;;  %s8155_s3 = sld [smem:[#allocation62_spill]]  ;;  %v5990_v3 = vmov 0   ;;  %vm688_vm1 = vcmask 261120   ;;  %v8053_v13 = vlaneseq  ;;  %v5991_v21 = vmov 1966171168  }
  0x1e   : > { %724 = vmatprep.mubr.bf16.mxu1 %v5990_v3  ;;  %s8156_s26 = sld [smem:[#allocation60_spill]]  ;;  %5730 = vset.pattern.permute.xlu1 %v5990_v3  ;;  %s6135_s20 = scalar_lea.vmem %s8036_s5, %s5539_s21  ;;  %v741_v22 = vunpack.c.l.s4 %v5991_v21  ;;  %vm941_vm2 = vcmask 130048   ;;  %vm1154_vm3 = vcmask 1041409   ;;  %vm1156_vm4 = vcmask 1042434  }
  0x1f   : > { %5731 = vset.pattern.permute.xlu0 %v5990_v3  ;;  %s5427_s24 = sshll.u32 %s5980_s27, 1  ;;  %v6143_v14 = vshrl.u32 %v8053_v13, 7  ;;  %s5992_s19 = smov 64   ;;  %vm1158_vm5 = vcmask 1043459   ;;  %vm1160_vm6 = vcmask 1044484   ;;  %vm1162_vm7 = vcmask 1045509  }
  0x20   : > { %v742_v26 = vunpack.c.0.s8 %v741_v22  ;;  %s5993_s1 = smov 112   ;;  %s5994_s22 = smov 96   ;;  %vm1164_vm8 = vcmask 1046534   ;;  %vm1166_vm9 = vcmask 1047559   ;;  %vm1177_vm10 = vcmask 64512  }
  0x21   : > { %v6149_v15 = vsub.s32 0, %v6143_v14  ;;  %v6152_v17 = vsub.s32 1, %v6143_v14  ;;  %s5995_s2 = smov 80   ;;  %vm1870_vm11 = vcmask 125952   ;;  %vm2627_vm12 = vcmask 261248   ;;  %s5606_s30 = sshll.u32 %s5980_s27, 6 }
  0x22   : > { %v6162_v30 = vsub.s32 %v742_v26, %v6143_v14  ;;  %vm3579_vm13 = vcmask 392448   ;;  %vm4531_vm14 = vcmask 523648   ;;  %vm5997_vm15 = vmmov 0   ;;  %s4908_s25 = scalar_lea.vmem %s8041_s10, %s5980_s27  ;;  %p5528_p5 = scmp.ne.s32.totalorder %s5980_s27, 1 }
  0x23   : > { %s649_s23 = scalar_lea.vmem %s8155_s3, %s5539_s21  ;;  %v640_v8 = vld [vmem:[#allocation2] sm:$0xff]  ;;  %v641_v9 = vld [vmem:[#allocation2 + $0x8] sm:$0xff]  ;;  %vm2838_vm0 = vcmask 257152   ;;  %s4757_s21 = scalar_lea.vmem %s8037_s6, %s5980_s27 }
  0x24   : > { %v5434_v4 = vld [vmem:[%s8156_s26 + $0x1] ss:$0 sm:$0xff]  ;;  %v5732_v5 = vld [vmem:[%s649_s23 + $0x14] ss:$8 sps:$4 sm:$0xff]   ;;  %v5734_v6 = vld [vmem:[%s649_s23 + $0x10] ss:$8 sps:$4 sm:$0xff]   ;;  %v642_v11 = vpack.c.bf16 %v641_v9, %v640_v8  ;;  %s7915_s3 = scalar_lea.vmem %s8042_s11, %s5606_s30 }
  0x25   : > { %1004 = vbcast.lane.b32.xlu0 %v5434_v4, 256  ;;  %704 = vmatprep.subr.bf16.mxu1 %v5732_v5  ;;  %v5735_v7 = vld [vmem:[%s649_s23 + $0x4] ss:$8 sps:$4 sm:$0xff]   ;;  %v5737_v10 = vld [vmem:[%s649_s23] ss:$8 sps:$4 sm:$0xff]   ;;  %s655_s23 = scalar_lea.vmem %s8035_s4, %s5427_s24  ;;  %8159 = vst [vmem:[#allocation12_spill] sm:$0xff] %v6162_v30  ;;  %s5095_s24 = scalar_lea.vmem %s8045_s14, %s5980_s27 }
  0x26   : > { %705 = vmatpush1.bf16.msra.mxu1 %v5734_v6  ;;  %v5433_v12 = vld [vmem:[%s8156_s26] ss:$0 sm:$0xff] }
  0x27   : > { %706 = vmatprep.subr.bf16.mxu1 %v5735_v7  ;;  %1001 = vbcast.lane.b32.xlu1 %v5433_v12, 256  ;;  %v656_v16 = vld [vmem:[%s655_s23] sm:$0x3]  ;;  %s8348_s23 = sld [smem:[#allocation61_spill]] (!%p5528_p5) }
  0x28   : > { %v661_v18 = vrot.slane %v656_v16, %v6149_v15  ;;  %v6156_v19 = vrot.slane %v656_v16, %v6152_v17 }
  0x2a   : > { %707 = vmatpush1.bf16.msra.mxu1 %v5737_v10  ;;  %8157 = vst [vmem:[#allocation10_spill] sm:$0xff] %v6156_v19 }
  0x2d   : > { %5432 = vmatmul.mubr.msk.bf16.vlgmr.msra.gmra.mxu1 %vm688_vm1, %v642_v11 }
  0x97   : > { %v6180_v43 = vpop.permute.xlu0 %1004 }
  0xed   : > { %v726_v20 = vpop.f32.mrf.mxu1 }
  0xee   : > { %v727_v23 = vadd.f32 %v726_v20, %v661_v18 }
  0xef   : > { %v728_v24 = vpop.f32.mrf.mxu1 }
  0xf0   : > { %v6159_v25 = vadd.f32 %v728_v24, %v6156_v19  ;;  %919 = vrot.lane.b32.xlu0 %v727_v23, %s5992_s19  ;;  %v735_v40 = vmul.f32 0.25, %v727_v23 }
  0xf1   : > { %v730_v27 = vpop.f32.mrf.mxu1 }
  0xf2   : > { %8158 = vst [vmem:[#allocation11_spill] sm:$0xff] %v6159_v25  ;;  %v731_v28 = vadd.f32 %v730_v27, %v661_v18  ;;  %v746_v41 = vrot.slane %v735_v40, %v6162_v30  ;;  %v739_v55 = vcombine.high %v735_v40, %v735_v40 }
  0xf4   : > { %v736_v29 = vmul.f32 0.25, %v731_v28  ;;  %921 = vrot.lane.b32.xlu0 %v731_v28, %s5992_s19  ;;  %v762_v42 = vrot.slane %v746_v41, %v6162_v30  ;;  %v754_v44 = vcombine.high %v746_v41, %v746_v41  ;;  %v753_v58 = vrot.slane %v739_v55, %v6162_v30  ;;  %s8347_s19 = sld [smem:[#allocation61_spill]] }
  0xf6   : > { %v788_v31 = vcombine.high %v736_v29, %v736_v29  ;;  %v795_v32 = vrot.slane %v736_v29, %v6162_v30  ;;  %v784_v45 = vcombine.high %v762_v42, %v762_v42  ;;  %v776_v46 = vrot.slane %v754_v44, %v6162_v30 }
  0xf7   : > { %v840_v47 = vrot.slane %v762_v42, %v6149_v15  ;;  %v769_v59 = vrot.slane %v753_v58, %v6162_v30  ;;  %v755_v62 = vcombine.high %v753_v58, %v753_v58 }
  0xf8   : > { %v802_v33 = vrot.slane %v788_v31, %v6162_v30  ;;  %v803_v34 = vcombine.high %v795_v32, %v795_v32  ;;  %v6167_v35 = vrot.slane %v795_v32, %v6162_v30  ;;  %v848_v48 = vrot.slane %v784_v45, %v6149_v15 }
  0xf9   : > { %v786_v52 = vcombine.high %v776_v46, %v776_v46  ;;  %v844_v53 = vrot.slane %v776_v46, %v6149_v15  ;;  %v856_v60 = vrot.slane %v769_v59, %v6149_v15  ;;  %v783_v63 = vrot.slane %v755_v62, %v6162_v30  ;;  %v6272_v46 = vpop.permute.xlu1 %1001 }
  0xfa   : > { %v804_v36 = vcombine.high %v802_v33, %v802_v33  ;;  %v6170_v37 = vrot.slane %v802_v33, %v6162_v30  ;;  %v6173_v38 = vrot.slane %v803_v34, %v6162_v30  ;;  %v785_v2 = vcombine.high %v769_v59, %v769_v59 }
  0xfb   : > { %v852_v56 = vrot.slane %v786_v52, %v6149_v15  ;;  %v860_v0 = vrot.slane %v783_v63, %v6149_v15  ;;  %v787_v6 = vcombine.high %v783_v63, %v783_v63  ;;  %v833_v21 = vcombine.high %v6167_v35, %v6167_v35 }
  0xfc   : > { %v6176_v39 = vrot.slane %v804_v36, %v6162_v30  ;;  %v864_v3 = vrot.slane %v785_v2, %v6149_v15  ;;  %v876_v22 = vrot.slane %v6173_v38, %v6149_v15  ;;  %v835_v27 = vcombine.high %v6173_v38, %v6173_v38 }
  0xfd   : > { %v868_v8 = vrot.slane %v787_v6, %v6149_v15  ;;  %v880_v24 = vrot.slane %v833_v21, %v6149_v15  ;;  %v888_v32 = vrot.slane %v6170_v37, %v6149_v15  ;;  %v872_v38 = vrot.slane %v6167_v35, %v6149_v15 }
  0xfe   : > { %v884_v28 = vrot.slane %v835_v27, %v6149_v15  ;;  %v892_v34 = vrot.slane %v6176_v39, %v6149_v15  ;;  %v834_v41 = vcombine.high %v6170_v37, %v6170_v37  ;;  %v836_v35 = vcombine.high %v6176_v39, %v6176_v39 }
 0x100   : > { %v896_v42 = vrot.slane %v834_v41, %v6149_v15  ;;  %v900_v37 = vrot.slane %v836_v35, %v6149_v15 }
 0x162   : > { %v920_v49 = vpop.permute.xlu0 %919 }
 0x163   : > { %v6185_v50 = vmul.f32 %v920_v49, %v840_v47  ;;  %v927_v51 = vmul.f32 %v920_v49, %v848_v48  ;;  %v926_v54 = vmul.f32 %v920_v49, %v844_v53  ;;  %v928_v57 = vmul.f32 %v920_v49, %v852_v56 }
 0x164   : > { %v929_v61 = vmul.f32 %v920_v49, %v856_v60  ;;  %v930_v1 = vmul.f32 %v920_v49, %v860_v0  ;;  %v931_v4 = vmul.f32 %v920_v49, %v864_v3  ;;  %v932_v9 = vmul.f32 %v920_v49, %v868_v8 }
 0x165   : > { %1889 = vrot.lane.b32.xlu1 %v6185_v50, %s5993_s1  ;;  %1893 = vrot.lane.b32.xlu0 %v927_v51, %s5993_s1  ;;  %v945_v5 = vsel %vm941_vm2, %v926_v54, 0.0  ;;  %v948_v7 = vsel %vm941_vm2, %v927_v51, 0.0  ;;  %v951_v10 = vsel %vm941_vm2, %v928_v57, 0.0  ;;  %v942_v31 = vsel %vm941_vm2, %v6185_v50, 0.0 }
 0x166   : > { %v954_v11 = vsel %vm941_vm2, %v929_v61, 0.0  ;;  %v957_v12 = vsel %vm941_vm2, %v930_v1, 0.0  ;;  %v960_v16 = vsel %vm941_vm2, %v931_v4, 0.0  ;;  %v963_v18 = vsel %vm941_vm2, %v932_v9, 0.0  ;;  %v922_v20 = vpop.permute.xlu0 %921 }
 0x167   : > { %v934_v23 = vmul.f32 %v922_v20, %v876_v22  ;;  %v935_v26 = vmul.f32 %v922_v20, %v880_v24  ;;  %v936_v29 = vmul.f32 %v922_v20, %v884_v28  ;;  %v937_v33 = vmul.f32 %v922_v20, %v888_v32 }
 0x168   : > { %v938_v36 = vmul.f32 %v922_v20, %v892_v34  ;;  %v933_v40 = vmul.f32 %v922_v20, %v872_v38  ;;  %v939_v44 = vmul.f32 %v922_v20, %v896_v42  ;;  %v940_v45 = vmul.f32 %v922_v20, %v900_v37 }
 0x169   : > { %2841 = vrot.lane.b32.xlu0 %v6185_v50, %s5994_s22  ;;  %1891 = vrot.lane.b32.xlu1 %v926_v54, %s5993_s1  ;;  %v969_v52 = vsel %vm941_vm2, %v934_v23, 0.0  ;;  %v972_v55 = vsel %vm941_vm2, %v935_v26, 0.0  ;;  %v975_v56 = vsel %vm941_vm2, %v936_v29, 0.0  ;;  %v978_v59 = vsel %vm941_vm2, %v937_v33, 0.0 }
 0x16a   : > { %v966_v39 = vsel %vm941_vm2, %v933_v40, 0.0  ;;  %v981_v62 = vsel %vm941_vm2, %v938_v36, 0.0  ;;  %v984_v0 = vsel %vm941_vm2, %v939_v44, 0.0  ;;  %v987_v3 = vsel %vm941_vm2, %v940_v45, 0.0 }
 0x16d   : > { %2843 = vrot.lane.b32.xlu1 %v926_v54, %s5994_s22  ;;  %1895 = vrot.lane.b32.xlu0 %v928_v57, %s5993_s1 }
 0x171   : > { %3795 = vrot.lane.b32.xlu1 %v926_v54, %s5995_s2  ;;  %2845 = vrot.lane.b32.xlu0 %v927_v51, %s5994_s22 }
 0x175   : > { %3793 = vrot.lane.b32.xlu0 %v6185_v50, %s5995_s2 }
 0x179   : > { %1897 = vrot.lane.b32.xlu0 %v929_v61, %s5993_s1 }
 0x17d   : > { %2847 = vrot.lane.b32.xlu0 %v928_v57, %s5994_s22 }
 0x181   : > { %3797 = vrot.lane.b32.xlu0 %v927_v51, %s5995_s2 }
 0x185   : > { %1899 = vrot.lane.b32.xlu0 %v930_v1, %s5993_s1 }
 0x189   : > { %2849 = vrot.lane.b32.xlu0 %v929_v61, %s5994_s22 }
 0x18d   : > { %3799 = vrot.lane.b32.xlu0 %v928_v57, %s5995_s2 }
 0x191   : > { %1901 = vrot.lane.b32.xlu0 %v931_v4, %s5993_s1 }
 0x195   : > { %946 = vadd.xlane.f32.xlu1 %v945_v5  ;;  %2851 = vrot.lane.b32.xlu0 %v930_v1, %s5994_s22 }
 0x199   : > { %949 = vadd.xlane.f32.xlu1 %v948_v7  ;;  %3801 = vrot.lane.b32.xlu0 %v929_v61, %s5995_s2 }
 0x19d   : > { %952 = vadd.xlane.f32.xlu1 %v951_v10  ;;  %1903 = vrot.lane.b32.xlu0 %v932_v9, %s5993_s1 }
 0x1a1   : > { %955 = vadd.xlane.f32.xlu1 %v954_v11  ;;  %2853 = vrot.lane.b32.xlu0 %v931_v4, %s5994_s22 }
 0x1a5   : > { %958 = vadd.xlane.f32.xlu1 %v957_v12  ;;  %3803 = vrot.lane.b32.xlu0 %v930_v1, %s5995_s2 }
 0x1a9   : > { %961 = vadd.xlane.f32.xlu1 %v960_v16  ;;  %2855 = vrot.lane.b32.xlu0 %v932_v9, %s5994_s22 }
 0x1ad   : > { %3805 = vrot.lane.b32.xlu0 %v931_v4, %s5995_s2  ;;  %964 = vadd.xlane.f32.xlu1 %v963_v18 }
 0x1b1   : > { %3807 = vrot.lane.b32.xlu0 %v932_v9, %s5995_s2 }
 0x1be   : > { %1907 = vrot.lane.b32.xlu1 %v934_v23, %s5993_s1 }
 0x1c2   : > { %1909 = vrot.lane.b32.xlu1 %v935_v26, %s5993_s1 }
 0x1c6   : > { %2859 = vrot.lane.b32.xlu1 %v934_v23, %s5994_s22 }
 0x1ca   : > { %1911 = vrot.lane.b32.xlu1 %v936_v29, %s5993_s1 }
 0x1ce   : > { %2861 = vrot.lane.b32.xlu1 %v935_v26, %s5994_s22 }
 0x1d0   : > { %943 = vadd.xlane.f32.xlu0 %v942_v31 }
 0x1d2   : > { %3811 = vrot.lane.b32.xlu1 %v934_v23, %s5995_s2 }
 0x1d6   : > { %1913 = vrot.lane.b32.xlu1 %v937_v33, %s5993_s1 }
 0x1d7   : > { %v1894_v47 = vpop.permute.xlu0 %1893  ;;  %v1890_v48 = vpop.permute.xlu1 %1889 }
 0x1d8   : > { %v1937_v9 = vsel %vm941_vm2, %v1890_v48, 0.0  ;;  %v1943_v16 = vsel %vm941_vm2, %v1894_v47, 0.0 }
 0x1da   : > { %2863 = vrot.lane.b32.xlu1 %v936_v29, %s5994_s22 }
 0x1db   : > { %v2842_v49 = vpop.permute.xlu0 %2841  ;;  %v1892_v50 = vpop.permute.xlu1 %1891 }
 0x1dc   : > { %v1940_v6 = vsel %vm941_vm2, %v1892_v50, 0.0  ;;  %v2889_v21 = vsel %vm941_vm2, %v2842_v49, 0.0 }
 0x1de   : > { %3813 = vrot.lane.b32.xlu1 %v935_v26, %s5995_s2 }
 0x1df   : > { %v1896_v51 = vpop.permute.xlu0 %1895  ;;  %v2844_v53 = vpop.permute.xlu1 %2843 }
 0x1e0   : > { %v2892_v8 = vsel %vm941_vm2, %v2844_v53, 0.0  ;;  %v1946_v24 = vsel %vm941_vm2, %v1896_v51, 0.0 }
 0x1e2   : > { %1915 = vrot.lane.b32.xlu1 %v938_v36, %s5993_s1 }
 0x1e3   : > { %v2846_v54 = vpop.permute.xlu0 %2845  ;;  %v3796_v57 = vpop.permute.xlu1 %3795 }
 0x1e4   : > { %v3844_v12 = vsel %vm941_vm2, %v3796_v57, 0.0 }
 0x1e6   : > { %1905 = vrot.lane.b32.xlu0 %v933_v40, %s5993_s1  ;;  %2865 = vrot.lane.b32.xlu1 %v937_v33, %s5994_s22 }
 0x1e7   : > { %v3794_v58 = vpop.permute.xlu0 %3793 }
 0x1e8   : > { %v3841_v34 = vsel %vm941_vm2, %v3794_v58, 0.0 }
 0x1ea   : > { %2857 = vrot.lane.b32.xlu0 %v933_v40, %s5994_s22  ;;  %3815 = vrot.lane.b32.xlu1 %v936_v29, %s5995_s2  ;;  %v2895_v29 = vsel %vm941_vm2, %v2846_v54, 0.0 }
 0x1eb   : > { %v1898_v61 = vpop.permute.xlu0 %1897 }
 0x1ee   : > { %3809 = vrot.lane.b32.xlu0 %v933_v40, %s5995_s2  ;;  %1917 = vrot.lane.b32.xlu1 %v939_v44, %s5993_s1  ;;  %v1949_v40 = vsel %vm941_vm2, %v1898_v61, 0.0 }
 0x1ef   : > { %v2848_v1 = vpop.permute.xlu0 %2847 }
 0x1f0   : > { %v2898_v35 = vsel %vm941_vm2, %v2848_v1, 0.0 }
 0x1f2   : > { %2867 = vrot.lane.b32.xlu1 %v938_v36, %s5994_s22 }
 0x1f3   : > { %v3798_v5 = vpop.permute.xlu0 %3797 }
 0x1f4   : > { %v3847_v48 = vsel %vm941_vm2, %v3798_v5, 0.0 }
 0x1f6   : > { %3817 = vrot.lane.b32.xlu1 %v937_v33, %s5995_s2 }
 0x1f7   : > { %v1900_v10 = vpop.permute.xlu0 %1899 }
 0x1f8   : > { %v1952_v50 = vsel %vm941_vm2, %v1900_v10, 0.0 }
 0x1fa   : > { %1919 = vrot.lane.b32.xlu1 %v940_v45, %s5993_s1  ;;  %s4841_s1 = scalar_lea.vmem %s8038_s7, %s5980_s27 }
 0x1fb   : > { %v2850_v20 = vpop.permute.xlu0 %2849 }
 0x1fc   : > { %v2901_v54 = vsel %vm941_vm2, %v2850_v20, 0.0 }
 0x1fe   : > { %2869 = vrot.lane.b32.xlu1 %v939_v44, %s5994_s22 }
 0x1ff   : > { %v3800_v26 = vpop.permute.xlu0 %3799 }
 0x200   : > { %v3850_v58 = vsel %vm941_vm2, %v3800_v26, 0.0 }
 0x202   : > { %3819 = vrot.lane.b32.xlu1 %v938_v36, %s5995_s2 }
 0x203   : > { %v1902_v33 = vpop.permute.xlu0 %1901 }
 0x206   : > { %2871 = vrot.lane.b32.xlu1 %v940_v45, %s5994_s22  ;;  %s5093_s22 = scalar_lea.vmem %s8044_s13, %s5980_s27 }
 0x207   : > { %v2852_v41 = vpop.permute.xlu0 %2851 }
 0x208   : > { %v2904_v5 = vsel %vm941_vm2, %v2852_v41, 0.0 }
 0x20a   : > { %3821 = vrot.lane.b32.xlu1 %v939_v44, %s5995_s2 }
 0x20b   : > { %v3802_v47 = vpop.permute.xlu0 %3801 }
 0x20c   : > { %v3853_v10 = vsel %vm941_vm2, %v3802_v47, 0.0 }
 0x20d   : > { %967 = vadd.xlane.f32.xlu0 %v966_v39 }
 0x20e   : > { %3823 = vrot.lane.b32.xlu1 %v940_v45, %s5995_s2  ;;  %s5605_s2 = sshll.u32 %s5980_s27, 4 }
 0x20f   : > { %v1904_v51 = vpop.permute.xlu0 %1903 }
 0x210   : > { %v1958_v20 = vsel %vm941_vm2, %v1904_v51, 0.0 }
 0x211   : > { %970 = vadd.xlane.f32.xlu0 %v969_v52 }
 0x213   : > { %v2854_v57 = vpop.permute.xlu0 %2853 }
 0x215   : > { %973 = vadd.xlane.f32.xlu0 %v972_v55 }
 0x219   : > { %976 = vadd.xlane.f32.xlu0 %v975_v56 }
 0x21d   : > { %979 = vadd.xlane.f32.xlu0 %v978_v59 }
 0x21e   : > { %v6283_v60 = vpop.xlane.xlu1 %946 }
 0x221   : > { %982 = vadd.xlane.f32.xlu0 %v981_v62  ;;  %v1955_v62 = vsel %vm941_vm2, %v1902_v33, 0.0 }
 0x222   : > { %v6286_v63 = vpop.xlane.xlu1 %949 }
 0x225   : > { %985 = vadd.xlane.f32.xlu0 %v984_v0  ;;  %v3804_v0 = vpop.permute.xlu0 %3803 }
 0x226   : > { %v6289_v2 = vpop.xlane.xlu1 %952 }
 0x229   : > { %988 = vadd.xlane.f32.xlu0 %v987_v3 }
 0x22a   : > { %v6292_v4 = vpop.xlane.xlu1 %955 }
 0x22d   : > { %1941 = vadd.xlane.f32.xlu0 %v1940_v6 }
 0x22e   : > { %v6295_v7 = vpop.xlane.xlu1 %958 }
 0x231   : > { %2893 = vadd.xlane.f32.xlu0 %v2892_v8 }
 0x232   : > { %v6299_v11 = vpop.xlane.xlu1 %961  ;;  %1938 = vadd.xlane.f32.xlu1 %v1937_v9  ;;  %v2856_v9 = vpop.permute.xlu0 %2855 }
 0x235   : > { %3845 = vadd.xlane.f32.xlu0 %v3844_v12 }
 0x236   : > { %1944 = vadd.xlane.f32.xlu1 %v1943_v16  ;;  %v6303_v18 = vpop.xlane.xlu1 %964 }
 0x23a   : > { %2890 = vadd.xlane.f32.xlu1 %v2889_v21  ;;  %v1908_v22 = vpop.permute.xlu1 %1907  ;;  %v3806_v21 = vpop.permute.xlu0 %3805 }
 0x23b   : > { %v1964_v23 = vsel %vm941_vm2, %v1908_v22, 0.0 }
 0x23c   : > { %1965 = vadd.xlane.f32.xlu0 %v1964_v23 }
 0x23e   : > { %1947 = vadd.xlane.f32.xlu1 %v1946_v24  ;;  %v1910_v27 = vpop.permute.xlu1 %1909  ;;  %v2907_v24 = vsel %vm941_vm2, %v2854_v57, 0.0 }
 0x23f   : > { %v1967_v28 = vsel %vm941_vm2, %v1910_v27, 0.0 }
 0x240   : > { %1968 = vadd.xlane.f32.xlu0 %v1967_v28  ;;  %v3808_v28 = vpop.permute.xlu0 %3807 }
 0x242   : > { %2896 = vadd.xlane.f32.xlu1 %v2895_v29  ;;  %v2860_v31 = vpop.permute.xlu1 %2859  ;;  %v3856_v29 = vsel %vm941_vm2, %v3804_v0, 0.0 }
 0x243   : > { %v2916_v32 = vsel %vm941_vm2, %v2860_v31, 0.0 }
 0x244   : > { %2917 = vadd.xlane.f32.xlu0 %v2916_v32 }
 0x246   : > { %3842 = vadd.xlane.f32.xlu1 %v3841_v34  ;;  %v1912_v36 = vpop.permute.xlu1 %1911  ;;  %v2910_v34 = vsel %vm941_vm2, %v2856_v9, 0.0 }
 0x247   : > { %v1970_v38 = vsel %vm941_vm2, %v1912_v36, 0.0 }
 0x248   : > { %1971 = vadd.xlane.f32.xlu0 %v1970_v38 }
 0x24a   : > { %1950 = vadd.xlane.f32.xlu1 %v1949_v40  ;;  %v2862_v42 = vpop.permute.xlu1 %2861  ;;  %v3859_v40 = vsel %vm941_vm2, %v3806_v21, 0.0  ;;  %v6411_v21 = vadd.f32 %v6272_v46, %v6303_v18 }
 0x24b   : > { %v2919_v44 = vsel %vm941_vm2, %v2862_v42, 0.0 }
 0x24c   : > { %2920 = vadd.xlane.f32.xlu0 %v2919_v44 }
 0x24e   : > { %2899 = vadd.xlane.f32.xlu1 %v2898_v35  ;;  %v3812_v37 = vpop.permute.xlu1 %3811  ;;  %v3862_v35 = vsel %vm941_vm2, %v3808_v28, 0.0 }
 0x24f   : > { %v3868_v45 = vsel %vm941_vm2, %v3812_v37, 0.0 }
 0x250   : > { %3869 = vadd.xlane.f32.xlu0 %v3868_v45 }
 0x252   : > { %3848 = vadd.xlane.f32.xlu1 %v3847_v48  ;;  %v1914_v49 = vpop.permute.xlu1 %1913 }
 0x253   : > { %v1973_v39 = vsel %vm941_vm2, %v1914_v49, 0.0 }
 0x254   : > { %1974 = vadd.xlane.f32.xlu0 %v1973_v39 }
 0x256   : > { %1953 = vadd.xlane.f32.xlu1 %v1952_v50  ;;  %v2864_v52 = vpop.permute.xlu1 %2863 }
 0x257   : > { %v2922_v53 = vsel %vm941_vm2, %v2864_v52, 0.0 }
 0x258   : > { %2923 = vadd.xlane.f32.xlu0 %v2922_v53 }
 0x259   : > { %v944_v33 = vpop.xlane.xlu0 %943 }
 0x25a   : > { %2902 = vadd.xlane.f32.xlu1 %v2901_v54  ;;  %v3814_v55 = vpop.permute.xlu1 %3813  ;;  %v6349_v57 = vadd.f32 %v6272_v46, %v944_v33 }
 0x25b   : > { %v3871_v56 = vsel %vm941_vm2, %v3814_v55, 0.0 }
 0x25c   : > { %3872 = vadd.xlane.f32.xlu0 %v3871_v56 }
 0x25d   : > { %v1906_v41 = vpop.permute.xlu0 %1905 }
 0x25e   : > { %3851 = vadd.xlane.f32.xlu1 %v3850_v58  ;;  %v1916_v59 = vpop.permute.xlu1 %1915  ;;  %v1961_v48 = vsel %vm941_vm2, %v1906_v41, 0.0 }
 0x25f   : > { %v1976_v61 = vsel %vm941_vm2, %v1916_v59, 0.0 }
 0x260   : > { %1977 = vadd.xlane.f32.xlu0 %v1976_v61  ;;  %v6357_v61 = vadd.f32 %v6272_v46, %v6283_v60 }
 0x261   : > { %v2858_v47 = vpop.permute.xlu0 %2857 }
 0x262   : > { %1956 = vadd.xlane.f32.xlu1 %v1955_v62  ;;  %v2866_v1 = vpop.permute.xlu1 %2865  ;;  %v2913_v50 = vsel %vm941_vm2, %v2858_v47, 0.0 }
 0x263   : > { %v2925_v3 = vsel %vm941_vm2, %v2866_v1, 0.0  ;;  %v6366_v1 = vadd.f32 %v6272_v46, %v6286_v63 }
 0x264   : > { %2926 = vadd.xlane.f32.xlu0 %v2925_v3 }
 0x265   : > { %v3810_v51 = vpop.permute.xlu0 %3809 }
 0x266   : > { %2905 = vadd.xlane.f32.xlu1 %v2904_v5  ;;  %v3816_v6 = vpop.permute.xlu1 %3815  ;;  %v3865_v54 = vsel %vm941_vm2, %v3810_v51, 0.0  ;;  %v6375_v5 = vadd.f32 %v6272_v46, %v6289_v2 }
 0x267   : > { %v3874_v8 = vsel %vm941_vm2, %v3816_v6, 0.0 }
 0x268   : > { %3875 = vadd.xlane.f32.xlu0 %v3874_v8  ;;  %v6384_v8 = vadd.f32 %v6272_v46, %v6292_v4 }
 0x26a   : > { %3854 = vadd.xlane.f32.xlu1 %v3853_v10  ;;  %v1918_v12 = vpop.permute.xlu1 %1917  ;;  %v6393_v10 = vadd.f32 %v6272_v46, %v6295_v7 }
 0x26b   : > { %v1979_v16 = vsel %vm941_vm2, %v1918_v12, 0.0 }
 0x26c   : > { %1980 = vadd.xlane.f32.xlu0 %v1979_v16  ;;  %v6402_v16 = vadd.f32 %v6272_v46, %v6299_v11 }
 0x26e   : > { %1959 = vadd.xlane.f32.xlu1 %v1958_v20  ;;  %v2868_v22 = vpop.permute.xlu1 %2867 }
 0x26f   : > { %v2928_v23 = vsel %vm941_vm2, %v2868_v22, 0.0 }
 0x270   : > { %2929 = vadd.xlane.f32.xlu0 %v2928_v23 }
 0x272   : > { %2908 = vadd.xlane.f32.xlu1 %v2907_v24  ;;  %v3818_v26 = vpop.permute.xlu1 %3817 }
 0x273   : > { %v3877_v27 = vsel %vm941_vm2, %v3818_v26, 0.0 }
 0x274   : > { %3878 = vadd.xlane.f32.xlu0 %v3877_v27 }
 0x276   : > { %3857 = vadd.xlane.f32.xlu1 %v3856_v29  ;;  %v1920_v31 = vpop.permute.xlu1 %1919 }
 0x277   : > { %v1982_v32 = vsel %vm941_vm2, %v1920_v31, 0.0 }
 0x278   : > { %1983 = vadd.xlane.f32.xlu0 %v1982_v32 }
 0x27a   : > { %2911 = vadd.xlane.f32.xlu1 %v2910_v34  ;;  %v2870_v36 = vpop.permute.xlu1 %2869 }
 0x27b   : > { %v2931_v38 = vsel %vm941_vm2, %v2870_v36, 0.0 }
 0x27c   : > { %2932 = vadd.xlane.f32.xlu0 %v2931_v38 }
 0x27e   : > { %3860 = vadd.xlane.f32.xlu1 %v3859_v40  ;;  %v3820_v42 = vpop.permute.xlu1 %3819 }
 0x27f   : > { %v3880_v44 = vsel %vm941_vm2, %v3820_v42, 0.0 }
 0x280   : > { %3881 = vadd.xlane.f32.xlu0 %v3880_v44 }
 0x282   : > { %3863 = vadd.xlane.f32.xlu1 %v3862_v35  ;;  %v2872_v37 = vpop.permute.xlu1 %2871 }
 0x283   : > { %v2934_v45 = vsel %vm941_vm2, %v2872_v37, 0.0 }
 0x284   : > { %2935 = vadd.xlane.f32.xlu0 %v2934_v45 }
 0x286   : > { %1962 = vadd.xlane.f32.xlu1 %v1961_v48  ;;  %v3822_v49 = vpop.permute.xlu1 %3821 }
 0x287   : > { %v3883_v39 = vsel %vm941_vm2, %v3822_v49, 0.0 }
 0x288   : > { %3884 = vadd.xlane.f32.xlu0 %v3883_v39 }
 0x28a   : > { %2914 = vadd.xlane.f32.xlu1 %v2913_v50  ;;  %v3824_v52 = vpop.permute.xlu1 %3823 }
 0x28b   : > { %v3886_v53 = vsel %vm941_vm2, %v3824_v52, 0.0 }
 0x28c   : > { %3887 = vadd.xlane.f32.xlu0 %v3886_v53 }
 0x28e   : > { %3866 = vadd.xlane.f32.xlu1 %v3865_v54 }
 0x296   : > { %v968_v55 = vpop.xlane.xlu0 %967 }
 0x297   : > { %v6353_v59 = vadd.f32 %v6180_v43, %v968_v55 }
 0x29a   : > { %v971_v56 = vpop.xlane.xlu0 %970 }
 0x29b   : > { %v6419_v24 = vadd.f32 %v6180_v43, %v971_v56 }
 0x29e   : > { %v974_v58 = vpop.xlane.xlu0 %973 }
 0x29f   : > { %1041 = vperm.xlu1 %5730, %v6349_v57   ;;  %v6362_v0 = vadd.f32 %v6180_v43, %v974_v58 }
 0x2a2   : > { %v977_v62 = vpop.xlane.xlu0 %976  ;;  %1065 = vperm.xlu0 %5731, %v6353_v59  }
 0x2a3   : > { %1044 = vperm.xlu1 %5730, %v6357_v61   ;;  %v6371_v60 = vadd.f32 %v6180_v43, %v977_v62 }
 0x2a6   : > { %v980_v3 = vpop.xlane.xlu0 %979  ;;  %1071 = vperm.xlu0 %5731, %v6362_v0  }
 0x2a7   : > { %1047 = vperm.xlu1 %5730, %v6366_v1   ;;  %v6380_v63 = vadd.f32 %v6180_v43, %v980_v3 }
 0x2aa   : > { %v983_v6 = vpop.xlane.xlu0 %982  ;;  %1074 = vperm.xlu0 %5731, %v6371_v60  }
 0x2ab   : > { %1050 = vperm.xlu1 %5730, %v6375_v5   ;;  %v6389_v2 = vadd.f32 %v6180_v43, %v983_v6 }
 0x2ae   : > { %v986_v9 = vpop.xlane.xlu0 %985  ;;  %1077 = vperm.xlu0 %5731, %v6380_v63  }
 0x2af   : > { %1053 = vperm.xlu1 %5730, %v6384_v8   ;;  %v6398_v4 = vadd.f32 %v6180_v43, %v986_v9 }
 0x2b2   : > { %v989_v12 = vpop.xlane.xlu0 %988  ;;  %1080 = vperm.xlu0 %5731, %v6389_v2  }
 0x2b3   : > { %1056 = vperm.xlu1 %5730, %v6393_v10   ;;  %v6407_v7 = vadd.f32 %v6180_v43, %v989_v12 }
 0x2b6   : > { %v1942_v20 = vpop.xlane.xlu0 %1941  ;;  %1083 = vperm.xlu0 %5731, %v6398_v4  }
 0x2b7   : > { %1059 = vperm.xlu1 %5730, %v6402_v16   ;;  %v6416_v11 = vadd.f32 %v1942_v20, %v6272_v46 }
 0x2ba   : > { %1086 = vperm.xlu0 %5731, %v6407_v7   ;;  %v2894_v22 = vpop.xlane.xlu0 %2893 }
 0x2bb   : > { %1062 = vperm.xlu1 %5730, %v6411_v21   ;;  %v1939_v23 = vpop.xlane.xlu1 %1938  ;;  %v6424_v18 = vadd.f32 %v2894_v22, %v6272_v46 }
 0x2bc   : > { %v6427_v27 = vadd.f32 %v1939_v23, %v6272_v46 }
 0x2bd   : > { %8160 = vst [vmem:[#allocation13_spill] sm:$0xff] %v6424_v18 }
 0x2be   : > { %2021 = vperm.xlu0 %5731, %v6416_v11   ;;  %v3846_v28 = vpop.xlane.xlu0 %3845 }
 0x2bf   : > { %1068 = vperm.xlu1 %5730, %v6419_v24   ;;  %v1945_v26 = vpop.xlane.xlu1 %1944  ;;  %v6432_v31 = vadd.f32 %v3846_v28, %v6272_v46 }
 0x2c0   : > { %v6435_v32 = vadd.f32 %v1945_v26, %v6272_v46 }
 0x2c1   : > { %8161 = vst [vmem:[#allocation14_spill] sm:$0xff] %v6432_v31 }
 0x2c2   : > { %2973 = vperm.xlu0 %5731, %v6424_v18   ;;  %8162 = vst [vmem:[#allocation15_spill] sm:$0xff] %v6435_v32 }
 0x2c3   : > { %2018 = vperm.xlu1 %5730, %v6427_v27   ;;  %v2891_v29 = vpop.xlane.xlu1 %2890 }
 0x2c4   : > { %v6443_v38 = vadd.f32 %v2891_v29, %v6272_v46 }
 0x2c5   : > { %v1966_v33 = vpop.xlane.xlu0 %1965 }
 0x2c6   : > { %3925 = vperm.xlu0 %5731, %v6432_v31   ;;  %v6440_v36 = vadd.f32 %v1966_v33, %v6180_v43  ;;  %8164 = vst [vmem:[#allocation17_spill] sm:$0xff] %v6443_v38 }
 0x2c7   : > { %2024 = vperm.xlu1 %5730, %v6435_v32   ;;  %v1948_v34 = vpop.xlane.xlu1 %1947 }
 0x2c8   : > { %8163 = vst [vmem:[#allocation16_spill] sm:$0xff] %v6440_v36  ;;  %v6451_v44 = vadd.f32 %v1948_v34, %v6272_v46 }
 0x2c9   : > { %v1969_v40 = vpop.xlane.xlu0 %1968 }
 0x2ca   : > { %2045 = vperm.xlu0 %5731, %v6440_v36   ;;  %v6448_v42 = vadd.f32 %v1969_v40, %v6180_v43  ;;  %8166 = vst [vmem:[#allocation19_spill] sm:$0xff] %v6451_v44 }
 0x2cb   : > { %2970 = vperm.xlu1 %5730, %v6443_v38   ;;  %v2897_v41 = vpop.xlane.xlu1 %2896 }
 0x2cc   : > { %8165 = vst [vmem:[#allocation18_spill] sm:$0xff] %v6448_v42  ;;  %v6459_v47 = vadd.f32 %v2897_v41, %v6272_v46 }
 0x2cd   : > { %v2918_v35 = vpop.xlane.xlu0 %2917 }
 0x2ce   : > { %2048 = vperm.xlu0 %5731, %v6448_v42   ;;  %v6456_v45 = vadd.f32 %v2918_v35, %v6180_v43  ;;  %8168 = vst [vmem:[#allocation21_spill] sm:$0xff] %v6459_v47 }
 0x2cf   : > { %2027 = vperm.xlu1 %5730, %v6451_v44   ;;  %v3843_v37 = vpop.xlane.xlu1 %3842 }
 0x2d0   : > { %8167 = vst [vmem:[#allocation20_spill] sm:$0xff] %v6456_v45  ;;  %v6467_v50 = vadd.f32 %v3843_v37, %v6272_v46 }
 0x2d1   : > { %v1972_v48 = vpop.xlane.xlu0 %1971 }
 0x2d2   : > { %2997 = vperm.xlu0 %5731, %v6456_v45   ;;  %v6464_v39 = vadd.f32 %v1972_v48, %v6180_v43  ;;  %8170 = vst [vmem:[#allocation23_spill] sm:$0xff] %v6467_v50 }
 0x2d3   : > { %2976 = vperm.xlu1 %5730, %v6459_v47   ;;  %v1951_v49 = vpop.xlane.xlu1 %1950 }
 0x2d4   : > { %8169 = vst [vmem:[#allocation22_spill] sm:$0xff] %v6464_v39  ;;  %v6475_v54 = vadd.f32 %v1951_v49, %v6272_v46 }
 0x2d5   : > { %v2921_v51 = vpop.xlane.xlu0 %2920 }
 0x2d6   : > { %2051 = vperm.xlu0 %5731, %v6464_v39   ;;  %v6472_v53 = vadd.f32 %v2921_v51, %v6180_v43  ;;  %8172 = vst [vmem:[#allocation25_spill] sm:$0xff] %v6475_v54 }
 0x2d7   : > { %3922 = vperm.xlu1 %5730, %v6467_v50   ;;  %v2900_v52 = vpop.xlane.xlu1 %2899 }
 0x2d8   : > { %8171 = vst [vmem:[#allocation24_spill] sm:$0xff] %v6472_v53  ;;  %v6483_v62 = vadd.f32 %v2900_v52, %v6272_v46 }
 0x2d9   : > { %v3870_v55 = vpop.xlane.xlu0 %3869 }
 0x2da   : > { %3000 = vperm.xlu0 %5731, %v6472_v53   ;;  %v6480_v58 = vadd.f32 %v3870_v55, %v6180_v43  ;;  %8174 = vst [vmem:[#allocation27_spill] sm:$0xff] %v6483_v62 }
 0x2db   : > { %2030 = vperm.xlu1 %5730, %v6475_v54   ;;  %v3849_v56 = vpop.xlane.xlu1 %3848 }
 0x2dc   : > { %8173 = vst [vmem:[#allocation26_spill] sm:$0xff] %v6480_v58  ;;  %v6491_v12 = vadd.f32 %v3849_v56, %v6272_v46 }
 0x2dd   : > { %v1975_v3 = vpop.xlane.xlu0 %1974 }
 0x2de   : > { %3949 = vperm.xlu0 %5731, %v6480_v58   ;;  %v6488_v9 = vadd.f32 %v1975_v3, %v6180_v43  ;;  %8176 = vst [vmem:[#allocation29_spill] sm:$0xff] %v6491_v12 }
 0x2df   : > { %2979 = vperm.xlu1 %5730, %v6483_v62   ;;  %v1954_v6 = vpop.xlane.xlu1 %1953 }
 0x2e0   : > { %8175 = vst [vmem:[#allocation28_spill] sm:$0xff] %v6488_v9  ;;  %v6499_v26 = vadd.f32 %v1954_v6, %v6272_v46 }
 0x2e1   : > { %v2924_v20 = vpop.xlane.xlu0 %2923 }
 0x2e2   : > { %2054 = vperm.xlu0 %5731, %v6488_v9   ;;  %v6496_v23 = vadd.f32 %v2924_v20, %v6180_v43  ;;  %8178 = vst [vmem:[#allocation31_spill] sm:$0xff] %v6499_v26 }
 0x2e3   : > { %3928 = vperm.xlu1 %5730, %v6491_v12   ;;  %v2903_v22 = vpop.xlane.xlu1 %2902 }
 0x2e4   : > { %8177 = vst [vmem:[#allocation30_spill] sm:$0xff] %v6496_v23  ;;  %v6507_v34 = vadd.f32 %v2903_v22, %v6272_v46 }
 0x2e5   : > { %v3873_v28 = vpop.xlane.xlu0 %3872 }
 0x2e6   : > { %3003 = vperm.xlu0 %5731, %v6496_v23   ;;  %v6504_v33 = vadd.f32 %v3873_v28, %v6180_v43  ;;  %8180 = vst [vmem:[#allocation33_spill] sm:$0xff] %v6507_v34 }
 0x2e7   : > { %2033 = vperm.xlu1 %5730, %v6499_v26   ;;  %v3852_v29 = vpop.xlane.xlu1 %3851 }
 0x2e8   : > { %8179 = vst [vmem:[#allocation32_spill] sm:$0xff] %v6504_v33  ;;  %v6515_v37 = vadd.f32 %v3852_v29, %v6272_v46 }
 0x2e9   : > { %v1978_v40 = vpop.xlane.xlu0 %1977 }
 0x2ea   : > { %3952 = vperm.xlu0 %5731, %v6504_v33   ;;  %v6512_v35 = vadd.f32 %v1978_v40, %v6180_v43  ;;  %8182 = vst [vmem:[#allocation35_spill] sm:$0xff] %v6515_v37 }
 0x2eb   : > { %2982 = vperm.xlu1 %5730, %v6507_v34   ;;  %v1957_v41 = vpop.xlane.xlu1 %1956 }
 0x2ec   : > { %8181 = vst [vmem:[#allocation34_spill] sm:$0xff] %v6512_v35  ;;  %v6523_v52 = vadd.f32 %v1957_v41, %v6272_v46 }
 0x2ed   : > { %v2927_v48 = vpop.xlane.xlu0 %2926 }
 0x2ee   : > { %2057 = vperm.xlu0 %5731, %v6512_v35   ;;  %v6520_v51 = vadd.f32 %v2927_v48, %v6180_v43  ;;  %8184 = vst [vmem:[#allocation37_spill] sm:$0xff] %v6523_v52  ;;  %v8206_v35 = vlaneseq }
 0x2ef   : > { %3931 = vperm.xlu1 %5730, %v6515_v37   ;;  %v2906_v49 = vpop.xlane.xlu1 %2905 }
 0x2f0   : > { %8183 = vst [vmem:[#allocation36_spill] sm:$0xff] %v6520_v51  ;;  %v6531_v6 = vadd.f32 %v2906_v49, %v6272_v46 }
 0x2f1   : > { %v3876_v55 = vpop.xlane.xlu0 %3875 }
 0x2f2   : > { %3006 = vperm.xlu0 %5731, %v6520_v51   ;;  %v6528_v3 = vadd.f32 %v3876_v55, %v6180_v43  ;;  %8186 = vst [vmem:[#allocation39_spill] sm:$0xff] %v6531_v6 }
 0x2f3   : > { %2036 = vperm.xlu1 %5730, %v6523_v52   ;;  %v3855_v56 = vpop.xlane.xlu1 %3854 }
 0x2f4   : > { %8185 = vst [vmem:[#allocation38_spill] sm:$0xff] %v6528_v3  ;;  %v6539_v29 = vadd.f32 %v3855_v56, %v6272_v46 }
 0x2f5   : > { %v1981_v20 = vpop.xlane.xlu0 %1980 }
 0x2f6   : > { %3955 = vperm.xlu0 %5731, %v6528_v3   ;;  %v6536_v28 = vadd.f32 %v1981_v20, %v6180_v43  ;;  %8188 = vst [vmem:[#allocation41_spill] sm:$0xff] %v6539_v29 }
 0x2f7   : > { %2985 = vperm.xlu1 %5730, %v6531_v6   ;;  %v1960_v22 = vpop.xlane.xlu1 %1959 }
 0x2f8   : > { %8187 = vst [vmem:[#allocation40_spill] sm:$0xff] %v6536_v28  ;;  %v6547_v49 = vadd.f32 %v1960_v22, %v6272_v46 }
 0x2f9   : > { %v2930_v40 = vpop.xlane.xlu0 %2929 }
 0x2fa   : > { %2060 = vperm.xlu0 %5731, %v6536_v28   ;;  %v6544_v48 = vadd.f32 %v2930_v40, %v6180_v43  ;;  %8190 = vst [vmem:[#allocation43_spill] sm:$0xff] %v6547_v49 }
 0x2fb   : > { %3934 = vperm.xlu1 %5730, %v6539_v29   ;;  %v2909_v41 = vpop.xlane.xlu1 %2908 }
 0x2fc   : > { %8189 = vst [vmem:[#allocation42_spill] sm:$0xff] %v6544_v48  ;;  %v6555_v13 = vadd.f32 %v2909_v41, %v6272_v46 }
 0x2fd   : > { %v3879_v55 = vpop.xlane.xlu0 %3878 }
 0x2fe   : > { %3009 = vperm.xlu0 %5731, %v6544_v48   ;;  %v6552_v56 = vadd.f32 %v3879_v55, %v6180_v43  ;;  %8192 = vst [vmem:[#allocation45_spill] sm:$0xff] %v6555_v13 }
 0x2ff   : > { %2039 = vperm.xlu1 %5730, %v6547_v49   ;;  %v3858_v20 = vpop.xlane.xlu1 %3857 }
 0x300   : > { %8191 = vst [vmem:[#allocation44_spill] sm:$0xff] %v6552_v56  ;;  %v6563_v19 = vadd.f32 %v3858_v20, %v6272_v46 }
 0x301   : > { %v1984_v30 = vpop.xlane.xlu0 %1983 }
 0x302   : > { %3958 = vperm.xlu0 %5731, %v6552_v56   ;;  %v6560_v22 = vadd.f32 %v1984_v30, %v6180_v43  ;;  %8194 = vst [vmem:[#allocation47_spill] sm:$0xff] %v6563_v19 }
 0x303   : > { %2988 = vperm.xlu1 %5730, %v6555_v13   ;;  %v2912_v40 = vpop.xlane.xlu1 %2911  ;;  %v1089_v13 = vand.u32 127, %v8206_v35 }
 0x304   : > { %8193 = vst [vmem:[#allocation46_spill] sm:$0xff] %v6560_v22  ;;  %v6571_v56 = vadd.f32 %v2912_v40, %v6272_v46 }
 0x305   : > { %v2933_v25 = vpop.xlane.xlu0 %2932 }
 0x306   : > { %2063 = vperm.xlu0 %5731, %v6560_v22   ;;  %v6568_v41 = vadd.f32 %v2933_v25, %v6180_v43  ;;  %8196 = vst [vmem:[#allocation49_spill] sm:$0xff] %v6571_v56 }
 0x307   : > { %3937 = vperm.xlu1 %5730, %v6563_v19   ;;  %v3861_v55 = vpop.xlane.xlu1 %3860 }
 0x308   : > { %8195 = vst [vmem:[#allocation48_spill] sm:$0xff] %v6568_v41  ;;  %v6579_v22 = vadd.f32 %v3861_v55, %v6272_v46 }
 0x309   : > { %v3882_v48 = vpop.xlane.xlu0 %3881 }
 0x30a   : > { %3012 = vperm.xlu0 %5731, %v6568_v41   ;;  %v6576_v20 = vadd.f32 %v3882_v48, %v6180_v43  ;;  %8198 = vst [vmem:[#allocation51_spill] sm:$0xff] %v6579_v22 }
 0x30b   : > { %2991 = vperm.xlu1 %5730, %v6571_v56   ;;  %v3864_v30 = vpop.xlane.xlu1 %3863 }
 0x30c   : > { %8197 = vst [vmem:[#allocation50_spill] sm:$0xff] %v6576_v20  ;;  %v6587_v41 = vadd.f32 %v3864_v30, %v6272_v46 }
 0x30d   : > { %v2936_v28 = vpop.xlane.xlu0 %2935 }
 0x30e   : > { %3961 = vperm.xlu0 %5731, %v6576_v20   ;;  %v6584_v40 = vadd.f32 %v2936_v28, %v6180_v43  ;;  %8200 = vst [vmem:[#allocation53_spill] sm:$0xff] %v6587_v41 }
 0x30f   : > { %3940 = vperm.xlu1 %5730, %v6579_v22   ;;  %v1963_v25 = vpop.xlane.xlu1 %1962 }
 0x310   : > { %8199 = vst [vmem:[#allocation52_spill] sm:$0xff] %v6584_v40  ;;  %v6595_v20 = vadd.f32 %v1963_v25, %v6180_v43 }
 0x311   : > { %v3885_v3 = vpop.xlane.xlu0 %3884 }
 0x312   : > { %3015 = vperm.xlu0 %5731, %v6584_v40   ;;  %v6592_v55 = vadd.f32 %v3885_v3, %v6180_v43  ;;  %8202 = vst [vmem:[#allocation55_spill] sm:$0xff] %v6595_v20 }
 0x313   : > { %3943 = vperm.xlu1 %5730, %v6587_v41   ;;  %v2915_v48 = vpop.xlane.xlu1 %2914 }
 0x314   : > { %8201 = vst [vmem:[#allocation54_spill] sm:$0xff] %v6592_v55  ;;  %v6603_v30 = vadd.f32 %v2915_v48, %v6180_v43 }
 0x315   : > { %v3888_v22 = vpop.xlane.xlu0 %3887 }
 0x316   : > { %3964 = vperm.xlu0 %5731, %v6592_v55   ;;  %v6600_v46 = vadd.f32 %v3888_v22, %v6180_v43  ;;  %8204 = vst [vmem:[#allocation57_spill] sm:$0xff] %v6603_v30 }
 0x317   : > { %2042 = vperm.xlu1 %5730, %v6595_v20   ;;  %v3867_v28 = vpop.xlane.xlu1 %3866 }
 0x318   : > { %8203 = vst [vmem:[#allocation56_spill] sm:$0xff] %v6600_v46  ;;  %v6608_v25 = vadd.f32 %v3867_v28, %v6180_v43 }
 0x31a   : > { %3967 = vperm.xlu0 %5731, %v6600_v46   ;;  %8205 = vst [vmem:[#allocation58_spill] sm:$0xff] %v6608_v25 }
 0x31b   : > { %2994 = vperm.xlu1 %5730, %v6603_v30   ;;  %v1042_v3 = vpop.permute.xlu1 %1041  ;;  %v6613_v30 = vsub.s32 %v1089_v13, %v6143_v14 }
 0x31d   : > { %v1066_v40 = vpop.permute.xlu0 %1065  ;;  %v1093_v23 = vrot.slane %v1042_v3, %v6613_v30 }
 0x31f   : > { %3946 = vperm.xlu1 %5730, %v6608_v25   ;;  %v1045_v55 = vpop.permute.xlu1 %1044 }
 0x320   : > { %v1097_v28 = vrot.slane %v1045_v55, %v6613_v30 }
 0x321   : > { %v1072_v20 = vpop.permute.xlu0 %1071 }
 0x322   : > { %v1155_v6 = vsel %vm1154_vm3, %v1097_v28, %v1093_v23 }
 0x323   : > { %v1048_v41 = vpop.permute.xlu1 %1047 }
 0x324   : > { %v1101_v25 = vrot.slane %v1048_v41, %v6613_v30 }
 0x325   : > { %v1075_v56 = vpop.permute.xlu0 %1074 }
 0x326   : > { %v1157_v55 = vsel %vm1156_vm4, %v1101_v25, %v1155_v6 }
 0x327   : > { %v1051_v22 = vpop.permute.xlu1 %1050 }
 0x328   : > { %v1105_v29 = vrot.slane %v1051_v22, %v6613_v30 }
 0x329   : > { %v1078_v51 = vpop.permute.xlu0 %1077 }
 0x32a   : > { %v1159_v3 = vsel %vm1158_vm5, %v1105_v29, %v1157_v55  ;;  %v1141_v55 = vrot.slane %v1078_v51, %v6613_v30 }
 0x32b   : > { %v1054_v19 = vpop.permute.xlu1 %1053 }
 0x32c   : > { %v1109_v35 = vrot.slane %v1054_v19, %v6613_v30  ;;  %v1125_v19 = vrot.slane %v1066_v40, %v6613_v30 }
 0x32d   : > { %v1081_v48 = vpop.permute.xlu0 %1080 }
 0x32e   : > { %v1161_v23 = vsel %vm1160_vm6, %v1109_v35, %v1159_v3 }
 0x32f   : > { %v1057_v46 = vpop.permute.xlu1 %1056 }
 0x330   : > { %v1113_v13 = vrot.slane %v1057_v46, %v6613_v30  ;;  %v1133_v46 = vrot.slane %v1072_v20, %v6613_v30  ;;  %v1145_v20 = vrot.slane %v1081_v48, %v6613_v30 }
 0x331   : > { %v1084_v33 = vpop.permute.xlu0 %1083 }
 0x332   : > { %v1163_v6 = vsel %vm1162_vm7, %v1113_v13, %v1161_v23  ;;  %v1149_v3 = vrot.slane %v1084_v33, %v6613_v30 }
 0x333   : > { %v1060_v43 = vpop.permute.xlu1 %1059 }
 0x334   : > { %v1117_v41 = vrot.slane %v1060_v43, %v6613_v30  ;;  %v1137_v43 = vrot.slane %v1075_v56, %v6613_v30 }
 0x335   : > { %v1087_v49 = vpop.permute.xlu0 %1086 }
 0x337   : > { %v1063_v9 = vpop.permute.xlu1 %1062 }
 0x338   : > { %v1121_v22 = vrot.slane %v1063_v9, %v6613_v30  ;;  %v1165_v9 = vsel %vm1164_vm8, %v1117_v41, %v1163_v6  ;;  %v1153_v41 = vrot.slane %v1087_v49, %v6613_v30 }
 0x339   : > { %v6622_v58 = vpop.permute.xlu0 %2021 }
 0x33a   : > { %v2072_v12 = vrot.slane %v6622_v58, %v6613_v30 }
 0x33b   : > { %v1069_v52 = vpop.permute.xlu1 %1068 }
 0x33c   : > { %v1129_v28 = vrot.slane %v1069_v52, %v6613_v30  ;;  %v1167_v52 = vsel %vm1166_vm9, %v1121_v22, %v1165_v9 }
 0x33d   : > { %v6633_v25 = vpop.permute.xlu0 %2973  ;;  %v1178_v51 = vsel %vm1177_vm10, %v1167_v52, -inf }
 0x33e   : > { %v1168_v29 = vsel %vm1154_vm3, %v1129_v28, %v1125_v19 }
 0x33f   : > { %v1169_v40 = vsel %vm1156_vm4, %v1133_v46, %v1168_v29  ;;  %v2019_v35 = vpop.permute.xlu1 %2018 }
 0x340   : > { %v1170_v13 = vsel %vm1158_vm5, %v1137_v43, %v1169_v40  ;;  %v2068_v26 = vrot.slane %v2019_v35, %v6613_v30 }
 0x341   : > { %v6644_v23 = vpop.permute.xlu0 %3925  ;;  %v1171_v56 = vsel %vm1160_vm6, %v1141_v55, %v1170_v13 }
 0x342   : > { %v1172_v19 = vsel %vm1162_vm7, %v1145_v20, %v1171_v56  ;;  %v2129_v50 = vsel %vm1154_vm3, %v2072_v12, %v2068_v26 }
 0x343   : > { %1179 = vmax.xlane.f32.xlu1 %v1178_v51  ;;  %v2025_v28 = vpop.permute.xlu1 %2024  ;;  %v1173_v22 = vsel %vm1164_vm8, %v1149_v3, %v1172_v19 }
 0x344   : > { %v1174_v48 = vsel %vm1166_vm9, %v1153_v41, %v1173_v22  ;;  %v2076_v42 = vrot.slane %v2025_v28, %v6613_v30 }
 0x345   : > { %v6652_v46 = vpop.permute.xlu0 %2045  ;;  %v1181_v33 = vsel %vm1177_vm10, %v1174_v48, -inf }
 0x346   : > { %1182 = vmax.xlane.f32.xlu0 %v1181_v33  ;;  %v2130_v18 = vsel %vm1156_vm4, %v2076_v42, %v2129_v50 }
 0x347   : > { %v2971_v6 = vpop.permute.xlu1 %2970 }
 0x348   : > { %v3020_v50 = vrot.slane %v2971_v6, %v6613_v30 }
 0x349   : > { %v6655_v43 = vpop.permute.xlu0 %2048 }
 0x34b   : > { %v2028_v29 = vpop.permute.xlu1 %2027 }
 0x34c   : > { %v2080_v62 = vrot.slane %v2028_v29, %v6613_v30 }
 0x34d   : > { %v6657_v49 = vpop.permute.xlu0 %2997 }
 0x34e   : > { %v2131_v28 = vsel %vm1158_vm5, %v2080_v62, %v2130_v18 }
 0x34f   : > { %v2977_v9 = vpop.permute.xlu1 %2976 }
 0x350   : > { %v3028_v18 = vrot.slane %v2977_v9, %v6613_v30 }
 0x351   : > { %v6659_v55 = vpop.permute.xlu0 %2051 }
 0x353   : > { %v6661_v40 = vpop.permute.xlu1 %3922 }
 0x355   : > { %v6663_v52 = vpop.permute.xlu0 %3000 }
 0x357   : > { %v2031_v20 = vpop.permute.xlu1 %2030 }
 0x358   : > { %v2084_v54 = vrot.slane %v2031_v20, %v6613_v30 }
 0x359   : > { %v6665_v13 = vpop.permute.xlu0 %3949 }
 0x35a   : > { %v2132_v44 = vsel %vm1160_vm6, %v2084_v54, %v2131_v28 }
 0x35b   : > { %v2980_v3 = vpop.permute.xlu1 %2979 }
 0x35d   : > { %v6667_v56 = vpop.permute.xlu0 %2054 }
 0x35f   : > { %v6669_v41 = vpop.permute.xlu1 %3928 }
 0x361   : > { %v6671_v51 = vpop.permute.xlu0 %3003 }
 0x363   : > { %v2034_v19 = vpop.permute.xlu1 %2033 }
 0x364   : > { %v2088_v47 = vrot.slane %v2034_v19, %v6613_v30 }
 0x365   : > { %v6673_v22 = vpop.permute.xlu0 %3952 }
 0x366   : > { %v2133_v29 = vsel %vm1162_vm7, %v2088_v47, %v2132_v44  ;;  %v3024_v44 = vrot.slane %v6633_v25, %v6613_v30  ;;  %v3032_v47 = vrot.slane %v2980_v3, %v6613_v30  ;;  %v3972_v3 = vrot.slane %v6661_v40, %v6613_v30 }
 0x367   : > { %v2983_v48 = vpop.permute.xlu1 %2982 }
 0x368   : > { %v3036_v62 = vrot.slane %v2983_v48, %v6613_v30 }
 0x369   : > { %v6675_v33 = vpop.permute.xlu0 %2057 }
 0x36b   : > { %v3932_v53 = vpop.permute.xlu1 %3931 }
 0x36d   : > { %v6677_v37 = vpop.permute.xlu0 %3006 }
 0x36f   : > { %v2037_v39 = vpop.permute.xlu1 %2036 }
 0x370   : > { %v2092_v35 = vrot.slane %v2037_v39, %v6613_v30 }
 0x371   : > { %v6679_v34 = vpop.permute.xlu0 %3955 }
 0x372   : > { %v2134_v12 = vsel %vm1164_vm8, %v2092_v35, %v2133_v29  ;;  %v3081_v35 = vsel %vm1154_vm3, %v3024_v44, %v3020_v50 }
 0x373   : > { %v2986_v45 = vpop.permute.xlu1 %2985 }
 0x374   : > { %v3040_v28 = vrot.slane %v2986_v45, %v6613_v30  ;;  %v3980_v45 = vrot.slane %v6669_v41, %v6613_v30 }
 0x375   : > { %v6683_v36 = vpop.permute.xlu0 %2060 }
 0x377   : > { %v3935_v31 = vpop.permute.xlu1 %3934 }
 0x379   : > { %v6693_v38 = vpop.permute.xlu0 %3009 }
 0x37b   : > { %v2040_v58 = vpop.permute.xlu1 %2039 }
 0x37c   : > { %v2096_v20 = vrot.slane %v2040_v58, %v6613_v30  ;;  %v3082_v58 = vsel %vm1156_vm4, %v3028_v18, %v3081_v35  ;;  %v3988_v18 = vrot.slane %v3935_v31, %v6613_v30 }
 0x37d   : > { %v6699_v32 = vpop.permute.xlu0 %3958  ;;  %v3083_v9 = vsel %vm1158_vm5, %v3032_v47, %v3082_v58 }
 0x37e   : > { %v2135_v26 = vsel %vm1166_vm9, %v2096_v20, %v2134_v12  ;;  %v3084_v29 = vsel %vm1160_vm6, %v3036_v62, %v3083_v9 }
 0x37f   : > { %v2989_v42 = vpop.permute.xlu1 %2988  ;;  %v2145_v39 = vsel %vm1177_vm10, %v2135_v26, -inf  ;;  %v3085_v48 = vsel %vm1162_vm7, %v3040_v28, %v3084_v29 }
 0x380   : > { %2146 = vmax.xlane.f32.xlu0 %v2145_v39  ;;  %v3044_v6 = vrot.slane %v2989_v42, %v6613_v30  ;;  %v3976_v42 = vrot.slane %v6644_v23, %v6613_v30  ;;  %v3984_v39 = vrot.slane %v3932_v53, %v6613_v30 }
 0x381   : > { %v6706_v54 = vpop.permute.xlu0 %2063 }
 0x382   : > { %v3086_v26 = vsel %vm1164_vm8, %v3044_v6, %v3085_v48  ;;  %v4033_v47 = vsel %vm1154_vm3, %v3976_v42, %v3972_v3  ;;  %v2104_v48 = vrot.slane %v6652_v46, %v6613_v30  ;;  %v3056_v46 = vrot.slane %v6657_v49, %v6613_v30 }
 0x383   : > { %v3938_v19 = vpop.permute.xlu1 %3937  ;;  %v4034_v41 = vsel %vm1156_vm4, %v3980_v45, %v4033_v47  ;;  %v2108_v45 = vrot.slane %v6655_v43, %v6613_v30  ;;  %v2124_v47 = vrot.slane %v6683_v36, %v6613_v30  ;;  %v2128_v49 = vrot.slane %v6706_v54, %v6613_v30 }
 0x384   : > { %v3992_v62 = vrot.slane %v3938_v19, %v6613_v30  ;;  %v4035_v53 = vsel %vm1158_vm5, %v3984_v39, %v4034_v41  ;;  %v2116_v39 = vrot.slane %v6667_v56, %v6613_v30  ;;  %v3064_v41 = vrot.slane %v6671_v51, %v6613_v30 }
 0x385   : > { %v6718_v20 = vpop.permute.xlu0 %3012  ;;  %v4036_v28 = vsel %vm1160_vm6, %v3988_v18, %v4035_v53  ;;  %v4008_v53 = vrot.slane %v6665_v13, %v6613_v30  ;;  %v3072_v51 = vrot.slane %v6693_v38, %v6613_v30  ;;  %v4012_v13 = vrot.slane %v6673_v22, %v6613_v30 }
 0x386   : > { %v4037_v31 = vsel %vm1162_vm7, %v3992_v62, %v4036_v28  ;;  %v4020_v22 = vrot.slane %v6699_v32, %v6613_v30 }
 0x387   : > { %v2992_v25 = vpop.permute.xlu1 %2991 }
 0x388   : > { %v3048_v12 = vrot.slane %v2992_v25, %v6613_v30 }
 0x389   : > { %v6736_v35 = vpop.permute.xlu0 %3961 }
 0x38a   : > { %v3087_v50 = vsel %vm1166_vm9, %v3048_v12, %v3086_v26  ;;  %v2112_v26 = vrot.slane %v6659_v55, %v6613_v30  ;;  %v3060_v55 = vrot.slane %v6663_v52, %v6613_v30  ;;  %v3068_v52 = vrot.slane %v6677_v37, %v6613_v30 }
 0x38b   : > { %v3941_v44 = vpop.permute.xlu1 %3940  ;;  %v3097_v40 = vsel %vm1177_vm10, %v3087_v50, -inf  ;;  %v3076_v37 = vrot.slane %v6718_v20, %v6613_v30 }
 0x38c   : > { %3098 = vmax.xlane.f32.xlu0 %v3097_v40  ;;  %v3996_v23 = vrot.slane %v3941_v44, %v6613_v30  ;;  %v2120_v44 = vrot.slane %v6675_v33, %v6613_v30 }
 0x38d   : > { %v3016_v29 = vpop.permute.xlu0 %3015 }
 0x38e   : > { %v4038_v9 = vsel %vm1164_vm8, %v3996_v23, %v4037_v31  ;;  %v3080_v38 = vrot.slane %v3016_v29, %v6613_v30 }
 0x38f   : > { %v3944_v58 = vpop.permute.xlu1 %3943 }
 0x390   : > { %v4000_v6 = vrot.slane %v3944_v58, %v6613_v30 }
 0x391   : > { %v3965_v56 = vpop.permute.xlu0 %3964 }
 0x392   : > { %v4039_v19 = vsel %vm1166_vm9, %v4000_v6, %v4038_v9 }
 0x393   : > { %v2043_v25 = vpop.permute.xlu1 %2042  ;;  %v4049_v3 = vsel %vm1177_vm10, %v4039_v19, -inf }
 0x394   : > { %v2100_v12 = vrot.slane %v2043_v25, %v6613_v30  ;;  %4050 = vmax.xlane.f32.xlu0 %v4049_v3  ;;  %v4016_v25 = vrot.slane %v6679_v34, %v6613_v30 }
 0x396   : > { %v2136_v42 = vsel %vm1154_vm3, %v2104_v48, %v2100_v12  ;;  %v3968_v12 = vpop.permute.xlu0 %3967 }
 0x397   : > { %v2137_v50 = vsel %vm1156_vm4, %v2108_v45, %v2136_v42  ;;  %v2995_v18 = vpop.permute.xlu1 %2994  ;;  %v4028_v42 = vrot.slane %v3965_v56, %v6613_v30  ;;  %v4032_v32 = vrot.slane %v3968_v12, %v6613_v30 }
 0x398   : > { %v2138_v40 = vsel %vm1158_vm5, %v2112_v26, %v2137_v50  ;;  %v3052_v43 = vrot.slane %v2995_v18, %v6613_v30  ;;  %v4024_v26 = vrot.slane %v6736_v35, %v6613_v30 }
 0x399   : > { %v2139_v62 = vsel %vm1160_vm6, %v2116_v39, %v2138_v40  ;;  %v6813_v40 = vsub.s32 2, %v6143_v14 }
 0x39a   : > { %v3088_v33 = vsel %vm1154_vm3, %v3056_v46, %v3052_v43  ;;  %v2140_v23 = vsel %vm1162_vm7, %v2120_v44, %v2139_v62  ;;  %v6816_v43 = vsub.s32 3, %v6143_v14 }
 0x39b   : > { %v3089_v36 = vsel %vm1156_vm4, %v3060_v55, %v3088_v33  ;;  %v3947_v28 = vpop.permute.xlu1 %3946  ;;  %v2141_v58 = vsel %vm1164_vm8, %v2124_v47, %v2140_v23 }
 0x39c   : > { %v3090_v54 = vsel %vm1158_vm5, %v3064_v41, %v3089_v36  ;;  %v4004_v31 = vrot.slane %v3947_v28, %v6613_v30  ;;  %v2142_v6 = vsel %vm1166_vm9, %v2128_v49, %v2141_v58  ;;  %v6822_v41 = vsub.s32 4, %v6143_v14 }
 0x39d   : > { %v2148_v9 = vsel %vm1177_vm10, %v2142_v6, -inf  ;;  %v3091_v19 = vsel %vm1160_vm6, %v3068_v52, %v3090_v54  ;;  %v6841_v6 = vsub.s32 6, %v6143_v14 }
 0x39e   : > { %v4040_v3 = vsel %vm1154_vm3, %v4008_v53, %v4004_v31  ;;  %2149 = vmax.xlane.f32.xlu1 %v2148_v9  ;;  %v3092_v48 = vsel %vm1162_vm7, %v3072_v51, %v3091_v19  ;;  %v6833_v51 = vsub.s32 5, %v6143_v14 }
 0x39f   : > { %v4041_v20 = vsel %vm1156_vm4, %v4012_v13, %v4040_v3  ;;  %v3093_v45 = vsel %vm1164_vm8, %v3076_v37, %v3092_v48 }
 0x3a0   : > { %v4042_v34 = vsel %vm1158_vm5, %v4016_v25, %v4041_v20  ;;  %v3094_v29 = vsel %vm1166_vm9, %v3080_v38, %v3093_v45  ;;  %v6849_v38 = vsub.s32 7, %v6143_v14 }
 0x3a1   : > { %v3100_v39 = vsel %vm1177_vm10, %v3094_v29, -inf  ;;  %v4043_v50 = vsel %vm1160_vm6, %v4020_v22, %v4042_v34 }
 0x3a2   : > { %3101 = vmax.xlane.f32.xlu1 %v3100_v39  ;;  %v4044_v18 = vsel %vm1162_vm7, %v4024_v26, %v4043_v50 }
 0x3a3   : > { %v4045_v46 = vsel %vm1164_vm8, %v4028_v42, %v4044_v18 }
 0x3a4   : > { %v4046_v44 = vsel %vm1166_vm9, %v4032_v32, %v4045_v46 }
 0x3a5   : > { %v4052_v35 = vsel %vm1177_vm10, %v4046_v44, -inf }
 0x3a6   : > { %4053 = vmax.xlane.f32.xlu1 %v4052_v35 }
 0x3cc   : > { %v1180_v55 = vpop.xlane.xlu1 %1179 }
 0x3cd   : > { %v1189_v47 = vrot.slane %v1180_v55, %v6149_v15  ;;  %v1193_v56 = vrot.slane %v1180_v55, %v6152_v17  ;;  %v1197_v62 = vrot.slane %v1180_v55, %v6813_v40  ;;  %v1201_v49 = vrot.slane %v1180_v55, %v6816_v43 }
 0x3ce   : > { %v1205_v54 = vrot.slane %v1180_v55, %v6822_v41  ;;  %v1209_v13 = vrot.slane %v1180_v55, %v6833_v51  ;;  %v1217_v20 = vrot.slane %v1180_v55, %v6849_v38 }
 0x3cf   : > { %v1266_v33 = vsub.f32 %v6349_v57, %v1189_v47  ;;  %v1267_v23 = vsub.f32 %v6357_v61, %v1193_v56  ;;  %v6827_v53 = vpop.xlane.xlu0 %1182  ;;  %v1268_v52 = vsub.f32 %v6366_v1, %v1197_v62  ;;  %v1269_v31 = vsub.f32 %v6375_v5, %v1201_v49 }
 0x3d0   : > { %v1225_v58 = vrot.slane %v6827_v53, %v6152_v17  ;;  %v1229_v61 = vrot.slane %v6827_v53, %v6813_v40  ;;  %v1270_v37 = vsub.f32 %v6384_v8, %v1205_v54  ;;  %v1233_v5 = vrot.slane %v6827_v53, %v6816_v43 }
 0x3d1   : > { %v1282_v36 = vmul.f32 1.442695, %v1266_v33  ;;  %v1284_v28 = vmul.f32 1.442695, %v1267_v23  ;;  %v1286_v57 = vmul.f32 1.442695, %v1268_v52  ;;  %v1271_v3 = vsub.f32 %v6393_v10, %v1209_v13 }
 0x3d2   : > { %v1275_v1 = vsub.f32 %v6419_v24, %v1225_v58  ;;  %v1288_v9 = vmul.f32 1.442695, %v1269_v31  ;;  %v1276_v19 = vsub.f32 %v6362_v0, %v1229_v61  ;;  %v1213_v24 = vrot.slane %v1180_v55, %v6841_v6 }
 0x3d3   : > { %5753 = vpow2.f32 %v1282_v36  ;;  %v1290_v48 = vmul.f32 1.442695, %v1270_v37  ;;  %v1237_v8 = vrot.slane %v6827_v53, %v6822_v41  ;;  %v1277_v22 = vsub.f32 %v6371_v60, %v1233_v5 }
 0x3d4   : > { %5755 = vpow2.f32 %v1284_v28  ;;  %v1300_v25 = vmul.f32 1.442695, %v1275_v1  ;;  %v1302_v12 = vmul.f32 1.442695, %v1276_v19  ;;  %v1272_v0 = vsub.f32 %v6402_v16, %v1213_v24 }
 0x3d5   : > { %5757 = vpow2.f32 %v1286_v57  ;;  %v1292_v14 = vmul.f32 1.442695, %v1271_v3  ;;  %v1241_v10 = vrot.slane %v6827_v53, %v6833_v51  ;;  %v1278_v26 = vsub.f32 %v6380_v63, %v1237_v8 }
 0x3d6   : > { %5759 = vpow2.f32 %v1288_v9  ;;  %v1304_v34 = vmul.f32 1.442695, %v1277_v22  ;;  %v1273_v60 = vsub.f32 %v6411_v21, %v1217_v20  ;;  %v1294_v16 = vmul.f32 1.442695, %v1272_v0  ;;  %v8207_v9 = vld [vmem:[#allocation15_spill] sm:$0xff]  ;;  %v8209_v20 = vld [vmem:[#allocation17_spill] sm:$0xff] }
 0x3d7   : > { %5761 = vpow2.f32 %v1300_v25  ;;  %v1221_v42 = vrot.slane %v6827_v53, %v6149_v15  ;;  %v1245_v39 = vrot.slane %v6827_v53, %v6841_v6  ;;  %v1279_v63 = vsub.f32 %v6389_v2, %v1241_v10 }
 0x3d8   : > { %5763 = vpow2.f32 %v1290_v48  ;;  %v1306_v50 = vmul.f32 1.442695, %v1278_v26  ;;  %v1296_v18 = vmul.f32 1.442695, %v1273_v60  ;;  %v1249_v44 = vrot.slane %v6827_v53, %v6849_v38 }
 0x3d9   : > { %5765 = vpow2.f32 %v1302_v12  ;;  %v1274_v21 = vsub.f32 %v6353_v59, %v1221_v42  ;;  %v1280_v35 = vsub.f32 %v6398_v4, %v1245_v39  ;;  %v1308_v55 = vmul.f32 1.442695, %v1279_v63 }
 0x3da   : > { %5767 = vpow2.f32 %v1292_v14  ;;  %v1281_v59 = vsub.f32 %v6407_v7, %v1249_v44  ;;  %v8210_v14 = vld [vmem:[#allocation13_spill] sm:$0xff] }
 0x3db   : > { %5769 = vpow2.f32 %v1304_v34  ;;  %v1298_v47 = vmul.f32 1.442695, %v1274_v21  ;;  %v1310_v62 = vmul.f32 1.442695, %v1280_v35 }
 0x3dc   : > { %5771 = vpow2.f32 %v1294_v16  ;;  %v1312_v33 = vmul.f32 1.442695, %v1281_v59  ;;  %v8211_v16 = vld [vmem:[#allocation21_spill] sm:$0xff] }
 0x3dd   : > { %5773 = vpow2.f32 %v1306_v50 }
 0x3de   : > { %5775 = vpow2.f32 %v1296_v18 }
 0x3df   : > { %5777 = vpow2.f32 %v1308_v55  ;;  %v8212_v55 = vld [vmem:[#allocation23_spill] sm:$0xff] }
 0x3e0   : > { %v6858_v45 = vpop.eup %5753  ;;  %5779 = vpow2.f32 %v1298_v47 }
 0x3e1   : > { %v6863_v29 = vpop.eup %5755  ;;  %1331 = vperm.xlu0 %5731, %v6858_v45   ;;  %5781 = vpow2.f32 %v1310_v62  ;;  %v8214_v62 = vld [vmem:[#allocation14_spill] sm:$0xff] }
 0x3e2   : > { %1334 = vperm.xlu1 %5730, %v6863_v29   ;;  %v6873_v32 = vpop.eup %5757  ;;  %5783 = vpow2.f32 %v1312_v33 }
 0x3e3   : > { %v6877_v46 = vpop.eup %5759 }
 0x3e4   : > { %v6882_v2 = vpop.eup %5761 }
 0x3e5   : > { %1358 = vperm.xlu0 %5731, %v6882_v2   ;;  %v6886_v56 = vpop.eup %5763 }
 0x3e6   : > { %1337 = vperm.xlu1 %5730, %v6873_v32   ;;  %v6889_v49 = vpop.eup %5765 }
 0x3e7   : > { %v6893_v4 = vpop.eup %5767 }
 0x3e8   : > { %v6895_v23 = vpop.eup %5769 }
 0x3e9   : > { %1361 = vperm.xlu0 %5731, %v6889_v49   ;;  %v6899_v7 = vpop.eup %5771 }
 0x3ea   : > { %1340 = vperm.xlu1 %5730, %v6877_v46   ;;  %v6901_v53 = vpop.eup %5773 }
 0x3eb   : > { %v6905_v52 = vpop.eup %5775 }
 0x3ec   : > { %v6907_v36 = vpop.eup %5777 }
 0x3ed   : > { %1364 = vperm.xlu0 %5731, %v6895_v23   ;;  %v6911_v28 = vpop.eup %5779 }
 0x3ee   : > { %1343 = vperm.xlu1 %5730, %v6886_v56   ;;  %v6913_v58 = vpop.eup %5781 }
 0x3ef   : > { %v6917_v54 = vpop.eup %5783 }
 0x3f1   : > { %1367 = vperm.xlu0 %5731, %v6901_v53  }
 0x3f2   : > { %1346 = vperm.xlu1 %5730, %v6893_v4  }
 0x3f5   : > { %1370 = vperm.xlu0 %5731, %v6907_v36  }
 0x3f6   : > { %1349 = vperm.xlu1 %5730, %v6899_v7  }
 0x3f9   : > { %1373 = vperm.xlu0 %5731, %v6913_v58  }
 0x3fa   : > { %1352 = vperm.xlu1 %5730, %v6905_v52  }
 0x3fd   : > { %1376 = vperm.xlu0 %5731, %v6917_v54  }
 0x3fe   : > { %1355 = vperm.xlu1 %5730, %v6911_v28  }
 0x409   : > { %v6920_v31 = vpop.xlane.xlu0 %2146 }
 0x40a   : > { %v2156_v57 = vrot.slane %v6920_v31, %v6149_v15  ;;  %v2160_v61 = vrot.slane %v6920_v31, %v6152_v17  ;;  %v2164_v1 = vrot.slane %v6920_v31, %v6813_v40  ;;  %v2168_v3 = vrot.slane %v6920_v31, %v6816_v43 }
 0x40b   : > { %v2172_v44 = vrot.slane %v6920_v31, %v6822_v41 }
 0x40c   : > { %v2233_v13 = vsub.f32 %v6427_v27, %v2156_v57  ;;  %v2234_v37 = vsub.f32 %v6416_v11, %v2160_v61  ;;  %v2235_v5 = vsub.f32 %v8207_v9, %v2164_v1  ;;  %v8208_v11 = vld [vmem:[#allocation19_spill] sm:$0xff]  ;;  %v8215_v1 = vld [vmem:[#allocation25_spill] sm:$0xff] }
 0x40d   : > { %v2236_v22 = vsub.f32 %v8208_v11, %v2168_v3  ;;  %v8216_v9 = vld [vmem:[#allocation27_spill] sm:$0xff] }
 0x40e   : > { %v2249_v19 = vmul.f32 1.442695, %v2233_v13  ;;  %v2251_v25 = vmul.f32 1.442695, %v2234_v37  ;;  %v2253_v24 = vmul.f32 1.442695, %v2235_v5  ;;  %v2237_v13 = vsub.f32 %v8215_v1, %v2172_v44 }
 0x40f   : > { %v2255_v60 = vmul.f32 1.442695, %v2236_v22  ;;  %v2176_v22 = vrot.slane %v6920_v31, %v6833_v51 }
 0x410   : > { %5785 = vpow2.f32 %v2249_v19 }
 0x411   : > { %5787 = vpow2.f32 %v2251_v25 }
 0x412   : > { %5789 = vpow2.f32 %v2253_v24  ;;  %v2257_v24 = vmul.f32 1.442695, %v2237_v13 }
 0x415   : > { %v6933_v48 = vpop.xlane.xlu0 %3098 }
 0x416   : > { %v3108_v8 = vrot.slane %v6933_v48, %v6149_v15  ;;  %v3112_v27 = vrot.slane %v6933_v48, %v6152_v17  ;;  %v3116_v12 = vrot.slane %v6933_v48, %v6813_v40  ;;  %v3120_v57 = vrot.slane %v6933_v48, %v6816_v43 }
 0x417   : > { %v3124_v44 = vrot.slane %v6933_v48, %v6822_v41 }
 0x418   : > { %v3185_v0 = vsub.f32 %v8209_v20, %v3108_v8  ;;  %v3186_v10 = vsub.f32 %v8210_v14, %v3112_v27  ;;  %v3187_v42 = vsub.f32 %v8211_v16, %v3116_v12  ;;  %v3188_v5 = vsub.f32 %v8216_v9, %v3120_v57  ;;  %v8219_v20 = vld [vmem:[#allocation29_spill] sm:$0xff]  ;;  %v8220_v14 = vld [vmem:[#allocation16_spill] sm:$0xff] }
 0x419   : > { %v8225_v57 = vld [vmem:[#allocation20_spill] sm:$0xff] }
 0x41a   : > { %v3201_v26 = vmul.f32 1.442695, %v3185_v0  ;;  %v3203_v34 = vmul.f32 1.442695, %v3186_v10  ;;  %v3205_v35 = vmul.f32 1.442695, %v3187_v42 }
 0x41b   : > { %v3207_v12 = vmul.f32 1.442695, %v3188_v5 }
 0x41c   : > { %5791 = vpow2.f32 %v3201_v26  ;;  %v8221_v26 = vld [vmem:[#allocation18_spill] sm:$0xff] }
 0x41d   : > { %v6945_v39 = vpop.eup %5785  ;;  %5793 = vpow2.f32 %v3203_v34  ;;  %v6947_v63 = vpop.xlane.xlu0 %4050 }
 0x41e   : > { %v6949_v50 = vpop.eup %5787  ;;  %v4060_v18 = vrot.slane %v6947_v63, %v6149_v15  ;;  %v4064_v21 = vrot.slane %v6947_v63, %v6152_v17  ;;  %2298 = vperm.xlu1 %5730, %v6945_v39   ;;  %5795 = vpow2.f32 %v2255_v60  ;;  %v4068_v19 = vrot.slane %v6947_v63, %v6813_v40 }
 0x41f   : > { %2301 = vperm.xlu0 %5731, %v6949_v50   ;;  %v6960_v59 = vpop.eup %5789  ;;  %5797 = vpow2.f32 %v3205_v35  ;;  %v4072_v5 = vrot.slane %v6947_v63, %v6816_v43 }
 0x420   : > { %v4137_v47 = vsub.f32 %v8212_v55, %v4060_v18  ;;  %8213 = vst [vmem:[#allocation15_spill] sm:$0xff] %v6960_v59  ;;  %v4138_v33 = vsub.f32 %v8214_v62, %v4064_v21  ;;  %v4139_v0 = vsub.f32 %v8219_v20, %v4068_v19  ;;  %v8223_v18 = vld [vmem:[#allocation31_spill] sm:$0xff]  ;;  %v8228_v19 = vld [vmem:[#allocation22_spill] sm:$0xff]  ;;  %v2180_v20 = vrot.slane %v6920_v31, %v6841_v6 }
 0x421   : > { %v2238_v21 = vsub.f32 %v8223_v18, %v2176_v22 }
 0x422   : > { %2304 = vperm.xlu1 %5730, %v6960_v59   ;;  %v4155_v61 = vmul.f32 1.442695, %v4138_v33  ;;  %v4153_v37 = vmul.f32 1.442695, %v4137_v47  ;;  %v4157_v35 = vmul.f32 1.442695, %v4139_v0 }
 0x423   : > { %v2259_v13 = vmul.f32 1.442695, %v2238_v21 }
 0x424   : > { %5799 = vpow2.f32 %v4155_v61 }
 0x425   : > { %5801 = vpow2.f32 %v4153_v37  ;;  %v8227_v37 = vld [vmem:[#allocation33_spill] sm:$0xff] }
 0x426   : > { %5803 = vpow2.f32 %v2257_v24  ;;  %v3189_v9 = vsub.f32 %v8227_v37, %v3124_v44  ;;  %v8233_v44 = vld [vmem:[#allocation37_spill] sm:$0xff] }
 0x427   : > { %v6970_v25 = vpop.xlane.xlu1 %2149  ;;  %5805 = vpow2.f32 %v3207_v12 }
 0x428   : > { %v2192_v3 = vrot.slane %v6970_v25, %v6152_v17  ;;  %v2196_v8 = vrot.slane %v6970_v25, %v6813_v40  ;;  %v2200_v47 = vrot.slane %v6970_v25, %v6816_v43  ;;  %v3209_v0 = vmul.f32 1.442695, %v3189_v9 }
 0x429   : > { %v6976_v27 = vpop.eup %5791 }
 0x42a   : > { %8217 = vst [vmem:[#allocation19_spill] sm:$0xff] %v6976_v27  ;;  %v6978_v11 = vpop.eup %5793  ;;  %3250 = vperm.xlu1 %5730, %v6976_v27   ;;  %v2242_v10 = vsub.f32 %v8220_v14, %v2192_v3  ;;  %v2243_v34 = vsub.f32 %v8221_v26, %v2196_v8  ;;  %v2244_v24 = vsub.f32 %v8228_v19, %v2200_v47  ;;  %v8230_v14 = vld [vmem:[#allocation35_spill] sm:$0xff] }
 0x42b   : > { %8218 = vst [vmem:[#allocation17_spill] sm:$0xff] %v6978_v11  ;;  %3253 = vperm.xlu0 %5731, %v6978_v11   ;;  %v6987_v60 = vpop.xlane.xlu1 %3101  ;;  %v6989_v16 = vpop.eup %5795  ;;  %v8237_v19 = vld [vmem:[#allocation39_spill] sm:$0xff] }
 0x42c   : > { %8222 = vst [vmem:[#allocation13_spill] sm:$0xff] %v6989_v16  ;;  %v2267_v42 = vmul.f32 1.442695, %v2242_v10  ;;  %v3144_v55 = vrot.slane %v6987_v60, %v6152_v17  ;;  %v2269_v62 = vmul.f32 1.442695, %v2243_v34  ;;  %v6999_v33 = vpop.eup %5797  ;;  %v3148_v3 = vrot.slane %v6987_v60, %v6813_v40  ;;  %v8231_v34 = vld [vmem:[#allocation24_spill] sm:$0xff] }
 0x42d   : > { %8224 = vst [vmem:[#allocation21_spill] sm:$0xff] %v6999_v33  ;;  %v4140_v10 = vsub.f32 %v8230_v14, %v4072_v5  ;;  %v2271_v26 = vmul.f32 1.442695, %v2244_v24  ;;  %v3152_v14 = vrot.slane %v6987_v60, %v6816_v43 }
 0x42e   : > { %2307 = vperm.xlu1 %5730, %v6989_v16   ;;  %5807 = vpow2.f32 %v2267_v42  ;;  %v3194_v61 = vsub.f32 %v8225_v57, %v3144_v55  ;;  %v3195_v42 = vsub.f32 %v8231_v34, %v3148_v3  ;;  %v3128_v55 = vrot.slane %v6933_v48, %v6833_v51 }
 0x42f   : > { %5809 = vpow2.f32 %v4157_v35  ;;  %v7014_v12 = vpop.xlane.xlu1 %4053  ;;  %v2239_v35 = vsub.f32 %v8233_v44, %v2180_v20  ;;  %v4159_v47 = vmul.f32 1.442695, %v4140_v10  ;;  %v2204_v57 = vrot.slane %v6970_v25, %v6822_v41  ;;  %v8239_v20 = vld [vmem:[#allocation28_spill] sm:$0xff] }
 0x430   : > { %5811 = vpow2.f32 %v2269_v62  ;;  %v3219_v22 = vmul.f32 1.442695, %v3194_v61  ;;  %v4096_v18 = vrot.slane %v7014_v12, %v6152_v17  ;;  %v3221_v61 = vmul.f32 1.442695, %v3195_v42 }
 0x431   : > { %v7003_v1 = vpop.eup %5799  ;;  %5813 = vpow2.f32 %v2259_v13  ;;  %v8235_v13 = vld [vmem:[#allocation26_spill] sm:$0xff]  ;;  %v2261_v5 = vmul.f32 1.442695, %v2239_v35  ;;  %v3190_v24 = vsub.f32 %v8237_v19, %v3128_v55  ;;  %v4076_v3 = vrot.slane %v6947_v63, %v6822_v41 }
 0x432   : > { %3256 = vperm.xlu1 %5730, %v6999_v33   ;;  %8226 = vst [vmem:[#allocation23_spill] sm:$0xff] %v7003_v1  ;;  %4205 = vperm.xlu0 %5731, %v7003_v1   ;;  %v7012_v8 = vpop.eup %5801  ;;  %5815 = vpow2.f32 %v3219_v22  ;;  %v4146_v37 = vsub.f32 %v8235_v13, %v4096_v18  ;;  %v2184_v34 = vrot.slane %v6920_v31, %v6849_v38  ;;  %v8241_v18 = vld [vmem:[#allocation41_spill] sm:$0xff]  ;;  %v8245_v31 = vld [vmem:[#allocation43_spill] sm:$0xff] }
 0x433   : > { %8229 = vst [vmem:[#allocation14_spill] sm:$0xff] %v7012_v8  ;;  %v7023_v21 = vpop.eup %5803  ;;  %5817 = vpow2.f32 %v3209_v0  ;;  %v2245_v0 = vsub.f32 %v8239_v20, %v2204_v57  ;;  %v3211_v42 = vmul.f32 1.442695, %v3190_v24  ;;  %v4141_v44 = vsub.f32 %v8241_v18, %v4076_v3  ;;  %v8249_v18 = vld [vmem:[#allocation45_spill] sm:$0xff] }
 0x434   : > { %8232 = vst [vmem:[#allocation25_spill] sm:$0xff] %v7023_v21  ;;  %v7029_v62 = vpop.eup %5805  ;;  %5819 = vpow2.f32 %v2271_v26  ;;  %v4171_v10 = vmul.f32 1.442695, %v4146_v37  ;;  %v2240_v37 = vsub.f32 %v8245_v31, %v2184_v34  ;;  %v2208_v3 = vrot.slane %v6970_v25, %v6833_v51  ;;  %v8251_v31 = vld [vmem:[#allocation34_spill] sm:$0xff] }
 0x435   : > { %8234 = vst [vmem:[#allocation27_spill] sm:$0xff] %v7029_v62  ;;  %5821 = vpow2.f32 %v4159_v47  ;;  %v2273_v55 = vmul.f32 1.442695, %v2245_v0  ;;  %v8243_v47 = vld [vmem:[#allocation30_spill] sm:$0xff]  ;;  %v4161_v19 = vmul.f32 1.442695, %v4141_v44 }
 0x436   : > { %4202 = vperm.xlu1 %5730, %v7012_v8   ;;  %5823 = vpow2.f32 %v3221_v61  ;;  %v3196_v57 = vsub.f32 %v8243_v47, %v3152_v14  ;;  %v4100_v61 = vrot.slane %v7014_v12, %v6813_v40  ;;  %v8247_v0 = vld [vmem:[#allocation32_spill] sm:$0xff]  ;;  %v2263_v34 = vmul.f32 1.442695, %v2240_v37 }
 0x437   : > { %5825 = vpow2.f32 %v2261_v5  ;;  %v3132_v5 = vrot.slane %v6933_v48, %v6841_v6  ;;  %v3136_v37 = vrot.slane %v6933_v48, %v6849_v38 }
 0x438   : > { %5827 = vpow2.f32 %v4171_v10  ;;  %v3223_v20 = vmul.f32 1.442695, %v3196_v57  ;;  %v4147_v14 = vsub.f32 %v8247_v0, %v4100_v61  ;;  %v3156_v57 = vrot.slane %v6987_v60, %v6822_v41 }
 0x439   : > { %5829 = vpow2.f32 %v3211_v42  ;;  %v3191_v47 = vsub.f32 %v8249_v18, %v3132_v5  ;;  %v4080_v42 = vrot.slane %v6947_v63, %v6833_v51 }
 0x43a   : > { %2310 = vperm.xlu1 %5730, %v7023_v21   ;;  %5831 = vpow2.f32 %v2273_v55  ;;  %v2246_v55 = vsub.f32 %v8251_v31, %v2208_v3  ;;  %v4173_v61 = vmul.f32 1.442695, %v4147_v14  ;;  %v8255_v31 = vld [vmem:[#allocation36_spill] sm:$0xff] }
 0x43b   : > { %v7034_v9 = vpop.eup %5807  ;;  %5833 = vpow2.f32 %v4161_v19  ;;  %v3213_v5 = vmul.f32 1.442695, %v3191_v47  ;;  %v8253_v19 = vld [vmem:[#allocation47_spill] sm:$0xff]  ;;  %v4084_v47 = vrot.slane %v6947_v63, %v6841_v6 }
 0x43c   : > { %8236 = vst [vmem:[#allocation29_spill] sm:$0xff] %v7034_v9  ;;  %2325 = vperm.xlu0 %5731, %v7034_v9   ;;  %v7041_v22 = vpop.eup %5809  ;;  %5835 = vpow2.f32 %v3223_v20  ;;  %v4142_v18 = vsub.f32 %v8253_v19, %v4080_v42  ;;  %v2275_v3 = vmul.f32 1.442695, %v2246_v55  ;;  %v4104_v20 = vrot.slane %v7014_v12, %v6816_v43  ;;  %v8259_v19 = vld [vmem:[#allocation38_spill] sm:$0xff] }
 0x43d   : > { %8238 = vst [vmem:[#allocation16_spill] sm:$0xff] %v7041_v22  ;;  %v7046_v26 = vpop.eup %5811  ;;  %5837 = vpow2.f32 %v2263_v34  ;;  %v8257_v34 = vld [vmem:[#allocation49_spill] sm:$0xff] }
 0x43e   : > { %3259 = vperm.xlu1 %5730, %v7029_v62   ;;  %8240 = vst [vmem:[#allocation18_spill] sm:$0xff] %v7046_v26  ;;  %v7053_v35 = vpop.eup %5813  ;;  %5839 = vpow2.f32 %v4173_v61  ;;  %v3192_v48 = vsub.f32 %v8257_v34, %v3136_v37  ;;  %v4163_v42 = vmul.f32 1.442695, %v4142_v18  ;;  %v8261_v18 = vld [vmem:[#allocation51_spill] sm:$0xff] }
 0x43f   : > { %8242 = vst [vmem:[#allocation31_spill] sm:$0xff] %v7053_v35  ;;  %v7058_v13 = vpop.eup %5815  ;;  %5841 = vpow2.f32 %v3213_v5  ;;  %v4088_v5 = vrot.slane %v6947_v63, %v6849_v38  ;;  %v4143_v34 = vsub.f32 %v8261_v18, %v4084_v47  ;;  %v8265_v63 = vld [vmem:[#allocation53_spill] sm:$0xff] }
 0x440   : > { %2328 = vperm.xlu0 %5731, %v7046_v26   ;;  %8244 = vst [vmem:[#allocation20_spill] sm:$0xff] %v7058_v13  ;;  %v7065_v24 = vpop.eup %5817  ;;  %5843 = vpow2.f32 %v2275_v3  ;;  %v3215_v37 = vmul.f32 1.442695, %v3192_v48 }
 0x441   : > { %8246 = vst [vmem:[#allocation33_spill] sm:$0xff] %v7065_v24  ;;  %v7070_v10 = vpop.eup %5819  ;;  %5845 = vpow2.f32 %v4163_v42  ;;  %v4144_v48 = vsub.f32 %v8265_v63, %v4088_v5  ;;  %v4165_v47 = vmul.f32 1.442695, %v4143_v34  ;;  %v2188_v42 = vrot.slane %v6970_v25, %v6149_v15  ;;  %v8269_v34 = vld [vmem:[#allocation55_spill] sm:$0xff] }
 0x442   : > { %4208 = vperm.xlu1 %5730, %v7041_v22   ;;  %8248 = vst [vmem:[#allocation22_spill] sm:$0xff] %v7070_v10  ;;  %v7077_v44 = vpop.eup %5821  ;;  %v2216_v5 = vrot.slane %v6970_v25, %v6849_v38 }
 0x443   : > { %8250 = vst [vmem:[#allocation35_spill] sm:$0xff] %v7077_v44  ;;  %v7082_v0 = vpop.eup %5823  ;;  %v2241_v63 = vsub.f32 %v8269_v34, %v2188_v42  ;;  %v3164_v42 = vrot.slane %v6987_v60, %v6841_v6  ;;  %v8275_v34 = vld [vmem:[#allocation57_spill] sm:$0xff] }
 0x444   : > { %3277 = vperm.xlu0 %5731, %v7058_v13   ;;  %8252 = vst [vmem:[#allocation24_spill] sm:$0xff] %v7082_v0 }
 0x446   : > { %2313 = vperm.xlu1 %5730, %v7053_v35  }
 0x448   : > { %2331 = vperm.xlu0 %5731, %v7070_v10   ;;  %v3197_v10 = vsub.f32 %v8255_v31, %v3156_v57  ;;  %v2212_v57 = vrot.slane %v6970_v25, %v6841_v6  ;;  %v4148_v31 = vsub.f32 %v8259_v19, %v4104_v20 }
 0x44a   : > { %3262 = vperm.xlu1 %5730, %v7065_v24   ;;  %v7089_v24 = vpop.eup %5825  ;;  %v3225_v61 = vmul.f32 1.442695, %v3197_v10  ;;  %v3160_v10 = vrot.slane %v6987_v60, %v6833_v51  ;;  %v4175_v20 = vmul.f32 1.442695, %v4148_v31 }
 0x44b   : > { %8254 = vst [vmem:[#allocation37_spill] sm:$0xff] %v7089_v24  ;;  %v7094_v14 = vpop.eup %5827 }
 0x44c   : > { %3280 = vperm.xlu0 %5731, %v7082_v0   ;;  %8256 = vst [vmem:[#allocation26_spill] sm:$0xff] %v7094_v14  ;;  %v7101_v55 = vpop.eup %5829  ;;  %5847 = vpow2.f32 %v3225_v61  ;;  %v4108_v61 = vrot.slane %v7014_v12, %v6822_v41 }
 0x44d   : > { %8258 = vst [vmem:[#allocation39_spill] sm:$0xff] %v7101_v55  ;;  %5849 = vpow2.f32 %v3215_v37  ;;  %v4167_v37 = vmul.f32 1.442695, %v4144_v48  ;;  %v8273_v48 = vld [vmem:[#allocation46_spill] sm:$0xff] }
 0x44e   : > { %4211 = vperm.xlu1 %5730, %v7077_v44   ;;  %v7106_v44 = vpop.eup %5831  ;;  %5851 = vpow2.f32 %v4175_v20  ;;  %v2248_v25 = vsub.f32 %v8273_v48, %v2216_v5  ;;  %v8277_v5 = vld [vmem:[#allocation48_spill] sm:$0xff] }
 0x44f   : > { %8260 = vst [vmem:[#allocation28_spill] sm:$0xff] %v7106_v44  ;;  %5853 = vpow2.f32 %v4165_v47  ;;  %v2265_v47 = vmul.f32 1.442695, %v2241_v63  ;;  %v3199_v63 = vsub.f32 %v8277_v5, %v3164_v42  ;;  %v3168_v42 = vrot.slane %v6987_v60, %v6849_v38 }
 0x450   : > { %4229 = vperm.xlu0 %5731, %v7094_v14   ;;  %v8263_v14 = vld [vmem:[#allocation40_spill] sm:$0xff] }
 0x451   : > { %v2247_v3 = vsub.f32 %v8263_v14, %v2212_v57  ;;  %v8267_v57 = vld [vmem:[#allocation42_spill] sm:$0xff] }
 0x452   : > { %2316 = vperm.xlu1 %5730, %v7089_v24   ;;  %v7113_v24 = vpop.eup %5833 }
 0x453   : > { %8262 = vst [vmem:[#allocation41_spill] sm:$0xff] %v7113_v24  ;;  %v7118_v19 = vpop.eup %5835  ;;  %v2277_v14 = vmul.f32 1.442695, %v2247_v3 }
 0x454   : > { %2334 = vperm.xlu0 %5731, %v7106_v44   ;;  %8264 = vst [vmem:[#allocation30_spill] sm:$0xff] %v7118_v19  ;;  %v7125_v18 = vpop.eup %5837 }
 0x455   : > { %8266 = vst [vmem:[#allocation43_spill] sm:$0xff] %v7125_v18  ;;  %v7130_v31 = vpop.eup %5839  ;;  %5855 = vpow2.f32 %v2277_v14 }
 0x456   : > { %3265 = vperm.xlu1 %5730, %v7101_v55   ;;  %v3198_v55 = vsub.f32 %v8267_v57, %v3160_v10  ;;  %8268 = vst [vmem:[#allocation32_spill] sm:$0xff] %v7130_v31  ;;  %v7137_v3 = vpop.eup %5841  ;;  %v3140_v10 = vrot.slane %v6987_v60, %v6149_v15  ;;  %v8271_v57 = vld [vmem:[#allocation44_spill] sm:$0xff]  ;;  %5857 = vpow2.f32 %v4167_v37  ;;  %v2279_v37 = vmul.f32 1.442695, %v2248_v25 }
 0x457   : > { %8270 = vst [vmem:[#allocation45_spill] sm:$0xff] %v7137_v3  ;;  %v4116_v60 = vrot.slane %v7014_v12, %v6841_v6 }
 0x458   : > { %3283 = vperm.xlu0 %5731, %v7118_v19   ;;  %v3227_v20 = vmul.f32 1.442695, %v3198_v55  ;;  %v7142_v19 = vpop.eup %5843  ;;  %v4092_v55 = vrot.slane %v7014_v12, %v6149_v15 }
 0x459   : > { %8272 = vst [vmem:[#allocation34_spill] sm:$0xff] %v7142_v19  ;;  %v7149_v14 = vpop.eup %5845 }
 0x45a   : > { %4214 = vperm.xlu1 %5730, %v7113_v24   ;;  %v4149_v24 = vsub.f32 %v8271_v57, %v4108_v61  ;;  %8274 = vst [vmem:[#allocation47_spill] sm:$0xff] %v7149_v14  ;;  %5859 = vpow2.f32 %v3227_v20  ;;  %v7154_v57 = vpop.eup %5847  ;;  %v4112_v20 = vrot.slane %v7014_v12, %v6833_v51 }
 0x45b   : > { %8276 = vst [vmem:[#allocation36_spill] sm:$0xff] %v7154_v57  ;;  %5861 = vpow2.f32 %v2265_v47  ;;  %v7161_v48 = vpop.eup %5849  ;;  %v3229_v47 = vmul.f32 1.442695, %v3199_v63 }
 0x45c   : > { %4232 = vperm.xlu0 %5731, %v7130_v31   ;;  %v4177_v61 = vmul.f32 1.442695, %v4149_v24  ;;  %8278 = vst [vmem:[#allocation49_spill] sm:$0xff] %v7161_v48 }
 0x45e   : > { %2319 = vperm.xlu1 %5730, %v7125_v18   ;;  %v3193_v18 = vsub.f32 %v8275_v34, %v3140_v10  ;;  %v8279_v34 = vld [vmem:[#allocation58_spill] sm:$0xff]  ;;  %5863 = vpow2.f32 %v4177_v61 }
 0x45f   : > { %v4145_v24 = vsub.f32 %v8279_v34, %v4092_v55  ;;  %5865 = vpow2.f32 %v2279_v37  ;;  %v8285_v37 = vld [vmem:[#allocation52_spill] sm:$0xff] }
 0x460   : > { %2337 = vperm.xlu0 %5731, %v7142_v19   ;;  %v7156_v19 = vpop.permute.xlu1 %1334  ;;  %v3217_v10 = vmul.f32 1.442695, %v3193_v18  ;;  %v8282_v18 = vld [vmem:[#allocation50_spill] sm:$0xff]  ;;  %v3200_v63 = vsub.f32 %v8285_v37, %v3168_v42 }
 0x461   : > { %v4150_v5 = vsub.f32 %v8282_v18, %v4112_v20 }
 0x462   : > { %3268 = vperm.xlu1 %5730, %v7137_v3   ;;  %v7166_v3 = vpop.eup %5851  ;;  %5867 = vpow2.f32 %v3217_v10  ;;  %v3231_v18 = vmul.f32 1.442695, %v3200_v63 }
 0x463   : > { %8280 = vst [vmem:[#allocation38_spill] sm:$0xff] %v7166_v3  ;;  %v7170_v25 = vpop.eup %5853  ;;  %5869 = vpow2.f32 %v3229_v47  ;;  %v4179_v10 = vmul.f32 1.442695, %v4150_v5  ;;  %v4120_v47 = vrot.slane %v7014_v12, %v6849_v38  ;;  %v8291_v5 = vld [vmem:[#allocation56_spill] sm:$0xff] }
 0x464   : > { %3286 = vperm.xlu0 %5731, %v7154_v57   ;;  %8281 = vst [vmem:[#allocation51_spill] sm:$0xff] %v7170_v25  ;;  %v4169_v57 = vmul.f32 1.442695, %v4145_v24  ;;  %v7177_v55 = vpop.eup %5855 }
 0x465   : > { %8283 = vst [vmem:[#allocation40_spill] sm:$0xff] %v7177_v55  ;;  %v7181_v61 = vpop.eup %5857 }
 0x466   : > { %4217 = vperm.xlu1 %5730, %v7149_v14   ;;  %v7175_v14 = vpop.permute.xlu1 %1337  ;;  %8284 = vst [vmem:[#allocation53_spill] sm:$0xff] %v7181_v61  ;;  %5871 = vpow2.f32 %v4169_v57 }
 0x467   : > { %v7186_v20 = vpop.eup %5859  ;;  %5873 = vpow2.f32 %v4179_v10 }
 0x468   : > { %4235 = vperm.xlu0 %5731, %v7166_v3   ;;  %8286 = vst [vmem:[#allocation42_spill] sm:$0xff] %v7186_v20  ;;  %v7190_v24 = vpop.eup %5861  ;;  %5875 = vpow2.f32 %v3231_v18 }
 0x469   : > { %8287 = vst [vmem:[#allocation55_spill] sm:$0xff] %v7190_v24 }
 0x46a   : > { %3271 = vperm.xlu1 %5730, %v7161_v48   ;;  %v1341_v34 = vpop.permute.xlu1 %1340  ;;  %v1389_v48 = vrot.slane %v7175_v14, %v6613_v30 }
 0x46b   : > { %v7195_v37 = vpop.eup %5863 }
 0x46c   : > { %2340 = vperm.xlu0 %5731, %v7177_v55   ;;  %v8288_v55 = vld [vmem:[#allocation54_spill] sm:$0xff]  ;;  %8289 = vst [vmem:[#allocation44_spill] sm:$0xff] %v7195_v37  ;;  %v7199_v57 = vpop.eup %5865 }
 0x46d   : > { %v4151_v42 = vsub.f32 %v8288_v55, %v4116_v60  ;;  %8290 = vst [vmem:[#allocation46_spill] sm:$0xff] %v7199_v57 }
 0x46e   : > { %4220 = vperm.xlu1 %5730, %v7170_v25   ;;  %v1332_v25 = vpop.permute.xlu0 %1331 }
 0x46f   : > { %v4181_v3 = vmul.f32 1.442695, %v4151_v42  ;;  %v7202_v63 = vpop.eup %5867 }
 0x470   : > { %3289 = vperm.xlu0 %5731, %v7186_v20   ;;  %v4152_v20 = vsub.f32 %v8291_v5, %v4120_v47  ;;  %8292 = vst [vmem:[#allocation57_spill] sm:$0xff] %v7202_v63  ;;  %v7206_v12 = vpop.eup %5869 }
 0x471   : > { %8293 = vst [vmem:[#allocation48_spill] sm:$0xff] %v7206_v12  ;;  %5877 = vpow2.f32 %v4181_v3 }
 0x472   : > { %4223 = vperm.xlu1 %5730, %v7181_v61   ;;  %v1344_v61 = vpop.permute.xlu1 %1343  ;;  %v4183_v55 = vmul.f32 1.442695, %v4152_v20  ;;  %v1359_v18 = vpop.permute.xlu0 %1358 }
 0x473   : > { %v7208_v60 = vpop.eup %5871  ;;  %v1397_v31 = vrot.slane %v1344_v61, %v6613_v30 }
 0x474   : > { %4238 = vperm.xlu0 %5731, %v7195_v37   ;;  %8294 = vst [vmem:[#allocation58_spill] sm:$0xff] %v7208_v60  ;;  %5879 = vpow2.f32 %v4183_v55  ;;  %v7212_v47 = vpop.eup %5873 }
 0x475   : > { %8295 = vst [vmem:[#allocation50_spill] sm:$0xff] %v7212_v47  ;;  %v7215_v5 = vpop.eup %5875 }
 0x476   : > { %2322 = vperm.xlu1 %5730, %v7190_v24   ;;  %v1347_v10 = vpop.permute.xlu1 %1346  ;;  %8296 = vst [vmem:[#allocation52_spill] sm:$0xff] %v7215_v5  ;;  %v1362_v37 = vpop.permute.xlu0 %1361  ;;  %v1385_v24 = vrot.slane %v7156_v19, %v6613_v30 }
 0x478   : > { %2343 = vperm.xlu0 %5731, %v7199_v57   ;;  %v1381_v57 = vrot.slane %v1332_v25, %v6613_v30  ;;  %v1401_v25 = vrot.slane %v1347_v10, %v6613_v30 }
 0x47a   : > { %3274 = vperm.xlu1 %5730, %v7202_v63   ;;  %v1350_v42 = vpop.permute.xlu1 %1349  ;;  %v1442_v44 = vsel %vm1154_vm3, %v1385_v24, %v1381_v57 }
 0x47b   : > { %v1443_v19 = vsel %vm1156_vm4, %v1389_v48, %v1442_v44 }
 0x47c   : > { %3292 = vperm.xlu0 %5731, %v7206_v12   ;;  %v1365_v12 = vpop.permute.xlu0 %1364 }
 0x47d   : > { %v1425_v61 = vrot.slane %v1365_v12, %v6613_v30 }
 0x47e   : > { %4226 = vperm.xlu1 %5730, %v7208_v60   ;;  %v7218_v3 = vpop.eup %5877  ;;  %v1353_v20 = vpop.permute.xlu1 %1352 }
 0x47f   : > { %8297 = vst [vmem:[#allocation54_spill] sm:$0xff] %v7218_v3  ;;  %v1409_v14 = vrot.slane %v1353_v20, %v6613_v30 }
 0x480   : > { %4241 = vperm.xlu0 %5731, %v7212_v47   ;;  %v1368_v60 = vpop.permute.xlu0 %1367 }
 0x481   : > { %v7221_v63 = vpop.eup %5879  ;;  %v1429_v44 = vrot.slane %v1368_v60, %v6613_v30 }
 0x482   : > { %8298 = vst [vmem:[#allocation56_spill] sm:$0xff] %v7221_v63  ;;  %v1356_v55 = vpop.permute.xlu1 %1355 }
 0x483   : > { %v1413_v47 = vrot.slane %v1356_v55, %v6613_v30  ;;  %v1421_v55 = vrot.slane %v1362_v37, %v6613_v30 }
 0x484   : > { %3295 = vperm.xlu0 %5731, %v7215_v5   ;;  %v1417_v5 = vrot.slane %v1359_v18, %v6613_v30  ;;  %v1371_v0 = vpop.permute.xlu0 %1370  ;;  %v1405_v18 = vrot.slane %v1350_v42, %v6613_v30 }
 0x488   : > { %4244 = vperm.xlu0 %5731, %v7218_v3   ;;  %v1393_v3 = vrot.slane %v1341_v34, %v6613_v30  ;;  %v1374_v48 = vpop.permute.xlu0 %1373 }
 0x48a   : > { %v1444_v35 = vsel %vm1158_vm5, %v1393_v3, %v1443_v19 }
 0x48c   : > { %4247 = vperm.xlu0 %5731, %v7221_v63   ;;  %v1449_v63 = vsel %vm1154_vm3, %v1417_v5, %v1413_v47  ;;  %v1445_v47 = vsel %vm1160_vm6, %v1397_v31, %v1444_v35  ;;  %v1437_v31 = vrot.slane %v1374_v48, %v6613_v30  ;;  %v1377_v20 = vpop.permute.xlu0 %1376 }
 0x48d   : > { %v1450_v34 = vsel %vm1156_vm4, %v1421_v55, %v1449_v63  ;;  %v1446_v37 = vsel %vm1162_vm7, %v1401_v25, %v1445_v47  ;;  %v1433_v63 = vrot.slane %v1371_v0, %v6613_v30  ;;  %v1441_v60 = vrot.slane %v1377_v20, %v6613_v30 }
 0x48e   : > { %v1451_v57 = vsel %vm1158_vm5, %v1425_v61, %v1450_v34  ;;  %v1447_v10 = vsel %vm1164_vm8, %v1405_v18, %v1446_v37 }
 0x48f   : > { %v1448_v42 = vsel %vm1166_vm9, %v1409_v14, %v1447_v10  ;;  %v1452_v5 = vsel %vm1160_vm6, %v1429_v44, %v1451_v57 }
 0x490   : > { %v1458_v12 = vsel %vm1177_vm10, %v1448_v42, 0.0  ;;  %v1453_v35 = vsel %vm1162_vm7, %v1433_v63, %v1452_v5 }
 0x491   : > { %v1454_v25 = vsel %vm1164_vm8, %v1437_v31, %v1453_v35 }
 0x492   : > { %v1455_v18 = vsel %vm1166_vm9, %v1441_v60, %v1454_v25 }
 0x493   : > { %v1461_v14 = vsel %vm1177_vm10, %v1455_v18, 0.0 }
 0x499   : > { %v2299_v24 = vpop.permute.xlu1 %2298 }
 0x49a   : > { %v2302_v0 = vpop.permute.xlu0 %2301  ;;  %v2348_v22 = vrot.slane %v2299_v24, %v6613_v30 }
 0x49b   : > { %v2352_v13 = vrot.slane %v2302_v0, %v6613_v30 }
 0x49d   : > { %v2305_v3 = vpop.permute.xlu1 %2304  ;;  %v2409_v1 = vsel %vm1154_vm3, %v2352_v13, %v2348_v22 }
 0x49e   : > { %v2356_v26 = vrot.slane %v2305_v3, %v6613_v30 }
 0x4a0   : > { %v2410_v16 = vsel %vm1156_vm4, %v2356_v26, %v2409_v1 }
 0x4a2   : > { %1459 = vadd.xlane.f32.xlu1 %v1458_v12 }
 0x4a5   : > { %v3251_v55 = vpop.permute.xlu1 %3250 }
 0x4a6   : > { %v3254_v61 = vpop.permute.xlu0 %3253 }
 0x4a9   : > { %v2308_v19 = vpop.permute.xlu1 %2307 }
 0x4aa   : > { %v2360_v62 = vrot.slane %v2308_v19, %v6613_v30 }
 0x4ab   : > { %1462 = vadd.xlane.f32.xlu0 %v1461_v14 }
 0x4ac   : > { %v2411_v0 = vsel %vm1158_vm5, %v2360_v62, %v2410_v16  ;;  %v3304_v16 = vrot.slane %v3254_v61, %v6613_v30  ;;  %v3300_v62 = vrot.slane %v3251_v55, %v6613_v30 }
 0x4ad   : > { %v3257_v34 = vpop.permute.xlu1 %3256  ;;  %v7260_v37 = vpop.permute.xlu0 %4205 }
 0x4b1   : > { %v7258_v47 = vpop.permute.xlu1 %4202 }
 0x4b5   : > { %v2311_v57 = vpop.permute.xlu1 %2310 }
 0x4b6   : > { %v2364_v9 = vrot.slane %v2311_v57, %v6613_v30 }
 0x4b7   : > { %v7262_v10 = vpop.permute.xlu0 %2325 }
 0x4b8   : > { %v2412_v24 = vsel %vm1160_vm6, %v2364_v9, %v2411_v0  ;;  %v3308_v9 = vrot.slane %v3257_v34, %v6613_v30 }
 0x4b9   : > { %v3260_v44 = vpop.permute.xlu1 %3259 }
 0x4bb   : > { %v7264_v48 = vpop.permute.xlu0 %2328 }
 0x4bd   : > { %v7266_v42 = vpop.permute.xlu1 %4208 }
 0x4bf   : > { %v7268_v5 = vpop.permute.xlu0 %3277 }
 0x4c1   : > { %v2314_v63 = vpop.permute.xlu1 %2313 }
 0x4c2   : > { %v2368_v33 = vrot.slane %v2314_v63, %v6613_v30 }
 0x4c3   : > { %v7270_v12 = vpop.permute.xlu0 %2331 }
 0x4c4   : > { %v2413_v57 = vsel %vm1162_vm7, %v2368_v33, %v2412_v24  ;;  %v3312_v33 = vrot.slane %v3260_v44, %v6613_v30 }
 0x4c5   : > { %v3263_v35 = vpop.permute.xlu1 %3262 }
 0x4c6   : > { %v3316_v63 = vrot.slane %v3263_v35, %v6613_v30  ;;  %v4252_v35 = vrot.slane %v7258_v47, %v6613_v30 }
 0x4c7   : > { %v7272_v31 = vpop.permute.xlu0 %3280 }
 0x4c9   : > { %v4212_v20 = vpop.permute.xlu1 %4211 }
 0x4cb   : > { %v7274_v25 = vpop.permute.xlu0 %4229 }
 0x4cd   : > { %v2317_v60 = vpop.permute.xlu1 %2316 }
 0x4ce   : > { %v2372_v11 = vrot.slane %v2317_v60, %v6613_v30 }
 0x4cf   : > { %v7276_v18 = vpop.permute.xlu0 %2334 }
 0x4d0   : > { %v2414_v59 = vsel %vm1164_vm8, %v2372_v11, %v2413_v57 }
 0x4d1   : > { %v3266_v14 = vpop.permute.xlu1 %3265 }
 0x4d3   : > { %v7283_v21 = vpop.permute.xlu0 %3283 }
 0x4d5   : > { %v4215_v8 = vpop.permute.xlu1 %4214 }
 0x4d7   : > { %v7291_v3 = vpop.permute.xlu0 %4232 }
 0x4d9   : > { %v2320_v19 = vpop.permute.xlu1 %2319 }
 0x4da   : > { %v2376_v27 = vrot.slane %v2320_v19, %v6613_v30 }
 0x4db   : > { %v7297_v13 = vpop.permute.xlu0 %2337 }
 0x4dc   : > { %v2415_v22 = vsel %vm1166_vm9, %v2376_v27, %v2414_v59  ;;  %v3361_v59 = vsel %vm1154_vm3, %v3304_v16, %v3300_v62  ;;  %v3320_v27 = vrot.slane %v3266_v14, %v6613_v30  ;;  %v4260_v14 = vrot.slane %v7266_v42, %v6613_v30 }
 0x4dd   : > { %v3269_v1 = vpop.permute.xlu1 %3268  ;;  %v2425_v26 = vsel %vm1177_vm10, %v2415_v22, 0.0  ;;  %v3362_v0 = vsel %vm1156_vm4, %v3308_v9, %v3361_v59  ;;  %v4268_v62 = vrot.slane %v4215_v8, %v6613_v30 }
 0x4de   : > { %2426 = vadd.xlane.f32.xlu0 %v2425_v26  ;;  %v3324_v61 = vrot.slane %v3269_v1, %v6613_v30  ;;  %v3363_v55 = vsel %vm1158_vm5, %v3312_v33, %v3362_v0  ;;  %v4256_v1 = vrot.slane %v7260_v37, %v6613_v30  ;;  %v4264_v26 = vrot.slane %v4212_v20, %v6613_v30 }
 0x4df   : > { %v7305_v60 = vpop.permute.xlu0 %3286  ;;  %v3364_v24 = vsel %vm1160_vm6, %v3316_v63, %v3363_v55 }
 0x4e0   : > { %v3365_v19 = vsel %vm1162_vm7, %v3320_v27, %v3364_v24  ;;  %v4313_v63 = vsel %vm1154_vm3, %v4256_v1, %v4252_v35  ;;  %v2392_v1 = vrot.slane %v7270_v12, %v6613_v30  ;;  %v3340_v12 = vrot.slane %v7272_v31, %v6613_v30 }
 0x4e1   : > { %v4218_v11 = vpop.permute.xlu1 %4217  ;;  %v3366_v22 = vsel %vm1164_vm8, %v3324_v61, %v3365_v19  ;;  %v4314_v42 = vsel %vm1156_vm4, %v4260_v14, %v4313_v63  ;;  %v2400_v63 = vrot.slane %v7297_v13, %v6613_v30 }
 0x4e2   : > { %v4272_v59 = vrot.slane %v4218_v11, %v6613_v30  ;;  %v4315_v37 = vsel %vm1158_vm5, %v4264_v26, %v4314_v42 }
 0x4e3   : > { %v7313_v34 = vpop.permute.xlu0 %4235  ;;  %v4316_v20 = vsel %vm1160_vm6, %v4268_v62, %v4315_v37 }
 0x4e4   : > { %v4317_v8 = vsel %vm1162_vm7, %v4272_v59, %v4316_v20 }
 0x4e5   : > { %v3272_v44 = vpop.permute.xlu1 %3271 }
 0x4e6   : > { %v3328_v57 = vrot.slane %v3272_v44, %v6613_v30 }
 0x4e7   : > { %v2341_v9 = vpop.permute.xlu0 %2340 }
 0x4e8   : > { %v3367_v16 = vsel %vm1166_vm9, %v3328_v57, %v3366_v22  ;;  %v2384_v57 = vrot.slane %v7262_v10, %v6613_v30  ;;  %v2388_v22 = vrot.slane %v7264_v48, %v6613_v30  ;;  %v3336_v10 = vrot.slane %v7268_v5, %v6613_v30 }
 0x4e9   : > { %v4221_v47 = vpop.permute.xlu1 %4220  ;;  %v3377_v33 = vsel %vm1177_vm10, %v3367_v16, 0.0  ;;  %v2396_v16 = vrot.slane %v7276_v18, %v6613_v30  ;;  %v2404_v42 = vrot.slane %v2341_v9, %v6613_v30 }
 0x4ea   : > { %3378 = vadd.xlane.f32.xlu0 %v3377_v33  ;;  %v4276_v27 = vrot.slane %v4221_v47, %v6613_v30 }
 0x4eb   : > { %v3290_v0 = vpop.permute.xlu0 %3289 }
 0x4ec   : > { %v4318_v24 = vsel %vm1164_vm8, %v4276_v27, %v4317_v8  ;;  %v3344_v27 = vrot.slane %v7283_v21, %v6613_v30  ;;  %v3348_v21 = vrot.slane %v7305_v60, %v6613_v30 }
 0x4ed   : > { %v4224_v61 = vpop.permute.xlu1 %4223 }
 0x4ee   : > { %v4280_v55 = vrot.slane %v4224_v61, %v6613_v30 }
 0x4ef   : > { %v4239_v11 = vpop.permute.xlu0 %4238 }
 0x4f0   : > { %v4319_v44 = vsel %vm1166_vm9, %v4280_v55, %v4318_v24 }
 0x4f1   : > { %v2323_v35 = vpop.permute.xlu1 %2322  ;;  %v4329_v19 = vsel %vm1177_vm10, %v4319_v44, 0.0 }
 0x4f2   : > { %v2380_v14 = vrot.slane %v2323_v35, %v6613_v30  ;;  %4330 = vadd.xlane.f32.xlu0 %v4329_v19  ;;  %v4288_v35 = vrot.slane %v7274_v25, %v6613_v30  ;;  %v4296_v25 = vrot.slane %v7313_v34, %v6613_v30 }
 0x4f3   : > { %v2344_v47 = vpop.permute.xlu0 %2343 }
 0x4f4   : > { %v2416_v26 = vsel %vm1154_vm3, %v2384_v57, %v2380_v14  ;;  %v2408_v37 = vrot.slane %v2344_v47, %v6613_v30  ;;  %v3352_v14 = vrot.slane %v3290_v0, %v6613_v30 }
 0x4f5   : > { %v2417_v62 = vsel %vm1156_vm4, %v2388_v22, %v2416_v26  ;;  %v3275_v33 = vpop.permute.xlu1 %3274 }
 0x4f6   : > { %v2418_v48 = vsel %vm1158_vm5, %v2392_v1, %v2417_v62  ;;  %v3332_v59 = vrot.slane %v3275_v33, %v6613_v30  ;;  %v4292_v1 = vrot.slane %v7291_v3, %v6613_v30  ;;  %v4300_v3 = vrot.slane %v4239_v11, %v6613_v30 }
 0x4f7   : > { %v2419_v18 = vsel %vm1160_vm6, %v2396_v16, %v2418_v48  ;;  %v3293_v61 = vpop.permute.xlu0 %3292 }
 0x4f8   : > { %v3368_v5 = vsel %vm1154_vm3, %v3336_v10, %v3332_v59  ;;  %v2420_v13 = vsel %vm1162_vm7, %v2400_v63, %v2419_v18  ;;  %v3356_v60 = vrot.slane %v3293_v61, %v6613_v30 }
 0x4f9   : > { %v3369_v20 = vsel %vm1156_vm4, %v3340_v12, %v3368_v5  ;;  %v4227_v8 = vpop.permute.xlu1 %4226  ;;  %v2421_v55 = vsel %vm1164_vm8, %v2404_v42, %v2420_v13 }
 0x4fa   : > { %v3370_v31 = vsel %vm1158_vm5, %v3344_v27, %v3369_v20  ;;  %v4284_v9 = vrot.slane %v4227_v8, %v6613_v30  ;;  %v2422_v24 = vsel %vm1166_vm9, %v2408_v37, %v2421_v55 }
 0x4fb   : > { %v2428_v44 = vsel %vm1177_vm10, %v2422_v24, 0.0  ;;  %v4242_v19 = vpop.permute.xlu0 %4241  ;;  %v3371_v57 = vsel %vm1160_vm6, %v3348_v21, %v3370_v31 }
 0x4fc   : > { %2429 = vadd.xlane.f32.xlu1 %v2428_v44  ;;  %v4320_v22 = vsel %vm1154_vm3, %v4288_v35, %v4284_v9  ;;  %v3372_v26 = vsel %vm1162_vm7, %v3352_v14, %v3371_v57  ;;  %v4304_v34 = vrot.slane %v4242_v19, %v6613_v30 }
 0x4fd   : > { %v4321_v16 = vsel %vm1156_vm4, %v4292_v1, %v4320_v22  ;;  %v3373_v33 = vsel %vm1164_vm8, %v3356_v60, %v3372_v26 }
 0x4fe   : > { %v4322_v0 = vsel %vm1158_vm5, %v4296_v25, %v4321_v16 }
 0x4ff   : > { %v3296_v62 = vpop.permute.xlu0 %3295  ;;  %v4323_v59 = vsel %vm1160_vm6, %v4300_v3, %v4322_v0 }
 0x500   : > { %v3360_v47 = vrot.slane %v3296_v62, %v6613_v30  ;;  %v4324_v18 = vsel %vm1162_vm7, %v4304_v34, %v4323_v59  ;;  %v8299_v59 = vld [vmem:[#allocation15_spill] sm:$0xff] }
 0x502   : > { %v3374_v10 = vsel %vm1166_vm9, %v3360_v47, %v3373_v33 }
 0x503   : > { %v4245_v63 = vpop.permute.xlu0 %4244  ;;  %v3380_v48 = vsel %vm1177_vm10, %v3374_v10, 0.0 }
 0x504   : > { %3381 = vadd.xlane.f32.xlu1 %v3380_v48  ;;  %v4308_v12 = vrot.slane %v4245_v63, %v6613_v30 }
 0x506   : > { %v4325_v37 = vsel %vm1164_vm8, %v4308_v12, %v4324_v18  ;;  %v8300_v18 = vld [vmem:[#allocation19_spill] sm:$0xff] }
 0x507   : > { %v4248_v42 = vpop.permute.xlu0 %4247 }
 0x508   : > { %v4312_v27 = vrot.slane %v4248_v42, %v6613_v30 }
 0x50a   : > { %v4326_v5 = vsel %vm1166_vm9, %v4312_v27, %v4325_v37  ;;  %v8301_v27 = vld [vmem:[#allocation17_spill] sm:$0xff] }
 0x50b   : > { %v4332_v11 = vsel %vm1177_vm10, %v4326_v5, 0.0  ;;  %vm4742_vm10 = vcmask 519552  }
 0x50c   : > { %4333 = vadd.xlane.f32.xlu1 %v4332_v11 }
 0x52b   : > { %v1460_v13 = vpop.xlane.xlu1 %1459 }
 0x52c   : > { %5881 = vrcp.f32 %v1460_v13  ;;  %v8302_v13 = vld [vmem:[#allocation13_spill] sm:$0xff] }
 0x534   : > { %v1463_v20 = vpop.xlane.xlu0 %1462 }
 0x535   : > { %5883 = vrcp.f32 %v1463_v20 }
 0x539   : > { %v5882_v61 = vpop.eup %5881 }
 0x53a   : > { %v1475_v8 = vrot.slane %v5882_v61, %v6152_v17  ;;  %v1471_v55 = vrot.slane %v5882_v61, %v6149_v15  ;;  %v1479_v9 = vrot.slane %v5882_v61, %v6813_v40  ;;  %v1483_v21 = vrot.slane %v5882_v61, %v6816_v43 }
 0x53b   : > { %v1487_v19 = vrot.slane %v5882_v61, %v6822_v41  ;;  %v1491_v22 = vrot.slane %v5882_v61, %v6833_v51  ;;  %v1495_v26 = vrot.slane %v5882_v61, %v6841_v6  ;;  %v1499_v16 = vrot.slane %v5882_v61, %v6849_v38 }
 0x53c   : > { %v1549_v31 = vmul.f32 %v6863_v29, %v1475_v8  ;;  %v1548_v30 = vmul.f32 %v6858_v45, %v1471_v55  ;;  %v1550_v24 = vmul.f32 %v6873_v32, %v1479_v9  ;;  %v1551_v35 = vmul.f32 %v6877_v46, %v1483_v21  ;;  %v8304_v9 = vld [vmem:[#allocation23_spill] sm:$0xff] }
 0x53d   : > { %v1552_v14 = vmul.f32 %v6886_v56, %v1487_v19  ;;  %v1553_v46 = vmul.f32 %v6893_v4, %v1491_v22  ;;  %v1554_v56 = vmul.f32 %v6899_v7, %v1495_v26  ;;  %v1555_v4 = vmul.f32 %v6905_v52, %v1499_v16 }
 0x53e   : > { %1571 = vperm.xlu1 %5730, %v1549_v31   ;;  %1566 = vperm.xlu0 %5731, %v1548_v30   ;;  %v8303_v31 = vld [vmem:[#allocation21_spill] sm:$0xff] }
 0x542   : > { %1576 = vperm.xlu1 %5730, %v1550_v24   ;;  %v5884_v44 = vpop.eup %5883 }
 0x543   : > { %v1507_v57 = vrot.slane %v5884_v44, %v6152_v17  ;;  %v1511_v45 = vrot.slane %v5884_v44, %v6813_v40  ;;  %v1515_v1 = vrot.slane %v5884_v44, %v6816_v43  ;;  %v1519_v60 = vrot.slane %v5884_v44, %v6822_v41 }
 0x544   : > { %v1523_v62 = vrot.slane %v5884_v44, %v6833_v51  ;;  %v1503_v25 = vrot.slane %v5884_v44, %v6149_v15  ;;  %v1527_v47 = vrot.slane %v5884_v44, %v6841_v6 }
 0x545   : > { %v1557_v29 = vmul.f32 %v6882_v2, %v1507_v57  ;;  %v1558_v32 = vmul.f32 %v6889_v49, %v1511_v45  ;;  %v1559_v2 = vmul.f32 %v6895_v23, %v1515_v1  ;;  %v1560_v49 = vmul.f32 %v6901_v53, %v1519_v60  ;;  %v8306_v45 = vld [vmem:[#allocation25_spill] sm:$0xff]  ;;  %v8308_v60 = vld [vmem:[#allocation27_spill] sm:$0xff] }
 0x546   : > { %1581 = vperm.xlu1 %5730, %v1551_v35   ;;  %v1561_v23 = vmul.f32 %v6907_v36, %v1523_v62  ;;  %v1556_v7 = vmul.f32 %v6911_v28, %v1503_v25  ;;  %v1562_v33 = vmul.f32 %v6913_v58, %v1527_v47  ;;  %v1531_v53 = vrot.slane %v5884_v44, %v6849_v38  ;;  %v8305_v35 = vld [vmem:[#allocation14_spill] sm:$0xff]  ;;  %v8307_v1 = vld [vmem:[#allocation29_spill] sm:$0xff] }
 0x547   : > { %1611 = vperm.xlu0 %5731, %v1557_v29  }
 0x548   : > { %v1563_v0 = vmul.f32 %v6917_v54, %v1531_v53 }
 0x54a   : > { %1586 = vperm.xlu1 %5730, %v1552_v14  }
 0x54b   : > { %1616 = vperm.xlu0 %5731, %v1558_v32  }
 0x54e   : > { %1591 = vperm.xlu1 %5730, %v1553_v46  }
 0x54f   : > { %1621 = vperm.xlu0 %5731, %v1559_v2  }
 0x552   : > { %1596 = vperm.xlu1 %5730, %v1554_v56  }
 0x553   : > { %1626 = vperm.xlu0 %5731, %v1560_v49   ;;  %v8309_v49 = vld [vmem:[#allocation18_spill] sm:$0xff] }
 0x556   : > { %1601 = vperm.xlu1 %5730, %v1555_v4   ;;  %v8310_v4 = vld [vmem:[#allocation16_spill] sm:$0xff] }
 0x557   : > { %1631 = vperm.xlu0 %5731, %v1561_v23  }
 0x55a   : > { %1606 = vperm.xlu1 %5730, %v1556_v7  }
 0x55b   : > { %1636 = vperm.xlu0 %5731, %v1562_v33   ;;  %v8311_v33 = vld [vmem:[#allocation20_spill] sm:$0xff] }
 0x55f   : > { %1641 = vperm.xlu0 %5731, %v1563_v0   ;;  %v8312_v0 = vld [vmem:[#allocation31_spill] sm:$0xff] }
 0x567   : > { %v2427_v52 = vpop.xlane.xlu0 %2426 }
 0x568   : > { %5885 = vrcp.f32 %v2427_v52 }
 0x573   : > { %v3379_v10 = vpop.xlane.xlu0 %3378 }
 0x574   : > { %5887 = vrcp.f32 %v3379_v10 }
 0x575   : > { %v7431_v3 = vpop.eup %5885 }
 0x576   : > { %v2438_v36 = vrot.slane %v7431_v3, %v6149_v15  ;;  %v2442_v28 = vrot.slane %v7431_v3, %v6152_v17  ;;  %v2446_v54 = vrot.slane %v7431_v3, %v6813_v40  ;;  %v2450_v5 = vrot.slane %v7431_v3, %v6816_v43 }
 0x577   : > { %v2454_v57 = vrot.slane %v7431_v3, %v6822_v41  ;;  %v2458_v23 = vrot.slane %v7431_v3, %v6833_v51 }
 0x578   : > { %v2515_v58 = vmul.f32 %v6945_v39, %v2438_v36  ;;  %v2516_v63 = vmul.f32 %v6949_v50, %v2442_v28  ;;  %v2517_v12 = vmul.f32 %v8299_v59, %v2446_v54  ;;  %v2518_v20 = vmul.f32 %v8302_v13, %v2450_v5  ;;  %v8313_v28 = vld [vmem:[#allocation22_spill] sm:$0xff]  ;;  %v8318_v13 = vld [vmem:[#allocation37_spill] sm:$0xff] }
 0x579   : > { %v2519_v14 = vmul.f32 %v8306_v45, %v2454_v57  ;;  %v2520_v52 = vmul.f32 %v8312_v0, %v2458_v23  ;;  %v8317_v5 = vld [vmem:[#allocation26_spill] sm:$0xff] }
 0x57a   : > { %2533 = vperm.xlu1 %5730, %v2515_v58   ;;  %2538 = vperm.xlu0 %5731, %v2516_v63   ;;  %v8314_v63 = vld [vmem:[#allocation33_spill] sm:$0xff] }
 0x57b   : > { %v4331_v48 = vpop.xlane.xlu0 %4330 }
 0x57c   : > { %5889 = vrcp.f32 %v4331_v48 }
 0x57e   : > { %2543 = vperm.xlu1 %5730, %v2517_v12  }
 0x581   : > { %v7442_v34 = vpop.eup %5887 }
 0x582   : > { %v3390_v42 = vrot.slane %v7442_v34, %v6149_v15  ;;  %v3394_v39 = vrot.slane %v7442_v34, %v6152_v17  ;;  %v3398_v61 = vrot.slane %v7442_v34, %v6813_v40  ;;  %v3402_v32 = vrot.slane %v7442_v34, %v6816_v43 }
 0x583   : > { %v3406_v36 = vrot.slane %v7442_v34, %v6822_v41 }
 0x584   : > { %v3467_v50 = vmul.f32 %v8300_v18, %v3390_v42  ;;  %v3468_v37 = vmul.f32 %v8301_v27, %v3394_v39  ;;  %v3469_v30 = vmul.f32 %v8303_v31, %v3398_v61  ;;  %v3470_v56 = vmul.f32 %v8308_v60, %v3402_v32  ;;  %v8315_v42 = vld [vmem:[#allocation24_spill] sm:$0xff]  ;;  %v8316_v18 = vld [vmem:[#allocation35_spill] sm:$0xff] }
 0x585   : > { %v2430_v11 = vpop.xlane.xlu1 %2429  ;;  %v3471_v54 = vmul.f32 %v8314_v63, %v3406_v36  ;;  %v8319_v31 = vld [vmem:[#allocation28_spill] sm:$0xff]  ;;  %v732_v63 = vpop.f32.mrf.mxu1 }
 0x586   : > { %5891 = vrcp.f32 %v2430_v11  ;;  %3485 = vperm.xlu1 %5730, %v3467_v50   ;;  %3490 = vperm.xlu0 %5731, %v3468_v37   ;;  %v2462_v37 = vrot.slane %v7431_v3, %v6841_v6  ;;  %v8323_v32 = vld [vmem:[#allocation32_spill] sm:$0xff] }
 0x589   : > { %v7455_v8 = vpop.eup %5889 }
 0x58a   : > { %2548 = vperm.xlu1 %5730, %v2518_v20   ;;  %v4346_v55 = vrot.slane %v7455_v8, %v6152_v17  ;;  %v4342_v21 = vrot.slane %v7455_v8, %v6149_v15  ;;  %v4350_v16 = vrot.slane %v7455_v8, %v6813_v40  ;;  %v4354_v59 = vrot.slane %v7455_v8, %v6816_v43 }
 0x58b   : > { %v2521_v20 = vmul.f32 %v8318_v13, %v2462_v37 }
 0x58c   : > { %v4420_v24 = vmul.f32 %v8304_v9, %v4346_v55  ;;  %v4419_v19 = vmul.f32 %v8305_v35, %v4342_v21  ;;  %v4421_v25 = vmul.f32 %v8310_v4, %v4350_v16  ;;  %v4422_v50 = vmul.f32 %v8316_v18, %v4354_v59  ;;  %v8325_v16 = vld [vmem:[#allocation11_spill] sm:$0xff] }
 0x58d   : > { %v3382_v44 = vpop.xlane.xlu1 %3381  ;;  %v3410_v55 = vrot.slane %v7442_v34, %v6833_v51  ;;  %v4358_v21 = vrot.slane %v7455_v8, %v6822_v41  ;;  %v4362_v4 = vrot.slane %v7455_v8, %v6833_v51  ;;  %v8328_v59 = vld [vmem:[#allocation47_spill] sm:$0xff] }
 0x58e   : > { %3495 = vperm.xlu1 %5730, %v3469_v30   ;;  %4442 = vperm.xlu0 %5731, %v4420_v24   ;;  %5893 = vrcp.f32 %v3382_v44  ;;  %v8321_v44 = vld [vmem:[#allocation30_spill] sm:$0xff] }
 0x592   : > { %4437 = vperm.xlu1 %5730, %v4419_v19   ;;  %v8322_v19 = vld [vmem:[#allocation41_spill] sm:$0xff] }
 0x593   : > { %v7466_v29 = vpop.eup %5891  ;;  %v4423_v57 = vmul.f32 %v8322_v19, %v4358_v21  ;;  %v8333_v21 = vld [vmem:[#allocation53_spill] sm:$0xff] }
 0x594   : > { %v2474_v22 = vrot.slane %v7466_v29, %v6152_v17  ;;  %v2478_v26 = vrot.slane %v7466_v29, %v6813_v40  ;;  %v2482_v10 = vrot.slane %v7466_v29, %v6816_v43  ;;  %v2486_v61 = vrot.slane %v7466_v29, %v6822_v41 }
 0x595   : > { %v4334_v2 = vpop.xlane.xlu1 %4333 }
 0x596   : > { %2553 = vperm.xlu1 %5730, %v2519_v14   ;;  %v2524_v46 = vmul.f32 %v8307_v1, %v2474_v22  ;;  %5895 = vrcp.f32 %v4334_v2  ;;  %v2525_v62 = vmul.f32 %v8309_v49, %v2478_v26  ;;  %v2526_v58 = vmul.f32 %v8313_v28, %v2482_v10 }
 0x597   : > { %v2527_v30 = vmul.f32 %v8319_v31, %v2486_v61  ;;  %v2466_v14 = vrot.slane %v7431_v3, %v6849_v38  ;;  %v3414_v22 = vrot.slane %v7442_v34, %v6841_v6  ;;  %v2490_v2 = vrot.slane %v7466_v29, %v6833_v51  ;;  %v8326_v3 = vld [vmem:[#allocation45_spill] sm:$0xff]  ;;  %v8330_v61 = vld [vmem:[#allocation10_spill] sm:$0xff] }
 0x598   : > { %2578 = vperm.xlu0 %5731, %v2524_v46   ;;  %v8324_v46 = vld [vmem:[#allocation43_spill] sm:$0xff]  ;;  %v3418_v28 = vrot.slane %v7442_v34, %v6849_v38  ;;  %v2494_v34 = vrot.slane %v7466_v29, %v6841_v6  ;;  %v2470_v31 = vrot.slane %v7466_v29, %v6149_v15 }
 0x599   : > { %v2522_v26 = vmul.f32 %v8324_v46, %v2466_v14  ;;  %v8335_v14 = vld [vmem:[#allocation40_spill] sm:$0xff] }
 0x59a   : > { %3500 = vperm.xlu1 %5730, %v3470_v56  }
 0x59b   : > { %v7483_v47 = vpop.eup %5893 }
 0x59c   : > { %2583 = vperm.xlu0 %5731, %v2525_v62   ;;  %v3426_v7 = vrot.slane %v7483_v47, %v6152_v17  ;;  %v3430_v48 = vrot.slane %v7483_v47, %v6813_v40  ;;  %v3434_v24 = vrot.slane %v7483_v47, %v6816_v43  ;;  %v3473_v62 = vmul.f32 %v8326_v3, %v3414_v22 }
 0x59d   : > { %v2529_v22 = vmul.f32 %v8335_v14, %v2494_v34  ;;  %v3450_v34 = vrot.slane %v7483_v47, %v6849_v38 }
 0x59e   : > { %4447 = vperm.xlu1 %5730, %v4421_v25   ;;  %v3476_v53 = vmul.f32 %v8311_v33, %v3426_v7  ;;  %v3477_v39 = vmul.f32 %v8315_v42, %v3430_v48  ;;  %v3478_v35 = vmul.f32 %v8321_v44, %v3434_v24  ;;  %v8327_v7 = vld [vmem:[#allocation34_spill] sm:$0xff]  ;;  %v4424_v42 = vmul.f32 %v8328_v59, %v4362_v4 }
 0x59f   : > { %v2528_v33 = vmul.f32 %v8327_v7, %v2490_v2 }
 0x5a0   : > { %3530 = vperm.xlu0 %5731, %v3476_v53   ;;  %v3438_v53 = vrot.slane %v7483_v47, %v6822_v41 }
 0x5a2   : > { %2558 = vperm.xlu1 %5730, %v2520_v52  }
 0x5a3   : > { %v7499_v12 = vpop.eup %5895 }
 0x5a4   : > { %2588 = vperm.xlu0 %5731, %v2526_v58   ;;  %v4378_v27 = vrot.slane %v7499_v12, %v6152_v17  ;;  %v8320_v17 = vld [vmem:[#allocation39_spill] sm:$0xff]  ;;  %v4382_v45 = vrot.slane %v7499_v12, %v6813_v40  ;;  %v4366_v58 = vrot.slane %v7455_v8, %v6841_v6  ;;  %v4386_v37 = vrot.slane %v7499_v12, %v6816_v43 }
 0x5a5   : > { %v3472_v9 = vmul.f32 %v8320_v17, %v3410_v55  ;;  %v7556_v55 = vadd.f32 %v732_v63, %v8330_v61  ;;  %v8331_v17 = vld [vmem:[#allocation49_spill] sm:$0xff]  ;;  %v4374_v61 = vrot.slane %v7499_v12, %v6149_v15  ;;  %v4394_v14 = vrot.slane %v7499_v12, %v6833_v51 }
 0x5a6   : > { %3505 = vperm.xlu1 %5730, %v3471_v54   ;;  %v4428_v11 = vmul.f32 %v8317_v5, %v4378_v27  ;;  %v4429_v1 = vmul.f32 %v8323_v32, %v4382_v45  ;;  %v3474_v43 = vmul.f32 %v8331_v17, %v3418_v28  ;;  %v2498_v32 = vrot.slane %v7466_v29, %v6849_v38 }
 0x5a7   : > { %v3422_v29 = vrot.slane %v7483_v47, %v6149_v15 }
 0x5a8   : > { %3535 = vperm.xlu0 %5731, %v3477_v39   ;;  %v4370_v39 = vrot.slane %v7455_v8, %v6849_v38 }
 0x5aa   : > { %4452 = vperm.xlu1 %5730, %v4422_v50   ;;  %v8329_v50 = vld [vmem:[#allocation36_spill] sm:$0xff]  ;;  %v7566_v44 = vmul.f32 %v8333_v21, %v4370_v39  ;;  %v8338_v39 = vld [vmem:[#allocation42_spill] sm:$0xff] }
 0x5ab   : > { %v3479_v27 = vmul.f32 %v8329_v50, %v3438_v53  ;;  %v8337_v53 = vld [vmem:[#allocation46_spill] sm:$0xff]  ;;  %v8339_v50 = vld [vmem:[#allocation57_spill] sm:$0xff] }
 0x5ac   : > { %4482 = vperm.xlu0 %5731, %v4428_v11  }
 0x5ae   : > { %2563 = vperm.xlu1 %5730, %v2521_v20  }
 0x5b0   : > { %2593 = vperm.xlu0 %5731, %v2527_v30  }
 0x5b2   : > { %3510 = vperm.xlu1 %5730, %v3472_v9   ;;  %v8332_v9 = vld [vmem:[#allocation51_spill] sm:$0xff] }
 0x5b3   : > { %v7563_v24 = vmul.f32 %v8332_v9, %v4366_v58 }
 0x5b4   : > { %3540 = vperm.xlu0 %5731, %v3478_v35  }
 0x5b6   : > { %4457 = vperm.xlu1 %5730, %v4423_v57   ;;  %v8334_v57 = vld [vmem:[#allocation38_spill] sm:$0xff] }
 0x5b7   : > { %v4430_v45 = vmul.f32 %v8334_v57, %v4386_v37  ;;  %v4390_v37 = vrot.slane %v7499_v12, %v6822_v41 }
 0x5b8   : > { %4487 = vperm.xlu0 %5731, %v4429_v1  }
 0x5b9   : > { %v1567_v60 = vpop.permute.xlu0 %1566  ;;  %v1572_v56 = vpop.permute.xlu1 %1571 }
 0x5ba   : > { %v1644_v40 = vmul.f32 %v1567_v60, %v8325_v16  ;;  %v1645_v49 = vmul.f32 %v1572_v56, %v8325_v16  ;;  %2568 = vperm.xlu1 %5730, %v2522_v26  }
 0x5bc   : > { %v1660_v25 = vsel %vm941_vm2, %v1644_v40, 0.0  ;;  %v1667_v23 = vsel %vm941_vm2, %v1645_v49, 0.0  ;;  %2598 = vperm.xlu0 %5731, %v2528_v33   ;;  %v8336_v49 = vld [vmem:[#allocation55_spill] sm:$0xff] }
 0x5bd   : > { %v1661_v0 = vrot.slane %v1660_v25, 4  ;;  %v1668_v52 = vrot.slane %v1667_v23, 4  ;;  %v1577_v10 = vpop.permute.xlu1 %1576  ;;  %v2523_v3 = vmul.f32 %v8336_v49, %v2470_v31  ;;  %v8343_v49 = vld [vmem:[#allocation52_spill] sm:$0xff] }
 0x5be   : > { %v1646_v36 = vmul.f32 %v1577_v10, %v8325_v16  ;;  %3515 = vperm.xlu1 %5730, %v3473_v62  }
 0x5bf   : > { %v1662_v54 = vadd.f32 %v1661_v0, %v1660_v25  ;;  %v1669_v48 = vadd.f32 %v1668_v52, %v1667_v23  ;;  %v3442_v25 = vrot.slane %v7483_v47, %v6833_v51  ;;  %v7583_v0 = vmul.f32 %v8337_v53, %v2498_v32 }
 0x5c0   : > { %v1674_v18 = vsel %vm941_vm2, %v1646_v36, 0.0  ;;  %3545 = vperm.xlu0 %5731, %v3479_v27   ;;  %v3446_v52 = vrot.slane %v7483_v47, %v6841_v6  ;;  %v3475_v27 = vmul.f32 %v8339_v50, %v3422_v29  ;;  %v4398_v53 = vrot.slane %v7499_v12, %v6841_v6 }
 0x5c1   : > { %v1663_v5 = vrot.slane %v1662_v54, 2  ;;  %v1670_v11 = vrot.slane %v1669_v48, 2  ;;  %v1675_v13 = vrot.slane %v1674_v18, 4  ;;  %v1582_v20 = vpop.permute.xlu1 %1581 }
 0x5c2   : > { %v1647_v8 = vmul.f32 %v1582_v20, %v8325_v16  ;;  %4462 = vperm.xlu1 %5730, %v4424_v42   ;;  %v1612_v19 = vpop.permute.xlu0 %1611 }
 0x5c3   : > { %v1676_v30 = vadd.f32 %v1675_v13, %v1674_v18  ;;  %v1664_v1 = vadd.f32 %v1663_v5, %v1662_v54  ;;  %v1671_v46 = vadd.f32 %v1670_v11, %v1669_v48  ;;  %v1653_v56 = vmul.f32 %v1612_v19, %v7556_v55 }
 0x5c4   : > { %v1681_v35 = vsel %vm941_vm2, %v1647_v8, 0.0  ;;  %4492 = vperm.xlu0 %5731, %v4430_v45   ;;  %v3480_v18 = vmul.f32 %v8338_v39, %v3442_v25  ;;  %v8341_v45 = vld [vmem:[#allocation44_spill] sm:$0xff] }
 0x5c5   : > { %v1677_v26 = vrot.slane %v1676_v30, 2  ;;  %v1682_v2 = vrot.slane %v1681_v35, 4  ;;  %v1587_v60 = vpop.permute.xlu1 %1586  ;;  %v1723_v23 = vsel %vm941_vm2, %v1653_v56, 0.0  ;;  %v1665_v10 = vrot.slane %v1664_v1, 1 }
 0x5c6   : > { %v1648_v40 = vmul.f32 %v1587_v60, %v8325_v16  ;;  %3520 = vperm.xlu1 %5730, %v3474_v43   ;;  %v1617_v33 = vpop.permute.xlu0 %1616  ;;  %v1672_v36 = vrot.slane %v1671_v46, 1  ;;  %v1724_v54 = vrot.slane %v1723_v23, 4  ;;  %v8340_v43 = vld [vmem:[#allocation48_spill] sm:$0xff]  ;;  %v4431_v15 = vmul.f32 %v8341_v45, %v4390_v37 }
 0x5c7   : > { %v1678_v62 = vadd.f32 %v1677_v26, %v1676_v30  ;;  %v1683_v4 = vadd.f32 %v1682_v2, %v1681_v35  ;;  %v1654_v59 = vmul.f32 %v1617_v33, %v7556_v55  ;;  %v1666_v8 = vadd.f32 %v1665_v10, %v1664_v1  ;;  %v8342_v26 = vld [vmem:[#allocation58_spill] sm:$0xff] }
 0x5c8   : > { %v1688_v7 = vsel %vm941_vm2, %v1648_v40, 0.0  ;;  %2603 = vperm.xlu0 %5731, %v2529_v22   ;;  %v1673_v31 = vadd.f32 %v1672_v36, %v1671_v46  ;;  %v7599_v9 = vmul.f32 %v8340_v43, %v3446_v52  ;;  %v1725_v21 = vadd.f32 %v1724_v54, %v1723_v23 }
 0x5c9   : > { %v1679_v28 = vrot.slane %v1678_v62, 1  ;;  %v1684_v58 = vrot.slane %v1683_v4, 2  ;;  %v1592_v63 = vpop.permute.xlu1 %1591  ;;  %v1689_v48 = vrot.slane %v1688_v7, 4  ;;  %v1730_v41 = vsel %vm941_vm2, %v1654_v59, 0.0 }
 0x5ca   : > { %v1649_v42 = vmul.f32 %v1592_v63, %v8325_v16  ;;  %2573 = vperm.xlu1 %5730, %v2523_v3   ;;  %v1622_v20 = vpop.permute.xlu0 %1621  ;;  %v4427_v2 = vmul.f32 %v8342_v26, %v4374_v61  ;;  %v5540_v60 = vpack.c.bf16 %v1666_v8, %v1666_v8  ;;  %v5541_v56 = vpack.c.bf16 %v1673_v31, %v1673_v31  ;;  %v8346_v61 = vld [vmem:[#allocation56_spill] sm:$0xff] }
 0x5cb   : > { %v1685_v5 = vadd.f32 %v1684_v58, %v1683_v4  ;;  %v1690_v11 = vadd.f32 %v1689_v48, %v1688_v7  ;;  %v1680_v30 = vadd.f32 %v1679_v28, %v1678_v62  ;;  %v1655_v47 = vmul.f32 %v1622_v20, %v7556_v55  ;;  %v8344_v28 = vld [vmem:[#allocation50_spill] sm:$0xff] }
 0x5cc   : > { %v1695_v13 = vsel %vm941_vm2, %v1649_v42, 0.0  ;;  %3550 = vperm.xlu0 %5731, %v3480_v18   ;;  %v1731_v40 = vrot.slane %v1730_v41, 4  ;;  %v7610_v3 = vmul.f32 %v8343_v49, %v3450_v34  ;;  %v1726_v4 = vrot.slane %v1725_v21, 2 }
 0x5cd   : > { %v1597_v17 = vpop.permute.xlu1 %1596  ;;  %v1696_v35 = vrot.slane %v1695_v13, 4  ;;  %v1691_v19 = vrot.slane %v1690_v11, 2  ;;  %v1686_v22 = vrot.slane %v1685_v5, 1  ;;  %v1737_v1 = vsel %vm941_vm2, %v1655_v47, 0.0 }
 0x5ce   : > { %3525 = vperm.xlu1 %5730, %v3475_v27   ;;  %v1650_v57 = vmul.f32 %v1597_v17, %v8325_v16  ;;  %v1627_v46 = vpop.permute.xlu0 %1626  ;;  %v5542_v62 = vpack.c.bf16 %v1680_v30, %v1680_v30  ;;  %v1738_v23 = vrot.slane %v1737_v1, 4  ;;  %v4432_v58 = vmul.f32 %v8344_v28, %v4394_v14 }
 0x5cf   : > { %v1697_v32 = vadd.f32 %v1696_v35, %v1695_v13  ;;  %v1692_v51 = vadd.f32 %v1691_v19, %v1690_v11  ;;  %v1687_v52 = vadd.f32 %v1686_v22, %v1685_v5  ;;  %v1656_v10 = vmul.f32 %v1627_v46, %v7556_v55  ;;  %v8345_v13 = vld [vmem:[#allocation54_spill] sm:$0xff] }
 0x5d0   : > { %v1702_v29 = vsel %vm941_vm2, %v1650_v57, 0.0  ;;  %4497 = vperm.xlu0 %5731, %v4431_v15   ;;  %v4402_v63 = vrot.slane %v7499_v12, %v6849_v38  ;;  %v1836_v54 = vunpack.c.l.b16 %v5540_v60  ;;  %v1732_v48 = vadd.f32 %v1731_v40, %v1730_v41 }
 0x5d1   : > { %v1698_v25 = vrot.slane %v1697_v32, 2  ;;  %v1703_v7 = vrot.slane %v1702_v29, 4  ;;  %v1602_v33 = vpop.permute.xlu1 %1601  ;;  %v1837_v39 = vunpack.c.l.b16 %v5541_v56  ;;  %v1838_v18 = vunpack.c.l.b16 %v5542_v62 }
 0x5d2   : > { %4477 = vperm.xlu1 %5730, %v4427_v2   ;;  %v1632_v36 = vpop.permute.xlu0 %1631  ;;  %v1727_v50 = vadd.f32 %v1726_v4, %v1725_v21  ;;  %v1744_v27 = vsel %vm941_vm2, %v1656_v10, 0.0  ;;  %v1693_v6 = vrot.slane %v1692_v51, 1  ;;  %v1739_v37 = vadd.f32 %v1738_v23, %v1737_v1 }
 0x5d3   : > { %v1699_v59 = vadd.f32 %v1698_v25, %v1697_v32  ;;  %v1704_v42 = vadd.f32 %v1703_v7, %v1702_v29  ;;  %v1745_v5 = vrot.slane %v1744_v27, 4  ;;  %v5543_v11 = vpack.c.bf16 %v1687_v52, %v1687_v52 }
 0x5d4   : > { %2608 = vperm.xlu0 %5731, %v7583_v0   ;;  %v1651_v38 = vmul.f32 %v1602_v33, %v8325_v16  ;;  %v7624_v20 = vmul.f32 %v8345_v13, %v4398_v53  ;;  %v7627_v8 = vmul.f32 %v8346_v61, %v4402_v63  ;;  %v1733_v31 = vrot.slane %v1732_v48, 2 }
 0x5d5   : > { %v1705_v34 = vrot.slane %v1704_v42, 2  ;;  %v1700_v30 = vrot.slane %v1699_v59, 1  ;;  %v1746_v0 = vadd.f32 %v1745_v5, %v1744_v27  ;;  %v1607_v43 = vpop.permute.xlu1 %1606  ;;  %v1728_v21 = vrot.slane %v1727_v50, 1 }
 0x5d6   : > { %4467 = vperm.xlu1 %5730, %v7563_v24   ;;  %v1637_v12 = vpop.permute.xlu0 %1636  ;;  %v1852_v24 = vsel %vm1154_vm3, %v1837_v39, %v1836_v54  ;;  %v1709_v41 = vsel %vm941_vm2, %v1651_v38, 0.0  ;;  %v1657_v35 = vmul.f32 %v1632_v36, %v7556_v55  ;;  %v1694_v19 = vadd.f32 %v1693_v6, %v1692_v51 }
 0x5d7   : > { %v1706_v17 = vadd.f32 %v1705_v34, %v1704_v42  ;;  %v1853_v47 = vsel %vm1156_vm4, %v1838_v18, %v1852_v24  ;;  %v1740_v57 = vrot.slane %v1739_v37, 2  ;;  %v1839_v15 = vunpack.c.l.b16 %v5543_v11 }
 0x5d8   : > { %3555 = vperm.xlu0 %5731, %v7599_v9   ;;  %v1710_v14 = vrot.slane %v1709_v41, 4  ;;  %v1751_v22 = vsel %vm941_vm2, %v1657_v35, 0.0  ;;  %v1652_v32 = vmul.f32 %v1607_v43, %v7556_v55  ;;  %v1734_v1 = vadd.f32 %v1733_v31, %v1732_v48 }
 0x5d9   : > { %v1707_v45 = vrot.slane %v1706_v17, 1  ;;  %v1701_v46 = vadd.f32 %v1700_v30, %v1699_v59  ;;  %v1747_v26 = vrot.slane %v1746_v0, 2  ;;  %v1752_v2 = vrot.slane %v1751_v22, 4 }
 0x5da   : > { %4472 = vperm.xlu1 %5730, %v7566_v44   ;;  %v1642_v60 = vpop.permute.xlu0 %1641  ;;  %v7637_v56 = vadd.f32 %v1728_v21, %v1727_v50  ;;  %v1711_v9 = vadd.f32 %v1710_v14, %v1709_v41  ;;  %v1716_v44 = vsel %vm941_vm2, %v1652_v32, 0.0  ;;  %v1658_v40 = vmul.f32 %v1637_v12, %v7556_v55 }
 0x5db   : > { %v5544_v49 = vpack.c.bf16 %v1694_v19, %v1694_v19  ;;  %v1741_v62 = vadd.f32 %v1740_v57, %v1739_v37  ;;  %v1708_v4 = vadd.f32 %v1707_v45, %v1706_v17  ;;  %v1753_v25 = vadd.f32 %v1752_v2, %v1751_v22 }
 0x5dc   : > { %4502 = vperm.xlu0 %5731, %v4432_v58   ;;  %v1712_v29 = vrot.slane %v1711_v9, 2  ;;  %v1717_v51 = vrot.slane %v1716_v44, 4  ;;  %v1758_v23 = vsel %vm941_vm2, %v1658_v40, 0.0  ;;  %v1659_v7 = vmul.f32 %v1642_v60, %v7556_v55 }
 0x5dd   : > { %v5545_v33 = vpack.c.bf16 %v1701_v46, %v1701_v46  ;;  %v1748_v53 = vadd.f32 %v1747_v26, %v1746_v0  ;;  %v1754_v52 = vrot.slane %v1753_v25, 2  ;;  %v1759_v10 = vrot.slane %v1758_v23, 4 }
 0x5de   : > { %v1735_v36 = vrot.slane %v1734_v1, 1  ;;  %v1713_v28 = vadd.f32 %v1712_v29, %v1711_v9  ;;  %v1718_v63 = vadd.f32 %v1717_v51, %v1716_v44  ;;  %v1765_v54 = vsel %vm941_vm2, %v1659_v7, 0.0 }
 0x5df   : > { %v1840_v58 = vunpack.c.l.b16 %v5544_v49  ;;  %v5546_v48 = vpack.c.bf16 %v1708_v4, %v1708_v4  ;;  %v1755_v59 = vadd.f32 %v1754_v52, %v1753_v25  ;;  %v1760_v42 = vadd.f32 %v1759_v10, %v1758_v23 }
 0x5e0   : > { %3560 = vperm.xlu0 %5731, %v7610_v3   ;;  %v1742_v39 = vrot.slane %v1741_v62, 1  ;;  %v1714_v18 = vrot.slane %v1713_v28, 1  ;;  %v1719_v50 = vrot.slane %v1718_v63, 2  ;;  %v1766_v27 = vrot.slane %v1765_v54, 4 }
 0x5e1   : > { %v1854_v6 = vsel %vm1158_vm5, %v1839_v15, %v1853_v47  ;;  %v1841_v37 = vunpack.c.l.b16 %v5545_v33  ;;  %v1749_v34 = vrot.slane %v1748_v53, 1  ;;  %v1761_v5 = vrot.slane %v1760_v42, 2 }
 0x5e2   : > { %v1715_v11 = vadd.f32 %v1714_v18, %v1713_v28  ;;  %v1756_v38 = vrot.slane %v1755_v59, 1  ;;  %v1720_v12 = vadd.f32 %v1719_v50, %v1718_v63  ;;  %v1767_v13 = vadd.f32 %v1766_v27, %v1765_v54 }
 0x5e3   : > { %v1855_v3 = vsel %vm1160_vm6, %v1840_v58, %v1854_v6  ;;  %v1736_v61 = vadd.f32 %v1735_v36, %v1734_v1  ;;  %v1842_v31 = vunpack.c.l.b16 %v5546_v48  ;;  %v1762_v30 = vadd.f32 %v1761_v5, %v1760_v42 }
 0x5e4   : > { %4507 = vperm.xlu0 %5731, %v7624_v20   ;;  %v1743_v17 = vadd.f32 %v1742_v39, %v1741_v62  ;;  %v5547_v0 = vpack.c.bf16 %v1715_v11, %v1715_v11  ;;  %v1721_v43 = vrot.slane %v1720_v12, 1  ;;  %v1768_v24 = vrot.slane %v1767_v13, 2 }
 0x5e5   : > { %v5549_v21 = vpack.c.bf16 %v7637_v56, %v7637_v56  ;;  %v1856_v41 = vsel %vm1162_vm7, %v1841_v37, %v1855_v3  ;;  %v1750_v35 = vadd.f32 %v1749_v34, %v1748_v53  ;;  %v1763_v47 = vrot.slane %v1762_v30, 1 }
 0x5e6   : > { %v1843_v19 = vunpack.c.l.b16 %v5547_v0  ;;  %v1757_v57 = vadd.f32 %v1756_v38, %v1755_v59  ;;  %v1722_v45 = vadd.f32 %v1721_v43, %v1720_v12  ;;  %v1769_v20 = vadd.f32 %v1768_v24, %v1767_v13 }
 0x5e7   : > { %v5550_v15 = vpack.c.bf16 %v1736_v61, %v1736_v61  ;;  %v1857_v14 = vsel %vm1164_vm8, %v1842_v31, %v1856_v41  ;;  %v1764_v22 = vadd.f32 %v1763_v47, %v1762_v30  ;;  %v5551_v32 = vpack.c.bf16 %v1743_v17, %v1743_v17 }
 0x5e8   : > { %4512 = vperm.xlu0 %5731, %v7627_v8   ;;  %v1858_v1 = vsel %vm1166_vm9, %v1843_v19, %v1857_v14  ;;  %v5548_v46 = vpack.c.bf16 %v1722_v45, %v1722_v45  ;;  %v1770_v26 = vrot.slane %v1769_v20, 1  ;;  %v5552_v2 = vpack.c.bf16 %v1750_v35, %v1750_v35 }
 0x5e9   : > { %v1866_v60 = vpack.c.b16 %v1858_v1, %v1858_v1  ;;  %v1845_v56 = vunpack.c.l.b16 %v5549_v21  ;;  %v5553_v9 = vpack.c.bf16 %v1757_v57, %v1757_v57  ;;  %v1846_v49 = vunpack.c.l.b16 %v5550_v15 }
 0x5ea   : > { %v1844_v44 = vunpack.c.l.b16 %v5548_v46  ;;  %v1771_v40 = vadd.f32 %v1770_v26, %v1769_v20  ;;  %v5554_v8 = vpack.c.bf16 %v1764_v22, %v1764_v22  ;;  %v1847_v62 = vunpack.c.l.b16 %v5551_v32 }
 0x5eb   : > { %1871 = vst.msk [vmem:[#allocation3] sm:$0xf] %vm1870_vm11, %v1866_v60  ;;  %v1848_v29 = vunpack.c.l.b16 %v5552_v2  ;;  %v1849_v23 = vunpack.c.l.b16 %v5553_v9  ;;  %vm3790_vm2 = vcmask 388352  }
 0x5ec   : > { %v1859_v4 = vsel %vm1154_vm3, %v1845_v56, %v1844_v44  ;;  %v5555_v25 = vpack.c.bf16 %v1771_v40, %v1771_v40  ;;  %v1850_v53 = vunpack.c.l.b16 %v5554_v8  ;;  %v5738_v56 = vld [vmem:[%s6135_s20 + $0x18] sm:$0xff]  }
 0x5ed   : > { %v1860_v51 = vsel %vm1156_vm4, %v1846_v49, %v1859_v4  ;;  %v5996_v49 = vmov 0.0  }
 0x5ee   : > { %v1861_v7 = vsel %vm1158_vm5, %v1847_v62, %v1860_v51  ;;  %v1851_v33 = vunpack.c.l.b16 %v5555_v25  ;;  %5631 = vmatprep.subr.bf16.mxu1 %v5996_v49  ;;  %5651 = vmatprep.subr.bf16.mxu0 %v5996_v49 }
 0x5ef   : > { %v1862_v52 = vsel %vm1160_vm6, %v1848_v29, %v1861_v7  ;;  %5632 = vmatpush3.bf16.msra.mxu1 %v5738_v56  ;;  %5639 = vmatprep.mubr.msk.bf16.mxu1 %vm5997_vm15, %v5996_v49 }
 0x5f0   : > { %v1863_v10 = vsel %vm1162_vm7, %v1849_v23, %v1862_v52  ;;  %5633 = vmatprep.subr.bf16.mxu1 %v5996_v49  ;;  %5667 = vmatprep.mubr.msk.bf16.mxu0 %vm5997_vm15, %v5996_v49 }
 0x5f1   : > { %v1864_v36 = vsel %vm1164_vm8, %v1850_v53, %v1863_v10  ;;  %v5739_v53 = vld [vmem:[%s6135_s20 + $0x10] sm:$0xff]  }
 0x5f2   : > { %v1865_v54 = vsel %vm1166_vm9, %v1851_v33, %v1864_v36 }
 0x5f3   : > { %v1867_v59 = vpack.c.b16 %v1865_v54, %v1865_v54  ;;  %5634 = vmatpush3.bf16.msra.mxu1 %v5739_v53 }
 0x5f4   : > { %5635 = vmatprep.subr.bf16.mxu1 %v5996_v49 }
 0x5f5   : > { %v2539_v28 = vpop.permute.xlu0 %2538  ;;  %v2534_v63 = vpop.permute.xlu1 %2533  ;;  %1872 = vst.msk [vmem:[#allocation3 + $0x4] sm:$0xf] %vm1870_vm11, %v1867_v59  ;;  %v5740_v59 = vld [vmem:[%s6135_s20 + $0x8] sm:$0xff]  }
 0x5f6   : > { %v2612_v58 = vmul.f32 %v2539_v28, %v8325_v16  ;;  %v2611_v48 = vmul.f32 %v2534_v63, %v8325_v16 }
 0x5f7   : > { %5636 = vmatpush3.bf16.msra.mxu1 %v5740_v59 }
 0x5f8   : > { %v2635_v42 = vsel %vm2627_vm12, %v2612_v58, 0.0  ;;  %v2628_v39 = vsel %vm2627_vm12, %v2611_v48, 0.0  ;;  %5637 = vmatprep.subr.bf16.mxu1 %v5996_v49 }
 0x5f9   : > { %v2636_v18 = vrot.slane %v2635_v42, 4  ;;  %v2544_v50 = vpop.permute.xlu1 %2543  ;;  %v2629_v27 = vrot.slane %v2628_v39, 4 }
 0x5fa   : > { %v2613_v6 = vmul.f32 %v2544_v50, %v8325_v16 }
 0x5fb   : > { %v2637_v34 = vadd.f32 %v2636_v18, %v2635_v42  ;;  %v2630_v11 = vadd.f32 %v2629_v27, %v2628_v39 }
 0x5fc   : > { %v2642_v37 = vsel %vm2627_vm12, %v2613_v6, 0.0 }
 0x5fd   : > { %v2643_v5 = vrot.slane %v2642_v37, 4  ;;  %v2638_v12 = vrot.slane %v2637_v34, 2  ;;  %v2631_v61 = vrot.slane %v2630_v11, 2 }
 0x5ff   : > { %v2644_v38 = vadd.f32 %v2643_v5, %v2642_v37  ;;  %v2639_v0 = vadd.f32 %v2638_v12, %v2637_v34  ;;  %v2632_v21 = vadd.f32 %v2631_v61, %v2630_v11 }
 0x601   : > { %v3491_v13 = vpop.permute.xlu0 %3490  ;;  %v3486_v3 = vpop.permute.xlu1 %3485  ;;  %v2645_v30 = vrot.slane %v2644_v38, 2  ;;  %v2640_v57 = vrot.slane %v2639_v0, 1  ;;  %v2633_v14 = vrot.slane %v2632_v21, 1 }
 0x602   : > { %v3564_v31 = vmul.f32 %v3491_v13, %v8325_v16  ;;  %v3563_v17 = vmul.f32 %v3486_v3, %v8325_v16 }
 0x603   : > { %v2646_v35 = vadd.f32 %v2645_v30, %v2644_v38  ;;  %v2641_v9 = vadd.f32 %v2640_v57, %v2639_v0  ;;  %v2634_v8 = vadd.f32 %v2633_v14, %v2632_v21  ;;  %v5741_v30 = vld [vmem:[%s6135_s20] sm:$0xff]   ;;  %s4843_s20 = scalar_lea.vmem %s8039_s8, %s5980_s27 }
 0x604   : > { %v3587_v43 = vsel %vm3579_vm13, %v3564_v31, 0.0  ;;  %v3580_v47 = vsel %vm3579_vm13, %v3563_v17, 0.0  ;;  %5638 = vmatpush3.bf16.msra.mxu1 %v5741_v30 }
 0x605   : > { %v2549_v24 = vpop.permute.xlu1 %2548  ;;  %v3588_v19 = vrot.slane %v3587_v43, 4  ;;  %v3581_v22 = vrot.slane %v3580_v47, 4  ;;  %v2647_v46 = vrot.slane %v2646_v35, 1  ;;  %v5557_v52 = vpack.c.bf16 %v2641_v9, %v2641_v9  ;;  %5643 = vmatprep.subr.bf16.mxu1 %v5996_v49 }
 0x606   : > { %v2614_v41 = vmul.f32 %v2549_v24, %v8325_v16  ;;  %v5556_v54 = vpack.c.bf16 %v2634_v8, %v2634_v8 }
 0x607   : > { %v3589_v26 = vadd.f32 %v3588_v19, %v3587_v43  ;;  %v3582_v62 = vadd.f32 %v3581_v22, %v3580_v47  ;;  %v2648_v29 = vadd.f32 %v2647_v46, %v2646_v35  ;;  %v2805_v3 = vunpack.c.l.b16 %v5557_v52 }
 0x608   : > { %v2649_v45 = vsel %vm2627_vm12, %v2614_v41, 0.0  ;;  %v2804_v41 = vunpack.c.l.b16 %v5556_v54 }
 0x609   : > { %v4443_v20 = vpop.permute.xlu0 %4442  ;;  %v3496_v15 = vpop.permute.xlu1 %3495  ;;  %v2650_v2 = vrot.slane %v2649_v45, 4  ;;  %v3590_v23 = vrot.slane %v3589_v26, 2  ;;  %v3583_v58 = vrot.slane %v3582_v62, 2  ;;  %v5558_v42 = vpack.c.bf16 %v2648_v29, %v2648_v29 }
 0x60a   : > { %v4516_v32 = vmul.f32 %v4443_v20, %v8325_v16  ;;  %v3565_v1 = vmul.f32 %v3496_v15, %v8325_v16  ;;  %v2820_v56 = vsel %vm1154_vm3, %v2805_v3, %v2804_v41 }
 0x60b   : > { %v2651_v7 = vadd.f32 %v2650_v2, %v2649_v45  ;;  %v3591_v27 = vadd.f32 %v3590_v23, %v3589_v26  ;;  %v3584_v61 = vadd.f32 %v3583_v58, %v3582_v62  ;;  %v2806_v57 = vunpack.c.l.b16 %v5558_v42 }
 0x60c   : > { %v4539_v60 = vsel %vm4531_vm14, %v4516_v32, 0.0  ;;  %v3594_v4 = vsel %vm3579_vm13, %v3565_v1, 0.0 }
 0x60d   : > { %v4540_v44 = vrot.slane %v4539_v60, 4  ;;  %v4438_v40 = vpop.permute.xlu1 %4437  ;;  %v3595_v36 = vrot.slane %v3594_v4, 4  ;;  %v2652_v6 = vrot.slane %v2651_v7, 2  ;;  %v3592_v45 = vrot.slane %v3591_v27, 1 }
 0x60e   : > { %v4515_v25 = vmul.f32 %v4438_v40, %v8325_v16  ;;  %v3585_v22 = vrot.slane %v3584_v61, 1  ;;  %v7706_v8 = vsel %vm1156_vm4, %v2806_v57, %v2820_v56 }
 0x60f   : > { %v4541_v51 = vadd.f32 %v4540_v44, %v4539_v60  ;;  %v3596_v11 = vadd.f32 %v3595_v36, %v3594_v4  ;;  %v2653_v35 = vadd.f32 %v2652_v6, %v2651_v7  ;;  %v3593_v23 = vadd.f32 %v3592_v45, %v3591_v27 }
 0x610   : > { %v4532_v33 = vsel %vm4531_vm14, %v4515_v25, 0.0  ;;  %v3586_v7 = vadd.f32 %v3585_v22, %v3584_v61 }
 0x611   : > { %v4542_v10 = vrot.slane %v4541_v51, 2  ;;  %v4533_v28 = vrot.slane %v4532_v33, 4  ;;  %v2554_v63 = vpop.permute.xlu1 %2553  ;;  %v3597_v20 = vrot.slane %v3596_v11, 2  ;;  %v2654_v9 = vrot.slane %v2653_v35, 1 }
 0x612   : > { %v2615_v48 = vmul.f32 %v2554_v63, %v8325_v16  ;;  %v5573_v6 = vpack.c.bf16 %v3593_v23, %v3593_v23 }
 0x613   : > { %v4543_v39 = vadd.f32 %v4542_v10, %v4541_v51  ;;  %v4534_v18 = vadd.f32 %v4533_v28, %v4532_v33  ;;  %v2579_v50 = vpop.permute.xlu0 %2578  ;;  %v3598_v62 = vadd.f32 %v3597_v20, %v3596_v11  ;;  %v2655_v63 = vadd.f32 %v2654_v9, %v2653_v35 }
 0x614   : > { %v2656_v37 = vsel %vm2627_vm12, %v2615_v48, 0.0  ;;  %v2620_v34 = vmul.f32 %v2579_v50, %v7556_v55  ;;  %v3757_v35 = vunpack.c.l.b16 %v5573_v6 }
 0x615   : > { %v4544_v5 = vrot.slane %v4543_v39, 1  ;;  %v4535_v38 = vrot.slane %v4534_v18, 2  ;;  %v2657_v12 = vrot.slane %v2656_v37, 4  ;;  %v3501_v13 = vpop.permute.xlu1 %3500  ;;  %v3599_v59 = vrot.slane %v3598_v62, 1 }
 0x616   : > { %v3566_v31 = vmul.f32 %v3501_v13, %v8325_v16  ;;  %v2691_v24 = vsel %vm2627_vm12, %v2620_v34, 0.0  ;;  %v5559_v3 = vpack.c.bf16 %v2655_v63, %v2655_v63 }
 0x617   : > { %v4545_v17 = vadd.f32 %v4544_v5, %v4543_v39  ;;  %v4536_v0 = vadd.f32 %v4535_v38, %v4534_v18  ;;  %v2658_v43 = vadd.f32 %v2657_v12, %v2656_v37  ;;  %v2584_v21 = vpop.permute.xlu0 %2583  ;;  %v2692_v32 = vrot.slane %v2691_v24, 4 }
 0x618   : > { %v3601_v47 = vsel %vm3579_vm13, %v3566_v31, 0.0  ;;  %v2621_v19 = vmul.f32 %v2584_v21, %v7556_v55  ;;  %v5572_v37 = vpack.c.bf16 %v3586_v7, %v3586_v7  ;;  %v2807_v22 = vunpack.c.l.b16 %v5559_v3 }
 0x619   : > { %v4537_v15 = vrot.slane %v4536_v0, 1  ;;  %v4448_v14 = vpop.permute.xlu1 %4447  ;;  %v3602_v1 = vrot.slane %v3601_v47, 4  ;;  %v5589_v26 = vpack.c.bf16 %v4545_v17, %v4545_v17  ;;  %v2659_v60 = vrot.slane %v2658_v43, 2 }
 0x61a   : > { %v2698_v46 = vsel %vm2627_vm12, %v2621_v19, 0.0  ;;  %v4517_v40 = vmul.f32 %v4448_v14, %v8325_v16  ;;  %v2693_v33 = vadd.f32 %v2692_v32, %v2691_v24  ;;  %v3600_v17 = vadd.f32 %v3599_v59, %v3598_v62 }
 0x61b   : > { %v4538_v2 = vadd.f32 %v4537_v15, %v4536_v0  ;;  %v2699_v44 = vrot.slane %v2698_v46, 4  ;;  %v3603_v25 = vadd.f32 %v3602_v1, %v3601_v47  ;;  %v3531_v29 = vpop.permute.xlu0 %3530  ;;  %v4709_v52 = vunpack.c.l.b16 %v5589_v26 }
 0x61c   : > { %v4546_v53 = vsel %vm4531_vm14, %v4517_v40, 0.0  ;;  %v2660_v36 = vadd.f32 %v2659_v60, %v2658_v43  ;;  %v3572_v58 = vmul.f32 %v3531_v29, %v7556_v55  ;;  %v2694_v38 = vrot.slane %v2693_v33, 2 }
 0x61d   : > { %v5588_v4 = vpack.c.bf16 %v4538_v2, %v4538_v2  ;;  %v2559_v51 = vpop.permute.xlu1 %2558  ;;  %v4547_v28 = vrot.slane %v4546_v53, 4  ;;  %v2700_v54 = vadd.f32 %v2699_v44, %v2698_v46  ;;  %v3604_v39 = vrot.slane %v3603_v25, 2 }
 0x61e   : > { %v2616_v48 = vmul.f32 %v2559_v51, %v8325_v16  ;;  %v3643_v34 = vsel %vm3579_vm13, %v3572_v58, 0.0  ;;  %v2661_v11 = vrot.slane %v2660_v36, 1  ;;  %v3756_v47 = vunpack.c.l.b16 %v5572_v37 }
 0x61f   : > { %v4708_v10 = vunpack.c.l.b16 %v5588_v4  ;;  %v4548_v18 = vadd.f32 %v4547_v28, %v4546_v53  ;;  %v2589_v50 = vpop.permute.xlu0 %2588  ;;  %v3644_v13 = vrot.slane %v3643_v34, 4  ;;  %v2701_v61 = vrot.slane %v2700_v54, 2 }
 0x620   : > { %v2663_v5 = vsel %vm2627_vm12, %v2616_v48, 0.0  ;;  %v2622_v30 = vmul.f32 %v2589_v50, %v7556_v55  ;;  %v3605_v0 = vadd.f32 %v3604_v39, %v3603_v25  ;;  %v2662_v45 = vadd.f32 %v2661_v11, %v2660_v36 }
 0x621   : > { %v7712_v42 = vsel %vm1154_vm3, %v4709_v52, %v4708_v10  ;;  %v3506_v27 = vpop.permute.xlu1 %3505  ;;  %v4549_v12 = vrot.slane %v4548_v18, 2  ;;  %v2664_v31 = vrot.slane %v2663_v5, 4  ;;  %v3645_v24 = vadd.f32 %v3644_v13, %v3643_v34 }
 0x622   : > { %v2705_v57 = vsel %vm2627_vm12, %v2622_v30, 0.0  ;;  %v2695_v20 = vadd.f32 %v2694_v38, %v2693_v33  ;;  %v2702_v32 = vadd.f32 %v2701_v61, %v2700_v54  ;;  %v3567_v1 = vmul.f32 %v3506_v27, %v8325_v16 }
 0x623   : > { %v4550_v43 = vadd.f32 %v4549_v12, %v4548_v18  ;;  %v3536_v21 = vpop.permute.xlu0 %3535  ;;  %v2665_v19 = vadd.f32 %v2664_v31, %v2663_v5  ;;  %v2706_v14 = vrot.slane %v2705_v57, 4  ;;  %v5574_v26 = vpack.c.bf16 %v3600_v17, %v3600_v17 }
 0x624   : > { %v3573_v46 = vmul.f32 %v3536_v21, %v7556_v55  ;;  %v3606_v2 = vrot.slane %v3605_v0, 1  ;;  %v3646_v56 = vrot.slane %v3645_v24, 2  ;;  %v3608_v4 = vsel %vm3579_vm13, %v3567_v1, 0.0 }
 0x625   : > { %v4453_v41 = vpop.permute.xlu1 %4452  ;;  %v4551_v15 = vrot.slane %v4550_v43, 1  ;;  %v2666_v40 = vrot.slane %v2665_v19, 2  ;;  %v2707_v62 = vadd.f32 %v2706_v14, %v2705_v57  ;;  %v5560_v29 = vpack.c.bf16 %v2662_v45, %v2662_v45 }
 0x626   : > { %v3650_v25 = vsel %vm3579_vm13, %v3573_v46, 0.0  ;;  %v2696_v51 = vrot.slane %v2695_v20, 1  ;;  %v3609_v7 = vrot.slane %v3608_v4, 4  ;;  %v2703_v33 = vrot.slane %v2702_v32, 1 }
 0x627   : > { %v4552_v60 = vadd.f32 %v4551_v15, %v4550_v43  ;;  %v4483_v9 = vpop.permute.xlu0 %4482  ;;  %v3651_v53 = vrot.slane %v3650_v25, 4  ;;  %v4518_v52 = vmul.f32 %v4453_v41, %v8325_v16  ;;  %v3607_v36 = vadd.f32 %v3606_v2, %v3605_v0 }
 0x628   : > { %v4524_v10 = vmul.f32 %v4483_v9, %v7556_v55  ;;  %v3647_v63 = vadd.f32 %v3646_v56, %v3645_v24  ;;  %v3610_v54 = vadd.f32 %v3609_v7, %v3608_v4  ;;  %v2667_v48 = vadd.f32 %v2666_v40, %v2665_v19 }
 0x629   : > { %v2564_v44 = vpop.permute.xlu1 %2563  ;;  %v5590_v23 = vpack.c.bf16 %v4552_v60, %v4552_v60  ;;  %v2708_v59 = vrot.slane %v2707_v62, 2  ;;  %v4553_v39 = vsel %vm4531_vm14, %v4518_v52, 0.0  ;;  %v3772_v27 = vsel %vm1154_vm3, %v3757_v35, %v3756_v47 }
 0x62a   : > { %v4595_v18 = vsel %vm4531_vm14, %v4524_v10, 0.0  ;;  %v3758_v6 = vunpack.c.l.b16 %v5574_v26  ;;  %v3652_v34 = vadd.f32 %v3651_v53, %v3650_v25  ;;  %v2808_v5 = vunpack.c.l.b16 %v5560_v29 }
 0x62b   : > { %v4710_v28 = vunpack.c.l.b16 %v5590_v23  ;;  %v2594_v58 = vpop.permute.xlu0 %2593  ;;  %v2697_v11 = vadd.f32 %v2696_v51, %v2695_v20  ;;  %v3611_v38 = vrot.slane %v3610_v54, 2  ;;  %v4554_v12 = vrot.slane %v4553_v39, 4 }
 0x62c   : > { %v2822_v13 = vsel %vm1158_vm5, %v2807_v22, %v7706_v8  ;;  %v2704_v3 = vadd.f32 %v2703_v33, %v2702_v32  ;;  %v4596_v61 = vrot.slane %v4595_v18, 4  ;;  %v2617_v31 = vmul.f32 %v2564_v44, %v8325_v16 }
 0x62d   : > { %v3511_v50 = vpop.permute.xlu1 %3510  ;;  %v7729_v37 = vsel %vm1156_vm4, %v4710_v28, %v7712_v42  ;;  %v5575_v17 = vpack.c.bf16 %v3607_v36, %v3607_v36  ;;  %v3648_v0 = vrot.slane %v3647_v63, 1  ;;  %v2668_v43 = vrot.slane %v2667_v48, 1 }
 0x62e   : > { %v2709_v24 = vadd.f32 %v2708_v59, %v2707_v62  ;;  %v3773_v42 = vsel %vm1156_vm4, %v3758_v6, %v3772_v27  ;;  %v3653_v21 = vrot.slane %v3652_v34, 2  ;;  %v2670_v41 = vsel %vm2627_vm12, %v2617_v31, 0.0 }
 0x62f   : > { %v3541_v30 = vpop.permute.xlu0 %3540  ;;  %v2623_v35 = vmul.f32 %v2594_v58, %v7556_v55  ;;  %v7738_v47 = vsel %vm1160_vm6, %v2808_v5, %v2822_v13  ;;  %v5565_v8 = vpack.c.bf16 %v2697_v11, %v2697_v11  ;;  %v3612_v19 = vadd.f32 %v3611_v38, %v3610_v54 }
 0x630   : > { %v4555_v57 = vadd.f32 %v4554_v12, %v4553_v39  ;;  %v5566_v20 = vpack.c.bf16 %v2704_v3, %v2704_v3  ;;  %v4597_v15 = vadd.f32 %v4596_v61, %v4595_v18  ;;  %v2671_v14 = vrot.slane %v2670_v41, 4 }
 0x631   : > { %v4458_v45 = vpop.permute.xlu1 %4457  ;;  %v2712_v22 = vsel %vm2627_vm12, %v2623_v35, 0.0  ;;  %v3759_v1 = vunpack.c.l.b16 %v5575_v17  ;;  %v3649_v46 = vadd.f32 %v3648_v0, %v3647_v63  ;;  %v2669_v26 = vadd.f32 %v2668_v43, %v2667_v48 }
 0x632   : > { %v2710_v2 = vrot.slane %v2709_v24, 1  ;;  %v3654_v60 = vadd.f32 %v3653_v21, %v3652_v34  ;;  %v2672_v56 = vadd.f32 %v2671_v14, %v2670_v41  ;;  %v3568_v9 = vmul.f32 %v3511_v50, %v8325_v16 }
 0x633   : > { %v4488_v32 = vpop.permute.xlu0 %4487  ;;  %v3574_v44 = vmul.f32 %v3541_v30, %v7556_v55  ;;  %v7743_v40 = vunpack.c.l.b16 %v5565_v8  ;;  %v3613_v62 = vrot.slane %v3612_v19, 1  ;;  %v4556_v4 = vrot.slane %v4555_v57, 2 }
 0x634   : > { %v2713_v25 = vrot.slane %v2712_v22, 4  ;;  %v4598_v29 = vrot.slane %v4597_v15, 2  ;;  %v2673_v51 = vrot.slane %v2672_v56, 2  ;;  %v3615_v23 = vsel %vm3579_vm13, %v3568_v9, 0.0 }
 0x635   : > { %v3657_v7 = vsel %vm3579_vm13, %v3574_v44, 0.0  ;;  %v7748_v53 = vsel %vm1158_vm5, %v3759_v1, %v3773_v42  ;;  %v7750_v52 = vunpack.c.l.b16 %v5566_v20  ;;  %v5581_v10 = vpack.c.bf16 %v3649_v46, %v3649_v46  ;;  %v2569_v28 = vpop.permute.xlu1 %2568 }
 0x636   : > { %v5561_v36 = vpack.c.bf16 %v2669_v26, %v2669_v26  ;;  %v2711_v63 = vadd.f32 %v2710_v2, %v2709_v24  ;;  %v3655_v54 = vrot.slane %v3654_v60, 1  ;;  %v3616_v58 = vrot.slane %v3615_v23, 4 }
 0x637   : > { %v2599_v33 = vpop.permute.xlu0 %2598  ;;  %v3658_v48 = vrot.slane %v3657_v7, 4  ;;  %v3614_v59 = vadd.f32 %v3613_v62, %v3612_v19  ;;  %v4557_v39 = vadd.f32 %v4556_v4, %v4555_v57  ;;  %v2714_v18 = vadd.f32 %v2713_v25, %v2712_v22 }
 0x638   : > { %v4519_v50 = vmul.f32 %v4458_v45, %v8325_v16  ;;  %v4599_v27 = vadd.f32 %v4598_v29, %v4597_v15  ;;  %v2674_v6 = vadd.f32 %v2673_v51, %v2672_v56  ;;  %v3617_v34 = vadd.f32 %v3616_v58, %v3615_v23 }
 0x639   : > { %v4525_v5 = vmul.f32 %v4488_v32, %v7556_v55  ;;  %v7754_v38 = vunpack.c.l.b16 %v5581_v10  ;;  %v2809_v12 = vunpack.c.l.b16 %v5561_v36  ;;  %v3659_v13 = vadd.f32 %v3658_v48, %v3657_v7  ;;  %v3516_v21 = vpop.permute.xlu1 %3515 }
 0x63a   : > { %v4560_v3 = vsel %vm4531_vm14, %v4519_v50, 0.0  ;;  %v5567_v61 = vpack.c.bf16 %v2711_v63, %v2711_v63  ;;  %v3656_v31 = vadd.f32 %v3655_v54, %v3654_v60  ;;  %v3618_v30 = vrot.slane %v3617_v34, 2 }
 0x63b   : > { %v3546_v11 = vpop.permute.xlu0 %3545  ;;  %v4561_v17 = vrot.slane %v4560_v3, 4  ;;  %v4558_v0 = vrot.slane %v4557_v39, 1  ;;  %v2715_v43 = vrot.slane %v2714_v18, 2  ;;  %v4602_v24 = vsel %vm4531_vm14, %v4525_v5, 0.0 }
 0x63c   : > { %v2618_v42 = vmul.f32 %v2569_v28, %v8325_v16  ;;  %v5576_v41 = vpack.c.bf16 %v3614_v59, %v3614_v59  ;;  %v4600_v35 = vrot.slane %v4599_v27, 1  ;;  %v2675_v8 = vrot.slane %v2674_v6, 1 }
 0x63d   : > { %v4562_v19 = vadd.f32 %v4561_v17, %v4560_v3  ;;  %v3619_v45 = vadd.f32 %v3618_v30, %v3617_v34  ;;  %v3660_v20 = vrot.slane %v3659_v13, 2  ;;  %v2624_v14 = vmul.f32 %v2599_v33, %v7556_v55  ;;  %v4463_v7 = vpop.permute.xlu1 %4462 }
 0x63e   : > { %v2677_v15 = vsel %vm2627_vm12, %v2618_v42, 0.0  ;;  %v2824_v22 = vsel %vm1162_vm7, %v2809_v12, %v7738_v47  ;;  %v7765_v32 = vunpack.c.l.b16 %v5567_v61  ;;  %v5582_v1 = vpack.c.bf16 %v3656_v31, %v3656_v31 }
 0x63f   : > { %v7759_v57 = vpop.permute.xlu0 %4492  ;;  %v4603_v46 = vrot.slane %v4602_v24, 4  ;;  %v4559_v26 = vadd.f32 %v4558_v0, %v4557_v39  ;;  %v2716_v2 = vadd.f32 %v2715_v43, %v2714_v18  ;;  %v2678_v60 = vrot.slane %v2677_v15, 4 }
 0x640   : > { %v2719_v56 = vsel %vm2627_vm12, %v2624_v14, 0.0  ;;  %v3760_v9 = vunpack.c.l.b16 %v5576_v41  ;;  %v4601_v44 = vadd.f32 %v4600_v35, %v4599_v27  ;;  %v2676_v62 = vadd.f32 %v2675_v8, %v2674_v6 }
 0x641   : > { %v4563_v4 = vrot.slane %v4562_v19, 2  ;;  %v3620_v25 = vrot.slane %v3619_v45, 1  ;;  %v3661_v29 = vadd.f32 %v3660_v20, %v3659_v13  ;;  %v2679_v51 = vadd.f32 %v2678_v60, %v2677_v15  ;;  %v3521_v0 = vpop.permute.xlu1 %3520 }
 0x642   : > { %v3569_v23 = vmul.f32 %v3516_v21, %v8325_v16  ;;  %v7769_v33 = vunpack.c.l.b16 %v5582_v1  ;;  %v4604_v10 = vadd.f32 %v4603_v46, %v4602_v24  ;;  %v2720_v36 = vrot.slane %v2719_v56, 4 }
 0x643   : > { %v2604_v47 = vpop.permute.xlu0 %2603  ;;  %v3575_v28 = vmul.f32 %v3546_v11, %v7556_v55  ;;  %v5591_v63 = vpack.c.bf16 %v4559_v26, %v4559_v26  ;;  %v2717_v54 = vrot.slane %v2716_v2, 1  ;;  %v2680_v58 = vrot.slane %v2679_v51, 2 }
 0x644   : > { %v3622_v48 = vsel %vm3579_vm13, %v3569_v23, 0.0  ;;  %v5597_v59 = vpack.c.bf16 %v4601_v44, %v4601_v44  ;;  %v5562_v39 = vpack.c.bf16 %v2676_v62, %v2676_v62  ;;  %v4564_v18 = vadd.f32 %v4563_v4, %v4562_v19 }
 0x645   : > { %v3623_v50 = vrot.slane %v3622_v48, 4  ;;  %v3621_v27 = vadd.f32 %v3620_v25, %v3619_v45  ;;  %v3662_v6 = vrot.slane %v3661_v29, 1  ;;  %v2681_v34 = vadd.f32 %v2680_v58, %v2679_v51  ;;  %v2574_v51 = vpop.permute.xlu1 %2573 }
 0x646   : > { %v3664_v5 = vsel %vm3579_vm13, %v3575_v28, 0.0  ;;  %v4605_v12 = vrot.slane %v4604_v10, 2  ;;  %v2721_v13 = vadd.f32 %v2720_v36, %v2719_v56  ;;  %v4711_v31 = vunpack.c.l.b16 %v5591_v63 }
 0x647   : > { %v3624_v3 = vadd.f32 %v3623_v50, %v3622_v48  ;;  %v3665_v61 = vrot.slane %v3664_v5, 4  ;;  %v2718_v11 = vadd.f32 %v2717_v54, %v2716_v2  ;;  %v2682_v30 = vrot.slane %v2681_v34, 1  ;;  %v3551_v43 = vpop.permute.xlu0 %3550 }
 0x648   : > { %v4520_v17 = vmul.f32 %v4463_v7, %v8325_v16  ;;  %v2810_v24 = vunpack.c.l.b16 %v5562_v39  ;;  %v4565_v42 = vrot.slane %v4564_v18, 1  ;;  %v3775_v35 = vsel %vm1160_vm6, %v3760_v9, %v7748_v53 }
 0x649   : > { %v3625_v21 = vrot.slane %v3624_v3, 2  ;;  %v3666_v41 = vadd.f32 %v3665_v61, %v3664_v5  ;;  %v7777_v8 = vunpack.c.l.b16 %v5597_v59  ;;  %v3663_v19 = vadd.f32 %v3662_v6, %v3661_v29 }
 0x64a   : > { %v2683_v45 = vadd.f32 %v2682_v30, %v2681_v34  ;;  %v5577_v20 = vpack.c.bf16 %v3621_v27, %v3621_v27  ;;  %v4606_v15 = vadd.f32 %v4605_v12, %v4604_v10  ;;  %v2722_v14 = vrot.slane %v2721_v13, 2 }
 0x64b   : > { %v4567_v1 = vsel %vm4531_vm14, %v4520_v17, 0.0  ;;  %v4726_v46 = vsel %vm1158_vm5, %v4711_v31, %v7729_v37  ;;  %v5568_v26 = vpack.c.bf16 %v2718_v11, %v2718_v11  ;;  %v4526_v60 = vmul.f32 %v7759_v57, %v7556_v55  ;;  %v7787_v23 = vpop.permute.xlu0 %4497  ;;  %v3526_v31 = vpop.permute.xlu1 %3525 }
 0x64c   : > { %v5563_v2 = vpack.c.bf16 %v2683_v45, %v2683_v45  ;;  %v2825_v56 = vsel %vm1164_vm8, %v2810_v24, %v2824_v22  ;;  %v4566_v53 = vadd.f32 %v4565_v42, %v4564_v18  ;;  %v3626_v9 = vadd.f32 %v3625_v21, %v3624_v3 }
 0x64d   : > { %v3667_v44 = vrot.slane %v3666_v41, 2  ;;  %v4568_v4 = vrot.slane %v4567_v1, 4  ;;  %v3570_v25 = vmul.f32 %v3521_v0, %v8325_v16  ;;  %v2625_v29 = vmul.f32 %v2604_v47, %v7556_v55 }
 0x64e   : > { %v2811_v62 = vunpack.c.l.b16 %v5563_v2  ;;  %v3761_v37 = vunpack.c.l.b16 %v5577_v20  ;;  %v5583_v7 = vpack.c.bf16 %v3663_v19, %v3663_v19  ;;  %v4607_v10 = vrot.slane %v4606_v15, 1 }
 0x64f   : > { %v2723_v36 = vadd.f32 %v2722_v14, %v2721_v13  ;;  %v4609_v22 = vsel %vm4531_vm14, %v4526_v60, 0.0  ;;  %v3629_v28 = vsel %vm3579_vm13, %v3570_v25, 0.0  ;;  %v2726_v63 = vsel %vm2627_vm12, %v2625_v29, 0.0  ;;  %v2609_v11 = vpop.permute.xlu0 %2608  ;;  %v4478_v25 = vpop.permute.xlu1 %4477 }
 0x650   : > { %v2826_v57 = vsel %vm1166_vm9, %v2811_v62, %v2825_v56  ;;  %v5592_v54 = vpack.c.bf16 %v4566_v53, %v4566_v53  ;;  %v3627_v48 = vrot.slane %v3626_v9, 1  ;;  %v3668_v59 = vadd.f32 %v3667_v44, %v3666_v41 }
 0x651   : > { %v2834_v58 = vpack.c.b16 %v2826_v57, %v2826_v57  ;;  %v4569_v47 = vadd.f32 %v4568_v4, %v4567_v1  ;;  %v3630_v39 = vrot.slane %v3629_v28, 4  ;;  %v2727_v18 = vrot.slane %v2726_v63, 4 }
 0x652   : > { %v2619_v50 = vmul.f32 %v2574_v51, %v7556_v55  ;;  %v7794_v27 = vunpack.c.l.b16 %v5568_v26  ;;  %v4608_v6 = vadd.f32 %v4607_v10, %v4606_v15  ;;  %v2724_v34 = vrot.slane %v2723_v36, 1 }
 0x653   : > { %2839 = vst.msk [vmem:[#allocation3] sm:$0xf] %vm2838_vm0, %v2834_v58  ;;  %v4610_v5 = vrot.slane %v4609_v22, 4  ;;  %v3631_v12 = vadd.f32 %v3630_v39, %v3629_v28  ;;  %v2728_v13 = vadd.f32 %v2727_v18, %v2726_v63  ;;  %v3576_v61 = vmul.f32 %v3551_v43, %v7556_v55  ;;  %v3556_v29 = vpop.permute.xlu0 %3555 }
 0x654   : > { %v2684_v3 = vsel %vm2627_vm12, %v2619_v50, 0.0  ;;  %v7799_v30 = vunpack.c.l.b16 %v5583_v7  ;;  %v3628_v17 = vadd.f32 %v3627_v48, %v3626_v9  ;;  %v3669_v0 = vrot.slane %v3668_v59, 1 }
 0x655   : > { %v2685_v24 = vrot.slane %v2684_v3, 4  ;;  %v3776_v42 = vsel %vm1162_vm7, %v3761_v37, %v3775_v35  ;;  %v4712_v21 = vunpack.c.l.b16 %v5592_v54  ;;  %v4570_v41 = vrot.slane %v4569_v47, 2 }
 0x656   : > { %v3632_v19 = vrot.slane %v3631_v12, 2  ;;  %v5598_v45 = vpack.c.bf16 %v4608_v6, %v4608_v6  ;;  %v7802_v20 = vadd.f32 %v2724_v34, %v2723_v36  ;;  %v3571_v14 = vmul.f32 %v3526_v31, %v7556_v55 }
 0x657   : > { %v2686_v15 = vadd.f32 %v2685_v24, %v2684_v3  ;;  %v4611_v1 = vadd.f32 %v4610_v5, %v4609_v22  ;;  %v2729_v26 = vrot.slane %v2728_v13, 2  ;;  %v3671_v2 = vsel %vm3579_vm13, %v3576_v61, 0.0  ;;  %v4503_v61 = vpop.permute.xlu0 %4502 }
 0x658   : > { %v3633_v43 = vadd.f32 %v3632_v19, %v3631_v12  ;;  %v5578_v60 = vpack.c.bf16 %v3628_v17, %v3628_v17  ;;  %v7806_v56 = vadd.f32 %v3669_v0, %v3668_v59  ;;  %v3636_v35 = vsel %vm3579_vm13, %v3571_v14, 0.0 }
 0x659   : > { %v2687_v53 = vrot.slane %v2686_v15, 2  ;;  %v7810_v9 = vsel %vm1160_vm6, %v4712_v21, %v4726_v46  ;;  %v4571_v44 = vadd.f32 %v4570_v41, %v4569_v47  ;;  %v3637_v4 = vrot.slane %v3636_v35, 4  ;;  %v4468_v21 = vpop.permute.xlu1 %4467 }
 0x65a   : > { %v3634_v62 = vrot.slane %v3633_v43, 1  ;;  %v7812_v51 = vunpack.c.l.b16 %v5598_v45  ;;  %v5569_v37 = vpack.c.bf16 %v7802_v20, %v7802_v20  ;;  %v3672_v10 = vrot.slane %v3671_v2, 4 }
 0x65b   : > { %v2688_v7 = vadd.f32 %v2687_v53, %v2686_v15  ;;  %v4612_v36 = vrot.slane %v4611_v1, 2  ;;  %v2730_v22 = vadd.f32 %v2729_v26, %v2728_v13  ;;  %v3638_v28 = vadd.f32 %v3637_v4, %v3636_v35 }
 0x65c   : > { %v3635_v57 = vadd.f32 %v3634_v62, %v3633_v43  ;;  %v3762_v63 = vunpack.c.l.b16 %v5578_v60  ;;  %v5584_v46 = vpack.c.bf16 %v7806_v56, %v7806_v56  ;;  %v4523_v58 = vmul.f32 %v4478_v25, %v7556_v55  ;;  %v3561_v25 = vpop.permute.xlu0 %3560 }
 0x65d   : > { %v2689_v54 = vrot.slane %v2688_v7, 1  ;;  %v4572_v48 = vrot.slane %v4571_v44, 1  ;;  %v3639_v47 = vrot.slane %v3638_v28, 2  ;;  %v2626_v39 = vmul.f32 %v2609_v11, %v7556_v55 }
 0x65e   : > { %v5579_v59 = vpack.c.bf16 %v3635_v57, %v3635_v57  ;;  %v3673_v50 = vadd.f32 %v3672_v10, %v3671_v2  ;;  %v4527_v6 = vmul.f32 %v7787_v23, %v7556_v55  ;;  %v4588_v34 = vsel %vm4531_vm14, %v4523_v58, 0.0 }
 0x65f   : > { %v2690_v18 = vadd.f32 %v2689_v54, %v2688_v7  ;;  %v2731_v12 = vrot.slane %v2730_v22, 1  ;;  %v3640_v13 = vadd.f32 %v3639_v47, %v3638_v28  ;;  %v4589_v3 = vrot.slane %v4588_v34, 4 }
 0x660   : > { %v3763_v5 = vunpack.c.l.b16 %v5579_v59  ;;  %v3777_v31 = vsel %vm1164_vm8, %v3762_v63, %v3776_v42  ;;  %v4613_v17 = vadd.f32 %v4612_v36, %v4611_v1  ;;  %v2733_v24 = vsel %vm2627_vm12, %v2626_v39, 0.0 }
 0x661   : > { %v5564_v0 = vpack.c.bf16 %v2690_v18, %v2690_v18  ;;  %v4573_v11 = vadd.f32 %v4572_v48, %v4571_v44  ;;  %v4590_v19 = vadd.f32 %v4589_v3, %v4588_v34  ;;  %v2734_v45 = vrot.slane %v2733_v24, 4  ;;  %v4473_v48 = vpop.permute.xlu1 %4472 }
 0x662   : > { %v3778_v41 = vsel %vm1166_vm9, %v3763_v5, %v3777_v31  ;;  %v3674_v15 = vrot.slane %v3673_v50, 2  ;;  %v4616_v14 = vsel %vm4531_vm14, %v4527_v6, 0.0  ;;  %v2732_v43 = vadd.f32 %v2731_v12, %v2730_v22 }
 0x663   : > { %v3786_v23 = vpack.c.b16 %v3778_v41, %v3778_v41  ;;  %v2812_v20 = vunpack.c.l.b16 %v5564_v0  ;;  %v3641_v26 = vrot.slane %v3640_v13, 1  ;;  %v2735_v2 = vadd.f32 %v2734_v45, %v2733_v24 }
 0x664   : > { %v4521_v42 = vmul.f32 %v4468_v21, %v8325_v16  ;;  %v4614_v1 = vrot.slane %v4613_v17, 1  ;;  %v4591_v56 = vrot.slane %v4590_v19, 2  ;;  %v3577_v53 = vmul.f32 %v3556_v29, %v7556_v55 }
 0x665   : > { %3791 = vst.msk [vmem:[#allocation3] sm:$0xf] %vm3790_vm2, %v3786_v23  ;;  %v2827_v60 = vsel %vm1154_vm3, %v7743_v40, %v2812_v20  ;;  %v5593_v35 = vpack.c.bf16 %v4573_v11, %v4573_v11  ;;  %v4617_v62 = vrot.slane %v4616_v14, 4  ;;  %v2736_v4 = vrot.slane %v2735_v2, 2 }
 0x666   : > { %v2828_v44 = vsel %vm1156_vm4, %v7750_v52, %v2827_v60  ;;  %v2817_v7 = vunpack.c.l.b16 %v5569_v37  ;;  %v3675_v10 = vadd.f32 %v3674_v15, %v3673_v50  ;;  %v4574_v36 = vsel %vm4531_vm14, %v4521_v42, 0.0 }
 0x667   : > { %v3678_v57 = vsel %vm3579_vm13, %v3577_v53, 0.0  ;;  %v5570_v22 = vpack.c.bf16 %v2732_v43, %v2732_v43  ;;  %v2829_v40 = vsel %vm1158_vm5, %v7765_v32, %v2828_v44  ;;  %v3642_v28 = vadd.f32 %v3641_v26, %v3640_v13  ;;  %v4508_v13 = vpop.permute.xlu0 %4507 }
 0x668   : > { %v2737_v63 = vadd.f32 %v2736_v4, %v2735_v2  ;;  %v7838_v29 = vunpack.c.l.b16 %v5584_v46  ;;  %v4592_v54 = vadd.f32 %v4591_v56, %v4590_v19  ;;  %v4575_v58 = vrot.slane %v4574_v36, 4 }
 0x669   : > { %v3679_v52 = vrot.slane %v3678_v57, 4  ;;  %v7840_v59 = vunpack.c.l.b16 %v5593_v35  ;;  %v7842_v37 = vadd.f32 %v4614_v1, %v4613_v17  ;;  %v4618_v47 = vadd.f32 %v4617_v62, %v4616_v14 }
 0x66a   : > { %v2738_v39 = vrot.slane %v2737_v63, 1  ;;  %v3676_v18 = vrot.slane %v3675_v10, 1  ;;  %v2830_v50 = vsel %vm1160_vm6, %v7794_v27, %v2829_v40  ;;  %v4576_v6 = vadd.f32 %v4575_v58, %v4574_v36 }
 0x66b   : > { %v3680_v32 = vadd.f32 %v3679_v52, %v3678_v57  ;;  %v2818_v34 = vunpack.c.l.b16 %v5570_v22  ;;  %v5580_v5 = vpack.c.bf16 %v3642_v28, %v3642_v28  ;;  %v4522_v12 = vmul.f32 %v4473_v48, %v8325_v16  ;;  %v4513_v53 = vpop.permute.xlu0 %4512 }
 0x66c   : > { %v2739_v46 = vadd.f32 %v2738_v39, %v2737_v63  ;;  %v4593_v3 = vrot.slane %v4592_v54, 1  ;;  %v4577_v31 = vrot.slane %v4576_v6, 2  ;;  %v4528_v17 = vmul.f32 %v4503_v61, %v7556_v55 }
 0x66d   : > { %v3681_v0 = vrot.slane %v3680_v32, 2  ;;  %v4619_v24 = vrot.slane %v4618_v47, 2  ;;  %v2831_v11 = vsel %vm1162_vm7, %v2817_v7, %v2830_v50  ;;  %v4581_v41 = vsel %vm4531_vm14, %v4522_v12, 0.0 }
 0x66e   : > { %v5571_v21 = vpack.c.bf16 %v2739_v46, %v2739_v46  ;;  %v4578_v27 = vadd.f32 %v4577_v31, %v4576_v6  ;;  %v4582_v45 = vrot.slane %v4581_v41, 4  ;;  %v4623_v23 = vsel %vm4531_vm14, %v4528_v17, 0.0 }
 0x66f   : > { %v3682_v19 = vadd.f32 %v3681_v0, %v3680_v32  ;;  %v3764_v20 = vunpack.c.l.b16 %v5580_v5  ;;  %v4624_v16 = vrot.slane %v4623_v23, 4  ;;  %v3578_v14 = vmul.f32 %v3561_v25, %v7556_v55 }
 0x670   : > { %v2819_v15 = vunpack.c.l.b16 %v5571_v21  ;;  %v4594_v43 = vadd.f32 %v4593_v3, %v4592_v54  ;;  %v2832_v26 = vsel %vm1164_vm8, %v2818_v34, %v2831_v11  ;;  %v4579_v61 = vrot.slane %v4578_v27, 1 }
 0x671   : > { %v4583_v2 = vadd.f32 %v4582_v45, %v4581_v41  ;;  %v3677_v42 = vadd.f32 %v3676_v18, %v3675_v10  ;;  %v4625_v60 = vadd.f32 %v4624_v16, %v4623_v23  ;;  %v3685_v56 = vsel %vm3579_vm13, %v3578_v14, 0.0 }
 0x672   : > { %v2833_v1 = vsel %vm1166_vm9, %v2819_v15, %v2832_v26  ;;  %v4580_v44 = vadd.f32 %v4579_v61, %v4578_v27  ;;  %v3683_v62 = vrot.slane %v3682_v19, 1  ;;  %v4620_v7 = vadd.f32 %v4619_v24, %v4618_v47 }
 0x673   : > { %v2835_v35 = vpack.c.b16 %v2833_v1, %v2833_v1  ;;  %v4584_v4 = vrot.slane %v4583_v2, 2  ;;  %v4626_v36 = vrot.slane %v4625_v60, 2  ;;  %v3686_v57 = vrot.slane %v3685_v56, 4 }
 0x674   : > { %v4529_v25 = vmul.f32 %v4508_v13, %v7556_v55  ;;  %v3779_v22 = vsel %vm1154_vm3, %v7754_v38, %v3764_v20  ;;  %v5596_v40 = vpack.c.bf16 %v4594_v43, %v4594_v43  ;;  %v4530_v28 = vmul.f32 %v4513_v53, %v7556_v55 }
 0x675   : > { %2840 = vst.msk [vmem:[#allocation3 + $0x4] sm:$0xf] %vm2838_vm0, %v2835_v35  ;;  %v4585_v10 = vadd.f32 %v4584_v4, %v4583_v2  ;;  %v5594_v63 = vpack.c.bf16 %v4580_v44, %v4580_v44  ;;  %v4627_v54 = vadd.f32 %v4626_v36, %v4625_v60  ;;  %v3687_v58 = vadd.f32 %v3686_v57, %v3685_v56 }
 0x676   : > { %v4630_v52 = vsel %vm4531_vm14, %v4529_v25, 0.0  ;;  %v5599_v48 = vpack.c.bf16 %v7842_v37, %v7842_v37  ;;  %v3684_v47 = vadd.f32 %v3683_v62, %v3682_v19  ;;  %v5585_v50 = vpack.c.bf16 %v3677_v42, %v3677_v42 }
 0x677   : > { %v4586_v39 = vrot.slane %v4585_v10, 1  ;;  %v4631_v18 = vrot.slane %v4630_v52, 4  ;;  %v4628_v38 = vrot.slane %v4627_v54, 1  ;;  %v3688_v6 = vrot.slane %v3687_v58, 2 }
 0x678   : > { %v4637_v32 = vsel %vm4531_vm14, %v4530_v28, 0.0  ;;  %v3780_v55 = vsel %vm1156_vm4, %v7769_v33, %v3779_v22  ;;  %v4621_v34 = vrot.slane %v4620_v7, 1  ;;  %v4716_v12 = vunpack.c.l.b16 %v5596_v40 }
 0x679   : > { %v4587_v5 = vadd.f32 %v4586_v39, %v4585_v10  ;;  %v4632_v46 = vadd.f32 %v4631_v18, %v4630_v52  ;;  %v4714_v13 = vunpack.c.l.b16 %v5594_v63  ;;  %v3689_v3 = vadd.f32 %v3688_v6, %v3687_v58 }
 0x67a   : > { %v4638_v31 = vrot.slane %v4637_v32, 4  ;;  %v4728_v37 = vsel %vm1162_vm7, %v7840_v59, %v7810_v9  ;;  %v5586_v0 = vpack.c.bf16 %v3684_v47, %v3684_v47  ;;  %v3781_v21 = vsel %vm1158_vm5, %v7799_v30, %v3780_v55  ;;  %v5500_v47 = vld [vmem:[%s4757_s21] ss:$0 sm:$0xff]  ;;  %s4903_s21 = scalar_lea.vmem %s8040_s9, %s5605_s2 }
 0x67b   : > { %v5595_v17 = vpack.c.bf16 %v4587_v5, %v4587_v5  ;;  %v4633_v24 = vrot.slane %v4632_v46, 2  ;;  %v4629_v11 = vadd.f32 %v4628_v38, %v4627_v54  ;;  %v3690_v41 = vrot.slane %v3689_v3, 1  ;;  %v5905_v38 = vld [vmem:[#allocation2] sm:$0xff] }
 0x67c   : > { %v4639_v33 = vadd.f32 %v4638_v31, %v4637_v32  ;;  %v3769_v27 = vunpack.c.l.b16 %v5585_v50  ;;  %v4622_v19 = vadd.f32 %v4621_v34, %v4620_v7  ;;  %v4731_v20 = vsel %vm1154_vm3, %v7777_v8, %v4716_v12 }
 0x67d   : > { %v4715_v45 = vunpack.c.l.b16 %v5595_v17  ;;  %v4634_v23 = vadd.f32 %v4633_v24, %v4632_v46  ;;  %v4729_v15 = vsel %vm1164_vm8, %v4714_v13, %v4728_v37  ;;  %v3691_v16 = vadd.f32 %v3690_v41, %v3689_v3  ;;  %v5906_v46 = vld [vmem:[#allocation2 + $0x8] sm:$0xff] }
 0x67e   : > { %v4640_v9 = vrot.slane %v4639_v33, 2  ;;  %v3770_v59 = vunpack.c.l.b16 %v5586_v0  ;;  %v3782_v14 = vsel %vm1160_vm6, %v7838_v29, %v3781_v21  ;;  %v5601_v61 = vpack.c.bf16 %v4629_v11, %v4629_v11 }
 0x67f   : > { %v4730_v30 = vsel %vm1166_vm9, %v4715_v45, %v4729_v15  ;;  %v4635_v43 = vrot.slane %v4634_v23, 1  ;;  %v5587_v2 = vpack.c.bf16 %v3691_v16, %v3691_v16  ;;  %v5600_v1 = vpack.c.bf16 %v4622_v19, %v4622_v19  ;;  %v645_v19 = vld [vmem:[%s8347_s19] sm:$0xff]  ;;  %v5743_v45 = vld [vmem:[%s4903_s21 + $0x8] sm:$0xff]   ;;  %v5746_v15 = vld [vmem:[%s7915_s3 + $0x30] sm:$0xff]  }
 0x680   : > { %v4738_v26 = vpack.c.b16 %v4730_v30, %v4730_v30  ;;  %v4641_v42 = vadd.f32 %v4640_v9, %v4639_v33  ;;  %v4732_v60 = vsel %vm1156_vm4, %v7812_v51, %v4731_v20  ;;  %v4719_v56 = vunpack.c.l.b16 %v5599_v48  ;;  %v5745_v20 = vld [vmem:[%s7915_s3 + $0x38] sm:$0xff]   ;;  %v5747_v16 = vld [vmem:[%s7915_s3 + $0x28] sm:$0xff]   ;;  %v5748_v9 = vld [vmem:[%s7915_s3 + $0x20] sm:$0xff]  }
 0x681   : > { %v4636_v8 = vadd.f32 %v4635_v43, %v4634_v23  ;;  %v3783_v53 = vsel %vm1162_vm7, %v3769_v27, %v3782_v14  ;;  %v3771_v35 = vunpack.c.l.b16 %v5587_v2  ;;  %v4721_v4 = vunpack.c.l.b16 %v5601_v61  ;;  %v646_v27 = vld [vmem:[%s8347_s19 + $0x8] sm:$0xff]  ;;  %v5744_v23 = vld [vmem:[%s4903_s21] sm:$0xff]   ;;  %5652 = vmatpush3.bf16.msra.mxu0 %v5745_v20 }
 0x682   : > { %4743 = vst.msk [vmem:[#allocation3] sm:$0xf] %vm4742_vm10, %v4738_v26  ;;  %v4642_v44 = vrot.slane %v4641_v42, 1  ;;  %v3784_v29 = vsel %vm1164_vm8, %v3770_v59, %v3783_v53  ;;  %v4733_v7 = vsel %vm1158_vm5, %v4719_v56, %v4732_v60  ;;  %v4720_v25 = vunpack.c.l.b16 %v5600_v1  ;;  %5653 = vmatprep.subr.bf16.mxu0 %v5996_v49  ;;  %v5749_v59 = vld [vmem:[%s7915_s3 + $0x18] sm:$0xff]   ;;  %v5507_v1 = vld [vmem:[%s4841_s1] ss:$0 sm:$0xff] }
 0x683   : > { %v5602_v62 = vpack.c.bf16 %v4636_v8, %v4636_v8  ;;  %v3785_v36 = vsel %vm1166_vm9, %v3771_v35, %v3784_v29  ;;  %vm4794_vm4 = vcmask 523264   ;;  %v5508_v53 = vld [vmem:[%s4843_s20] ss:$0 sm:$0xff] }
 0x684   : > { %v4643_v57 = vadd.f32 %v4642_v44, %v4641_v42  ;;  %v3787_v51 = vpack.c.b16 %v3785_v36, %v3785_v36  ;;  %v4734_v10 = vsel %vm1160_vm6, %v4720_v25, %v4733_v7 }
 0x685   : > { %v4722_v22 = vunpack.c.l.b16 %v5602_v62  ;;  %v4735_v28 = vsel %vm1162_vm7, %v4721_v4, %v4734_v10  ;;  %5654 = vmatpush3.bf16.msra.mxu0 %v5746_v15  ;;  %v5511_v10 = vld [vmem:[%s4908_s25] ss:$0 sm:$0xff] }
 0x686   : > { %v5603_v40 = vpack.c.bf16 %v4643_v57, %v4643_v57  ;;  %3792 = vst.msk [vmem:[#allocation3 + $0x4] sm:$0xf] %vm3790_vm2, %v3787_v51  ;;  %5655 = vmatprep.subr.bf16.mxu0 %v5996_v49  ;;  %v5750_v51 = vld [vmem:[%s7915_s3 + $0x10] sm:$0xff]  }
 0x687   : > { %v4736_v54 = vsel %vm1164_vm8, %v4722_v22, %v4735_v28  ;;  %v5751_v22 = vld [vmem:[%s7915_s3 + $0x8] sm:$0xff]  }
 0x688   : > { %v4723_v63 = vunpack.c.l.b16 %v5603_v40  ;;  %v5752_v40 = vld [vmem:[%s7915_s3] sm:$0xff]   ;;  %s4994_s3 = scalar_lea.vmem %s8043_s12, %s5980_s27 }
 0x689   : > { %5656 = vmatpush3.bf16.msra.mxu0 %v5747_v16 }
 0x68a   : > { %v4737_v58 = vsel %vm1166_vm9, %v4723_v63, %v4736_v54  ;;  %5657 = vmatprep.subr.bf16.mxu0 %v5996_v49 }
 0x68b   : > { %v4739_v52 = vpack.c.b16 %v4737_v58, %v4737_v58 }
 0x68d   : > { %4744 = vst.msk [vmem:[#allocation3 + $0x4] sm:$0xf] %vm4742_vm10, %v4739_v52  ;;  %5658 = vmatpush3.bf16.msra.mxu0 %v5748_v9  ;;  %v5526_v9 = vld [vmem:[%s5093_s22] ss:$0 sm:$0xff] }
 0x68e   : > { %5659 = vmatprep.subr.bf16.mxu0 %v5996_v49 }
 0x691   : > { %5660 = vmatpush3.bf16.msra.mxu0 %v5749_v59 }
 0x692   : > { %5661 = vmatprep.subr.bf16.mxu0 %v5996_v49 }
 0x694   : > { %v5742_v48 = vld [vmem:[#allocation3] sm:$0xff]  }
 0x695   : > { %5640 = vmatmul.mubr.msk.bf16.vlgmr.msra.gmra.mxu1 %vm4794_vm4, %v5742_v48  ;;  %5662 = vmatpush3.bf16.msra.mxu0 %v5750_v51 }
 0x696   : > { %5647 = vmatprep.mubr.msk.bf16.mxu1 %vm5997_vm15, %v5996_v49  ;;  %5644 = vmatpush3.bf16.msra.mxu1 %v5743_v45 }
 0x697   : > { %5645 = vmatprep.subr.bf16.mxu1 %v5996_v49  ;;  %5663 = vmatprep.subr.bf16.mxu0 %v5996_v49 }
 0x699   : > { %5664 = vmatpush3.bf16.msra.mxu0 %v5751_v22 }
 0x69a   : > { %5646 = vmatpush3.bf16.msra.mxu1 %v5744_v23  ;;  %5665 = vmatprep.subr.bf16.mxu0 %v5996_v49  ;;  %v5517_v49 = vld [vmem:[%s4994_s3] ss:$0 sm:$0xff] }
 0x69d   : > { %5666 = vmatpush3.bf16.msra.mxu0 %v5752_v40 }
 0x755   : > { %v4832_v39 = vpop.f32.mrf.mxu1 }
 0x756   : > { %v4833_v18 = vadd.f32 %v5500_v47, %v4832_v39 }
 0x757   : > { %v5641_v50 = vpop.f32.mrf.mxu1 }
 0x758   : > { %v4839_v6 = vadd.f32 %v5905_v38, %v4833_v18 }
 0x759   : > { %v4835_v32 = vpop.f32.mrf.mxu1 }
 0x75a   : > { %v4836_v55 = vadd.f32 %v5500_v47, %v4835_v32  ;;  %v4845_v34 = vsel %vm688_vm1, %v4839_v6, 0.0 }
 0x75b   : > { %4846 = vadd.xlane.f32.xlu1 %v4845_v34  ;;  %v5642_v5 = vpop.f32.mrf.mxu1 }
 0x75c   : > { %v4840_v12 = vadd.f32 %v5906_v46, %v4836_v55 }
 0x75e   : > { %v4848_v13 = vsel %vm688_vm1, %v4840_v12, 0.0 }
 0x75f   : > { %4849 = vadd.xlane.f32.xlu0 %v4848_v13 }
 0x7e4   : > { %v4847_v3 = vpop.xlane.xlu1 %4846 }
 0x7e5   : > { %v4852_v31 = vmul.f32 0.03125, %v4847_v3 }
 0x7e7   : > { %v4854_v37 = vsub.f32 %v4839_v6, %v4852_v31 }
 0x7e8   : > { %v4850_v0 = vpop.xlane.xlu0 %4849 }
 0x7e9   : > { %v4853_v17 = vmul.f32 0.03125, %v4850_v0  ;;  %v4856_v24 = vmul.f32 %v4854_v37, %v4854_v37 }
 0x7eb   : > { %v4855_v21 = vsub.f32 %v4840_v12, %v4853_v17  ;;  %v4858_v11 = vsel %vm688_vm1, %v4856_v24, 0.0 }
 0x7ec   : > { %4859 = vadd.xlane.f32.xlu0 %v4858_v11 }
 0x7ed   : > { %v4857_v41 = vmul.f32 %v4855_v21, %v4855_v21 }
 0x7ef   : > { %v4861_v33 = vsel %vm688_vm1, %v4857_v41, 0.0 }
 0x7f0   : > { %4862 = vadd.xlane.f32.xlu1 %v4861_v33 }
 0x801   : > { %4895 = vperm.xlu1 %5730, %v646_v27  }
 0x802   : > { %4890 = vperm.xlu0 %5731, %v645_v19  }
 0x875   : > { %v4860_v14 = vpop.xlane.xlu0 %4859 }
 0x876   : > { %v4864_v30 = vmul.f32 0.03125, %v4860_v14  ;;  %v5527_v14 = vld [vmem:[%s5095_s24] ss:$0 sm:$0xff] }
 0x878   : > { %v4866_v43 = vadd.f32 1e-05, %v4864_v30 }
 0x879   : > { %v4863_v26 = vpop.xlane.xlu1 %4862 }
 0x87a   : > { %5897 = vrsqrt.f32 %v4866_v43  ;;  %v4865_v61 = vmul.f32 0.03125, %v4863_v26 }
 0x87c   : > { %v4867_v2 = vadd.f32 1e-05, %v4865_v61 }
 0x87d   : > { %v7935_v4 = vpop.permute.xlu1 %4895  ;;  %v7937_v7 = vpop.permute.xlu0 %4890 }
 0x87e   : > { %5899 = vrsqrt.f32 %v4867_v2 }
 0x887   : > { %v5898_v42 = vpop.eup %5897 }
 0x888   : > { %v4870_v60 = vmul.f32 %v5898_v42, %v4854_v37 }
 0x88a   : > { %v4878_v8 = vmul.f32 %v5507_v1, %v4870_v60 }
 0x88b   : > { %v5900_v56 = vpop.eup %5899 }
 0x88c   : > { %v4871_v35 = vmul.f32 %v5900_v56, %v4855_v21  ;;  %v4886_v29 = vadd.f32 %v5508_v53, %v4878_v8 }
 0x88e   : > { %v4879_v44 = vmul.f32 %v5507_v1, %v4871_v35  ;;  %v4898_v57 = vmul.f32 %v7937_v7, %v4886_v29 }
 0x890   : > { %v4887_v62 = vadd.f32 %v5508_v53, %v4879_v44 }
 0x892   : > { %v4899_v36 = vmul.f32 %v7935_v4, %v4887_v62 }
 0x894   : > { %v4900_v25 = vpack.c.bf16 %v4899_v36, %v4898_v57 }
 0x896   : > { %5648 = vmatmul.mubr.msk.bf16.vlgmr.msra.gmra.mxu1 %vm688_vm1, %v4900_v25 }
 0x956   : > { %v4965_v28 = vpop.f32.mrf.mxu1 }
 0x957   : > { %v4966_v54 = vadd.f32 %v5511_v10, %v4965_v28 }
 0x958   : > { %v5649_v63 = vpop.f32.mrf.mxu1 }
 0x959   : > { %v4972_v47 = vmax.f32 %v4966_v54, 0.0 }
 0x95a   : > { %v4968_v58 = vpop.f32.mrf.mxu1 }
 0x95b   : > { %v4969_v52 = vadd.f32 %v5511_v10, %v4968_v58 }
 0x95c   : > { %v5650_v48 = vpop.f32.mrf.mxu1 }
 0x95d   : > { %v4973_v39 = vmax.f32 %v4969_v52, 0.0 }
 0x95f   : > { %v4974_v18 = vpack.c.bf16 %v4973_v39, %v4972_v47 }
 0x961   : > { %5668 = vmatmul.mubr.bf16.vlgmr.msra.gmra.mxu0 %v4974_v18 }
 0xa21   : > { %v5084_v50 = vpop.f32.mrf.mxu0 }
 0xa22   : > { %v5085_v38 = vadd.f32 %v5517_v49, %v5084_v50 }
 0xa23   : > { %v5669_v6 = vpop.f32.mrf.mxu0 }
 0xa24   : > { %v5091_v32 = vadd.f32 %v5085_v38, %v4898_v57 }
 0xa25   : > { %v5087_v55 = vpop.f32.mrf.mxu0 }
 0xa26   : > { %v5088_v34 = vadd.f32 %v5517_v49, %v5087_v55  ;;  %v5097_v5 = vsel %vm688_vm1, %v5091_v32, 0.0 }
 0xa27   : > { %5098 = vadd.xlane.f32.xlu1 %v5097_v5  ;;  %v5670_v46 = vpop.f32.mrf.mxu0 }
 0xa28   : > { %v5092_v12 = vadd.f32 %v5088_v34, %v4899_v36 }
 0xa2a   : > { %v5100_v13 = vsel %vm688_vm1, %v5092_v12, 0.0 }
 0xa2b   : > { %5101 = vadd.xlane.f32.xlu0 %v5100_v13 }
 0xab0   : > { %v5099_v3 = vpop.xlane.xlu1 %5098 }
 0xab1   : > { %v5103_v31 = vmul.f32 0.03125, %v5099_v3 }
 0xab3   : > { %v5105_v37 = vsub.f32 %v5091_v32, %v5103_v31 }
 0xab4   : > { %v5102_v0 = vpop.xlane.xlu0 %5101 }
 0xab5   : > { %v5104_v17 = vmul.f32 0.03125, %v5102_v0  ;;  %v5107_v24 = vmul.f32 %v5105_v37, %v5105_v37 }
 0xab7   : > { %v5106_v21 = vsub.f32 %v5092_v12, %v5104_v17  ;;  %v5109_v11 = vsel %vm688_vm1, %v5107_v24, 0.0 }
 0xab8   : > { %5110 = vadd.xlane.f32.xlu0 %v5109_v11 }
 0xab9   : > { %v5108_v41 = vmul.f32 %v5106_v21, %v5106_v21 }
 0xabb   : > { %v5112_v33 = vsel %vm688_vm1, %v5108_v41, 0.0 }
 0xabc   : > { %5113 = vadd.xlane.f32.xlu1 %v5112_v33 }
 0xb41   : > { %v5111_v27 = vpop.xlane.xlu0 %5110 }
 0xb42   : > { %v5115_v19 = vmul.f32 0.03125, %v5111_v27 }
 0xb44   : > { %v5117_v45 = vadd.f32 1e-05, %v5115_v19 }
 0xb45   : > { %v5114_v23 = vpop.xlane.xlu1 %5113 }
 0xb46   : > { %5901 = vrsqrt.f32 %v5117_v45  ;;  %v5116_v20 = vmul.f32 0.03125, %v5114_v23 }
 0xb48   : > { %v5118_v15 = vadd.f32 1e-05, %v5116_v20 }
 0xb4a   : > { %5903 = vrsqrt.f32 %v5118_v15 }
 0xb53   : > { %v5902_v16 = vpop.eup %5901 }
 0xb54   : > { %v5121_v59 = vmul.f32 %v5902_v16, %v5105_v37 }
 0xb56   : > { %v5129_v30 = vmul.f32 %v5526_v9, %v5121_v59 }
 0xb57   : > { %v5904_v43 = vpop.eup %5903 }
 0xb58   : > { %v5137_v26 = vadd.f32 %v5527_v14, %v5129_v30  ;;  %v5122_v61 = vmul.f32 %v5904_v43, %v5106_v21 }
 0xb5a   : > { %v5139_v2 = vmul.f32 %v5137_v26, %v7937_v7  ;;  %v5130_v42 = vmul.f32 %v5526_v9, %v5122_v61 }
 0xb5c   : > { %5141 = vst.msk [vmem:[#allocation2] sm:$0xff] %vm688_vm1, %v5139_v2  ;;  %v5138_v1 = vadd.f32 %v5527_v14, %v5130_v42  ;;  %5146 = sbr.rel (%p5528_p5) target bundleno = 3267 (0xcc3), region = 96 }
 0xb5e   : > { %v5140_v60 = vmul.f32 %v5138_v1, %v7935_v4 }
 0xb60   : > { %5142 = vst.msk [vmem:[#allocation2 + $0x8] sm:$0xff] %vm688_vm1, %v5140_v60 }
 0xb61   : > { %v5147_v8 = vld [vmem:[%s8348_s23] sm:$0xff]  ;;  %v5998_v56 = vmov 1   ;;  %v5148_v53 = vld [vmem:[%s8348_s23 + $0x8] sm:$0xff]  ;;  %v5999_v44 = vmov 0.0   ;;  %vm6000_vm5 = vmmov 0   ;;  %vm5175_vm6 = vcmask 253952  }
 0xb62   : > { %5907 = vset.pattern.permute.xlu0 %v5998_v56  ;;  %v5908_v35 = vld [vmem:[%s8046_s15 + $0x8] sm:$0xff]   ;;  %5671 = vmatprep.subr.bf16.mxu0 %v5999_v44  ;;  %v5909_v29 = vld [vmem:[%s8046_s15] sm:$0xff]   ;;  %vm5277_vm7 = vcmask 122880  }
 0xb63   : > { %5151 = vperm.xlu0 %5907, %v5147_v8   ;;  %5672 = vmatpush3.bf16.msra.mxu0 %v5908_v35  ;;  %v5529_v55 = vld [vmem:[%s8047_s16] ss:$0 sm:$0xff]  ;;  %v8349_v12 = vld [vmem:[#allocation12_spill] sm:$0xff] }
 0xb64   : > { %5673 = vmatprep.subr.bf16.mxu0 %v5999_v44  ;;  %5675 = vmatprep.mubr.msk.bf16.mxu0 %vm6000_vm5, %v5999_v44 }
 0xb67   : > { %5156 = vperm.xlu0 %5907, %v5148_v53   ;;  %5674 = vmatpush3.bf16.msra.mxu0 %v5909_v29 }
 0xbde   : > { %v5152_v62 = vpop.permute.xlu0 %5151 }
 0xbdf   : > { %v5159_v4 = vmul.f32 %v5152_v62, %v5139_v2 }
 0xbe1   : > { %v5161_v7 = vsel %vm688_vm1, %v5159_v4, 0.0 }
 0xbe2   : > { %v5162_v36 = vrot.slane %v5161_v7, 4  ;;  %v5157_v57 = vpop.permute.xlu0 %5156 }
 0xbe3   : > { %v5160_v25 = vmul.f32 %v5157_v57, %v5140_v60 }
 0xbe4   : > { %v5163_v51 = vadd.f32 %v5162_v36, %v5161_v7 }
 0xbe5   : > { %v5168_v22 = vsel %vm688_vm1, %v5160_v25, 0.0 }
 0xbe6   : > { %v5164_v40 = vrot.slane %v5163_v51, 2  ;;  %v5169_v10 = vrot.slane %v5168_v22, 4 }
 0xbe8   : > { %v5165_v28 = vadd.f32 %v5164_v40, %v5163_v51  ;;  %v5170_v63 = vadd.f32 %v5169_v10, %v5168_v22 }
 0xbea   : > { %v5166_v54 = vrot.slane %v5165_v28, 1  ;;  %v5171_v58 = vrot.slane %v5170_v63, 2 }
 0xbec   : > { %v5167_v52 = vadd.f32 %v5166_v54, %v5165_v28  ;;  %v5172_v48 = vadd.f32 %v5171_v58, %v5170_v63 }
 0xbee   : > { %5176 = vst.msk [vmem:[#allocation4] sm:$0x1] %vm5175_vm6, %v5167_v52  ;;  %v5173_v47 = vrot.slane %v5172_v48, 1  ;;  %v5178_v18 = vpack.c.bf16 %v5167_v52, %v5167_v52 }
 0xbf0   : > { %v5174_v39 = vadd.f32 %v5173_v47, %v5172_v48  ;;  %v5193_v50 = vunpack.c.l.b16 %v5178_v18 }
 0xbf2   : > { %5177 = vst.msk [vmem:[#allocation4 + $0x1] sm:$0x1] %vm5175_vm6, %v5174_v39  ;;  %v5179_v49 = vpack.c.bf16 %v5174_v39, %v5174_v39 }
 0xbf4   : > { %v5194_v38 = vunpack.c.l.b16 %v5179_v49 }
 0xbf6   : > { %v5195_v6 = vsel %vm1154_vm3, %v5194_v38, %v5193_v50 }
 0xbf7   : > { %v5196_v32 = vpack.c.b16 %v5195_v6, %v5195_v6 }
 0xbf9   : > { %5676 = vmatmul.mubr.msk.bf16.vlgmr.msra.gmra.mxu0 %vm688_vm1, %v5196_v32 }
 0xcb9   : > { %v5246_v34 = vpop.f32.mrf.mxu0 }
 0xcba   : > { %v5247_v5 = vadd.f32 %v5529_v55, %v5246_v34 }
 0xcbb   : > { %v5677_v46 = vpop.f32.mrf.mxu0 }
 0xcbc   : > { %v5259_v13 = vrot.slane %v5247_v5, %v8349_v12 }
 0xcbd   : > { %v5249_v3 = vpop.f32.mrf.mxu0 }
 0xcbe   : > { %v5260_v31 = vcombine.high %v5259_v13, %v5259_v13  ;;  %v5267_v37 = vrot.slane %v5259_v13, %v8349_v12 }
 0xcbf   : > { %v5678_v0 = vpop.f32.mrf.mxu0 }
 0xcc0   : > { %v5274_v17 = vrot.slane %v5260_v31, %v8349_v12  ;;  %5278 = vst.msk [vmem:[#allocation6] sm:$0x1] %vm5277_vm7, %v5267_v37 }
 0xcc2   : > { %5279 = vst.msk [vmem:[#allocation6 + $0x1] sm:$0x1] %vm5277_vm7, %v5274_v17 }
 0xcc3 PF: > { %s8350_s24 = sadd.s32 4294967295, %s5988_s29   ;;  %s6001_s25 = smov [#allocation4]  }
 0xcc4   : > { %p7996_p6 = scmp.eq.s32.totalorder %s8350_s24, 1  ;;  %s5289_s23 = sshll.u32 %s6001_s25, 4  ;;  %s5290_s23 = int_to_ptr.vmem [resolvable:$true] %s5289_s23 }
 0xcc5   : > { %s5910_s30 = scalar_lea.vmem %s5290_s23, 32  ;;  %p5917_p10 = scmp.lt.s32.totalorder %s5290_s23, %s5290_s23 }
 0xcc6   : > { %p5911_p7 = scmp.ne.s32.totalorder %s5290_s23, %s5910_s30  ;;  %p5918_p11 = scmp.lt.s32.totalorder %s5910_s30, %s5910_s30 }
 0xcc8   : > { %p5912_p8 = pnand %p5911_p7, %p7996_p6  ;;  %p5919_p12 = por %p5918_p11, %p5917_p10 }
 0xcca   : > { %p5913_p9 = pneg %p5912_p8 }
 0xccc   : > { %p5920_p13 = pnand %p5919_p12, %p5913_p9 }
 0xcce   : > { %5923 = shalt.err (!%p5920_p13)
}
 0xccf   : > { %s6002_s3 = smov 16   ;;  %s6003_s19 = smov 1  }
 0xcd0   : > { %5680 = dma.vmem_to_hbm [thread:$0]  (%p7996_p6), %s5290_s23, 32, %s8048_s17, [#allocation5], %s6002_s3, %s6002_s3, %s6003_s19  }
 0xcd1   : > { %s6004_s22 = smov [#allocation6]  }
 0xcd2   : > { %s5305_s2 = sshll.u32 %s6004_s22, 4  ;;  %s5306_s2 = int_to_ptr.vmem [resolvable:$true] %s5305_s2 }
 0xcd3   : > { %s5934_s20 = scalar_lea.vmem %s5306_s2, 32  ;;  %p5941_p3 = scmp.lt.s32.totalorder %s5306_s2, %s5306_s2 }
 0xcd4   : > { %p5935_p0 = scmp.ne.s32.totalorder %s5306_s2, %s5934_s20  ;;  %p5942_p4 = scmp.lt.s32.totalorder %s5934_s20, %s5934_s20 }
 0xcd6   : > { %p5936_p1 = pnand %p5935_p0, %p7996_p6  ;;  %p5943_p5 = por %p5942_p4, %p5941_p3 }
 0xcd8   : > { %p5937_p2 = pneg %p5936_p1 }
 0xcda   : > { %p5944_p7 = pnand %p5943_p5, %p5937_p2 }
 0xcdc   : > { %5947 = shalt.err (!%p5944_p7)
}
 0xcdd   : > { %5682 = dma.vmem_to_hbm [thread:$0]  (%p7996_p6), %s5306_s2, 32, %s8049_s18, [#allocation7], %s6002_s3, %s6002_s3, %s6003_s19  }
 0xcde   : > { %5971 = dma.done.wait (%p7996_p6), [#allocation5], 32  }
 0xcdf   : > { %5973 = vsyncadd (%p7996_p6), [#allocation5], 4294967264 }
 0xce0   : > { %5975 = dma.done.wait (%p7996_p6), [#allocation7], 32  }
 0xce1   : > { %5977 = vsyncadd (%p7996_p6), [#allocation7], 4294967264 }
 0xce2 PF: > { %s31_s29 = sadd.s32 1, %s5988_s29   ;;  %s8352_s27 = smov %s5984_s28 }
 0xce3   : > { %p28_p8 = scmp.ge.s32.totalorder %s31_s29, 4   ;;  %s8353_s28 = smov %s8355_s0 }
 0xce5   :  { %30 = sbr.rel (!%p28_p8) target bundleno = 8 (0x8), region = 151 }
 0xcea   :  { %5325 = vsyncpa [#allocation5], 1 }
 0xceb   :  { %5327 = vsyncpa [#allocation5 + $0x1], 1 }
 0xcec   :  { %5328 = vsyncpa [#allocation7], 1 }

</bundles_post_ra>
